<compile_context>
chip_gen: v7x
topology: tpu7x:2x2x1
jax: 0.10.0
libtpu: 0.0.40
codegen_flags: <defaults>
</compile_context>

<pallas_src>
import functools

import jax
import jax.numpy as jnp
from jax import lax
from jax.experimental import pallas as pl
from jax.experimental.pallas import tpu as pltpu


# ----------------------------------------------------------------------------
# One fused kernel: the whole encoder forward for a single batch item.
# ----------------------------------------------------------------------------
def encoder_kernel(nr_heads, kernel_size, emit_att,
                   x_ref, pos_ref, mkey_ref,
                   convw_ref, convs_ref, convsh_ref,
                   linw_ref, linb_ref,
                   wqkv_ref, bqkv_ref, wo_ref, bo_ref,
                   alpha_ref,
                   o_ref, *rest):
    if emit_att:
        att0_ref, att1_ref, att2_ref, xp_ref, ctx_ref = rest
        att_refs = (att0_ref, att1_ref, att2_ref)
    else:
        xp_ref, ctx_ref = rest
        att_refs = None

    T, C = x_ref.shape[1], x_ref.shape[2]
    K = kernel_size
    pad = K // 2
    H = nr_heads
    Dh = C // H
    inv_sqrt_dh = 1.0 / float(Dh) ** 0.5

    x = x_ref[0]                                              # (T, C) f32

    # --- pre_net: 3x [Conv1d(k=5, 'same') + folded BN + ReLU] -----------------
    # Zero the halo rows of the scratch once; they stay zero across layers.
    xp_ref[0:pad, :] = jnp.zeros((pad, C), jnp.float32)
    xp_ref[pad + T:pad + T + pad, :] = jnp.zeros((pad, C), jnp.float32)

    for layer in range(3):
        xp_ref[pad:pad + T, :] = x                            # current activation
        # y[t] = sum_k x[t + k - pad] @ W_k  (K full-depth matmuls, f32 accum)
        y = jnp.dot(xp_ref[0:T, :].astype(jnp.bfloat16),
                    convw_ref[layer * K],
                    preferred_element_type=jnp.float32)
        for k in range(1, K):
            y = y + jnp.dot(xp_ref[k:k + T, :].astype(jnp.bfloat16),
                            convw_ref[layer * K + k],
                            preferred_element_type=jnp.float32)
        x = jnp.maximum(y * convs_ref[layer] + convsh_ref[layer], 0.0)
        # F.dropout(p=0.1, training=False) -> identity

    # --- Linear + ReLU, then x + pos_alpha * pos_emb (fused) ------------------
    y = jnp.dot(x.astype(jnp.bfloat16), linw_ref[...],
                preferred_element_type=jnp.float32) + linb_ref[...]
    x = jnp.maximum(y, 0.0) + alpha_ref[0] * pos_ref[0]
    # F.dropout(p=0.1, training=False) -> identity

    # --- key-padding mask (1.0 = padded); hoist broadcasts once ---------------
    mkey = mkey_ref[0]                                        # (1, T) f32
    bias = jnp.broadcast_to(mkey * (-1e9), (T, T))            # additive key mask
    keep = jnp.broadcast_to(1.0 - mkey, (T, T))               # masked_fill factor

    # --- 3 self-attention blocks ----------------------------------------------
    for blk in range(3):
        qkv = jnp.dot(x.astype(jnp.bfloat16), wqkv_ref[blk],
                      preferred_element_type=jnp.float32) + bqkv_ref[blk]
        qkv_bf = qkv.astype(jnp.bfloat16)
        for h in range(H):                                    # H = 4, static loop
            qh = qkv_bf[:, h * Dh:(h + 1) * Dh]
            kh = qkv_bf[:, C + h * Dh:C + (h + 1) * Dh]
            vh = qkv_bf[:, 2 * C + h * Dh:2 * C + (h + 1) * Dh]
            # contract last dims: no k^T materialized
            s = lax.dot_general(qh, kh, (((1,), (1,)), ((), ())),
                                preferred_element_type=jnp.float32)
            s = s * inv_sqrt_dh + bias
            s = s - s.max(axis=-1, keepdims=True)
            e = jnp.exp(s)
            a = e * pl.reciprocal(e.sum(axis=-1, keepdims=True), approx=True)
            if emit_att:
                att_refs[blk][0, h] = (a * keep).astype(jnp.bfloat16)
            # write this head's context into its slice of the (T, C) slab
            ctx_ref[:, h * Dh:(h + 1) * Dh] = jnp.dot(
                a.astype(jnp.bfloat16), vh, preferred_element_type=jnp.float32)
        out = jnp.dot(ctx_ref[...].astype(jnp.bfloat16), wo_ref[blk],
                      preferred_element_type=jnp.float32) + bo_ref[blk]
        x = x + out                                           # residual

    o_ref[0] = x


# ----------------------------------------------------------------------------
# Wrapper: single pallas_call, grid over batch.
# ----------------------------------------------------------------------------
def encoder_forward(params, text_embedding, mask, pos_emb,
                    nr_heads=4, kernel_size=5, return_attention=True):
    B, T, C = text_embedding.shape
    H = nr_heads
    K = kernel_size

    # mask: (B, T, 1) bool, True = padded.  -> key-padding mask (B, 1, T).
    mask_key = jnp.transpose(mask.astype(jnp.float32), (0, 2, 1))

    kern = functools.partial(encoder_kernel, nr_heads, kernel_size,
                             return_attention)

    out_shape = [jax.ShapeDtypeStruct((B, T, C), jnp.float32)]
    out_specs = [pl.BlockSpec((1, T, C), lambda b: (b, 0, 0))]
    if return_attention:
        for _ in range(3):
            out_shape.append(jax.ShapeDtypeStruct((B, H, T, T), jnp.bfloat16))
            out_specs.append(pl.BlockSpec((1, H, T, T), lambda b: (b, 0, 0, 0)))

    in_specs = [
        pl.BlockSpec((1, T, C), lambda b: (b, 0, 0)),          # x
        pl.BlockSpec((1, T, C), lambda b: (b, 0, 0)),          # pos_emb
        pl.BlockSpec((1, 1, T), lambda b: (b, 0, 0)),          # key mask
        pl.BlockSpec((3 * K, C, C), lambda b: (0, 0, 0)),      # conv tap weights
        pl.BlockSpec((3, 1, C), lambda b: (0, 0, 0)),          # conv scale
        pl.BlockSpec((3, 1, C), lambda b: (0, 0, 0)),          # conv shift
        pl.BlockSpec((C, C), lambda b: (0, 0)),                # linear weight
        pl.BlockSpec((1, C), lambda b: (0, 0)),                # linear bias
        pl.BlockSpec((3, C, 3 * C), lambda b: (0, 0, 0)),      # fused QKV weights
        pl.BlockSpec((3, 1, 3 * C), lambda b: (0, 0, 0)),      # fused QKV biases
        pl.BlockSpec((3, C, C), lambda b: (0, 0, 0)),          # out-proj weights
        pl.BlockSpec((3, 1, C), lambda b: (0, 0, 0)),          # out-proj biases
        pl.BlockSpec(memory_space=pltpu.MemorySpace.SMEM),     # pos_alpha scalar
    ]

    scratch_shapes = [
        pltpu.VMEM((T + 2 * (K // 2), C), jnp.float32),        # conv halo buffer
        pltpu.VMEM((T, C), jnp.float32),                       # per-block ctx slab
    ]

    outs = pl.pallas_call(
        kern,
        out_shape=tuple(out_shape),
        grid=(B,),
        in_specs=in_specs,
        out_specs=tuple(out_specs),
        scratch_shapes=scratch_shapes,
        compiler_params=pltpu.CompilerParams(
            dimension_semantics=("parallel",),
            vmem_limit_bytes=48 * 1024 * 1024),
    )(text_embedding, pos_emb, mask_key,
      params["conv_w"], params["conv_scale"], params["conv_shift"],
      params["lin_w"], params["lin_b"],
      params["att_wqkv"], params["att_bqkv"], params["att_wo"], params["att_bo"],
      params["pos_alpha"])

    if return_attention:
        x_out, a0, a1, a2 = outs
        return x_out, (a0, a1, a2)
    return outs[0], ()


# ----------------------------------------------------------------------------
# Parameter init (deterministic, synthetic).  Matmul weights stored in bf16;
# BN folding, biases, mask math stay f32.
# ----------------------------------------------------------------------------
def init_params(key, C, nr_heads, kernel_size=5, eps=1e-5):
    K = kernel_size
    keys = jax.random.split(key, 64)
    ki = iter(range(64))

    conv_w, conv_scale, conv_shift = [], [], []
    for _ in range(3):
        # tap-major weight layout: w[k] is the (C_in, C_out) matrix of tap k
        w = 0.05 * jax.random.normal(keys[next(ki)], (K, C, C), jnp.float32)
        b = 0.01 * jax.random.normal(keys[next(ki)], (1, C), jnp.float32)
        gamma = 1.0 + 0.01 * jax.random.normal(keys[next(ki)], (1, C), jnp.float32)
        beta = 0.01 * jax.random.normal(keys[next(ki)], (1, C), jnp.float32)
        run_mean = jnp.zeros((1, C), jnp.float32)
        run_var = jnp.ones((1, C), jnp.float32)
        # Fold eval-mode BatchNorm + conv bias into scale / shift.
        scale = gamma / jnp.sqrt(run_var + eps)
        shift = beta - run_mean * scale + b * scale
        conv_w.append(w)
        conv_scale.append(scale)
        conv_shift.append(shift)

    params = {
        "conv_w": jnp.concatenate(conv_w, axis=0).astype(jnp.bfloat16),  # (3K,C,C)
        "conv_scale": jnp.stack(conv_scale),                             # (3,1,C)
        "conv_shift": jnp.stack(conv_shift),                             # (3,1,C)
        "lin_w": (0.05 * jax.random.normal(keys[next(ki)], (C, C), jnp.float32)
                  ).astype(jnp.bfloat16),
        "lin_b": 0.01 * jax.random.normal(keys[next(ki)], (1, C), jnp.float32),
        "pos_alpha": jnp.ones((1,), jnp.float32),                        # torch.ones(1)
    }

    wqkv, bqkv, wo, bo = [], [], [], []
    for _ in range(3):
        wq = 0.05 * jax.random.normal(keys[next(ki)], (C, C), jnp.float32)
        wk = 0.05 * jax.random.normal(keys[next(ki)], (C, C), jnp.float32)
        wv = 0.05 * jax.random.normal(keys[next(ki)], (C, C), jnp.float32)
        w_o = 0.05 * jax.random.normal(keys[next(ki)], (C, C), jnp.float32)
        bq = 0.01 * jax.random.normal(keys[next(ki)], (1, C), jnp.float32)
        bk = 0.01 * jax.random.normal(keys[next(ki)], (1, C), jnp.float32)
        bv = 0.01 * jax.random.normal(keys[next(ki)], (1, C), jnp.float32)
        b_o = 0.01 * jax.random.normal(keys[next(ki)], (1, C), jnp.float32)
        wqkv.append(jnp.concatenate([wq, wk, wv], axis=1))       # (C, 3C)
        bqkv.append(jnp.concatenate([bq, bk, bv], axis=1))       # (1, 3C)
        wo.append(w_o)
        bo.append(b_o)

    params["att_wqkv"] = jnp.stack(wqkv).astype(jnp.bfloat16)    # (3, C, 3C)
    params["att_bqkv"] = jnp.stack(bqkv)                         # (3, 1, 3C)
    params["att_wo"] = jnp.stack(wo).astype(jnp.bfloat16)        # (3, C, C)
    params["att_bo"] = jnp.stack(bo)                             # (3, 1, C)
    return params


# ----------------------------------------------------------------------------
# Pure-JAX f32 reference (same folded/bf16-valued weights), for a sanity check.
# ----------------------------------------------------------------------------
def encoder_reference(params, x, mask, pos_emb, nr_heads=4, kernel_size=5):
    B, T, C = x.shape
    K = kernel_size
    pad = K // 2
    H = nr_heads
    Dh = C // H
    hi = lax.Precision.HIGHEST

    cw = params["conv_w"].astype(jnp.float32).reshape(3, K, C, C)
    for layer in range(3):
        xp = jnp.pad(x, ((0, 0), (pad, pad), (0, 0)))
        y = sum(jnp.einsum("btc,cd->btd", xp[:, k:k + T], cw[layer, k],
                           precision=hi) for k in range(K))
        x = jnp.maximum(
            y * params["conv_scale"][layer] + params["conv_shift"][layer], 0.0)

    y = jnp.einsum("btc,cd->btd", x, params["lin_w"].astype(jnp.float32),
                   precision=hi) + params["lin_b"]
    x = jnp.maximum(y, 0.0) + params["pos_alpha"][0] * pos_emb

    mkey = jnp.transpose(mask.astype(jnp.float32), (0, 2, 1))    # (B, 1, T)
    bias = (mkey * (-1e9))[:, None]                              # (B, 1, 1, T)
    keep = (1.0 - mkey)[:, None]                                 # (B, 1, 1, T)

    atts = []
    for blk in range(3):
        qkv = jnp.einsum("btc,cd->btd", x,
                         params["att_wqkv"][blk].astype(jnp.float32),
                         precision=hi) + params["att_bqkv"][blk]
        q, k_, v = qkv[..., :C], qkv[..., C:2 * C], qkv[..., 2 * C:]
        q = q.reshape(B, T, H, Dh).transpose(0, 2, 1, 3)
        k_ = k_.reshape(B, T, H, Dh).transpose(0, 2, 1, 3)
        v = v.reshape(B, T, H, Dh).transpose(0, 2, 1, 3)
        s = jnp.einsum("bhqd,bhkd->bhqk", q, k_, precision=hi) / jnp.sqrt(Dh)
        a = jax.nn.softmax(s + bias, axis=-1)
        atts.append(a * keep)
        ctx = jnp.einsum("bhqk,bhkd->bhqd", a, v,
                         precision=hi).transpose(0, 2, 1, 3).reshape(B, T, C)
        x = x + jnp.einsum("btc,cd->btd", ctx,
                           params["att_wo"][blk].astype(jnp.float32),
                           precision=hi) + params["att_bo"][blk]
    return x, atts


if __name__ == "__main__":
    B, T, C, H = 2, 16, 128, 4    # C=128 keeps activation/weight blocks lane-dense

    params = init_params(jax.random.PRNGKey(0), C, H)

    k1, k2 = jax.random.split(jax.random.PRNGKey(0), 2)
    text_embedding = jax.random.normal(k1, (B, T, C), jnp.float32)
    pos_emb = jax.random.normal(k2, (B, T, C), jnp.float32)

    # padding mask: True at padded positions (sequence lengths 16 and 12)
    lengths = jnp.array([16, 12])
    mask = (jnp.arange(T)[None, :] >= lengths[:, None])[:, :, None]  # (B, T, 1)

    x_out, att_heads = encoder_forward(params, text_embedding, mask, pos_emb, H)

    jax.block_until_ready(x_out)
    for a in att_heads:
        jax.block_until_ready(a)

    assert x_out.shape == (B, T, C)
    assert all(a.shape == (B, H, T, T) and a.dtype == jnp.bfloat16
               for a in att_heads)

    # Sanity check against the pure-JAX reference (bf16 operands -> loose tol).
    ref_x, ref_atts = encoder_reference(params, text_embedding, mask, pos_emb, H)
    err_x = float(jnp.max(jnp.abs(x_out - ref_x)))
    err_a = max(float(jnp.max(jnp.abs(a.astype(jnp.float32) - ra)))
                for a, ra in zip(att_heads, ref_atts))
    assert err_x < 1e-1, f"x mismatch: {err_x}"
    assert err_a < 3e-2, f"att mismatch: {err_a}"

    print("KERNEL_OK")
</pallas_src>

<mosaic_0001>
module attributes {stable_mosaic.version = 11 : i64} {
  func.func @encoder_kernel(%arg0: i32, %arg1: memref<1x16x128xf32, #tpu.memory_space<vmem>>, %arg2: memref<1x16x128xf32, #tpu.memory_space<vmem>>, %arg3: memref<1x1x16xf32, #tpu.memory_space<vmem>>, %arg4: memref<15x128x128xbf16, #tpu.memory_space<vmem>>, %arg5: memref<3x1x128xf32, #tpu.memory_space<vmem>>, %arg6: memref<3x1x128xf32, #tpu.memory_space<vmem>>, %arg7: memref<128x128xbf16, #tpu.memory_space<vmem>>, %arg8: memref<1x128xf32, #tpu.memory_space<vmem>>, %arg9: memref<3x128x384xbf16, #tpu.memory_space<vmem>>, %arg10: memref<3x1x384xf32, #tpu.memory_space<vmem>>, %arg11: memref<3x128x128xbf16, #tpu.memory_space<vmem>>, %arg12: memref<3x1x128xf32, #tpu.memory_space<vmem>>, %arg13: memref<1xf32, #tpu.memory_space<smem>>, %arg14: memref<1x16x128xf32, #tpu.memory_space<vmem>>, %arg15: memref<1x4x16x16xbf16, #tpu.memory_space<vmem>>, %arg16: memref<1x4x16x16xbf16, #tpu.memory_space<vmem>>, %arg17: memref<1x4x16x16xbf16, #tpu.memory_space<vmem>>, %arg18: memref<20x128xf32, #tpu.memory_space<vmem>>, %arg19: memref<16x128xf32, #tpu.memory_space<vmem>>) attributes {dimension_semantics = [#tpu.dimension_semantics<parallel>], iteration_bounds = array<i64: 2>, scalar_prefetch = 0 : i64, scratch_operands = 2 : i64, tpu.core_type = #tpu.core_type<tc>, window_params = [{transform_indices = @transform_0, window_bounds = array<i64: 1, 16, 128>}, {transform_indices = @transform_1, window_bounds = array<i64: 1, 16, 128>}, {transform_indices = @transform_2, window_bounds = array<i64: 1, 1, 16>}, {pipeline_mode = #tpu.pipeline_mode<synchronous>, transform_indices = @transform_3, window_bounds = array<i64: 15, 128, 128>}, {pipeline_mode = #tpu.pipeline_mode<synchronous>, transform_indices = @transform_4, window_bounds = array<i64: 3, 1, 128>}, {pipeline_mode = #tpu.pipeline_mode<synchronous>, transform_indices = @transform_5, window_bounds = array<i64: 3, 1, 128>}, {pipeline_mode = #tpu.pipeline_mode<synchronous>, transform_indices = @transform_6, window_bounds = array<i64: 128, 128>}, {pipeline_mode = #tpu.pipeline_mode<synchronous>, transform_indices = @transform_7, window_bounds = array<i64: 1, 128>}, {pipeline_mode = #tpu.pipeline_mode<synchronous>, transform_indices = @transform_8, window_bounds = array<i64: 3, 128, 384>}, {pipeline_mode = #tpu.pipeline_mode<synchronous>, transform_indices = @transform_9, window_bounds = array<i64: 3, 1, 384>}, {pipeline_mode = #tpu.pipeline_mode<synchronous>, transform_indices = @transform_10, window_bounds = array<i64: 3, 128, 128>}, {pipeline_mode = #tpu.pipeline_mode<synchronous>, transform_indices = @transform_11, window_bounds = array<i64: 3, 1, 128>}, {transform_indices = @transform_12, window_bounds = array<i64: 1>}, {transform_indices = @transform_13, window_bounds = array<i64: 1, 16, 128>}, {transform_indices = @transform_14, window_bounds = array<i64: 1, 4, 16, 16>}, {transform_indices = @transform_15, window_bounds = array<i64: 1, 4, 16, 16>}, {transform_indices = @transform_16, window_bounds = array<i64: 1, 4, 16, 16>}]} {
    %c0 = arith.constant 0 : index
    %c0_0 = arith.constant 0 : index
    %c0_1 = arith.constant 0 : index
    %0 = vector.load %arg1[%c0, %c0_0, %c0_1] : memref<1x16x128xf32, #tpu.memory_space<vmem>>, vector<1x16x128xf32>
    %1 = vector.shape_cast %0 : vector<1x16x128xf32> to vector<16x128xf32>
    %cst = arith.constant 0.000000e+00 : f32
    %2 = vector.broadcast %cst : f32 to vector<2x128xf32>
    %c0_2 = arith.constant 0 : index
    %c0_3 = arith.constant 0 : index
    %3 = vector.load %arg18[%c0_2, %c0_3] : memref<20x128xf32, #tpu.memory_space<vmem>>, vector<2x128xf32>
    tpu.vector_store %arg18[%c0_2, %c0_3], %2 {strides = array<i32>} : memref<20x128xf32, #tpu.memory_space<vmem>>, vector<2x128xf32>,
    %cst_4 = arith.constant 0.000000e+00 : f32
    %4 = vector.broadcast %cst_4 : f32 to vector<2x128xf32>
    %c18 = arith.constant 18 : index
    %c0_5 = arith.constant 0 : index
    %5 = vector.load %arg18[%c18, %c0_5] : memref<20x128xf32, #tpu.memory_space<vmem>>, vector<2x128xf32>
    tpu.vector_store %arg18[%c18, %c0_5], %4 {strides = array<i32>} : memref<20x128xf32, #tpu.memory_space<vmem>>, vector<2x128xf32>,
    %c2 = arith.constant 2 : index
    %c0_6 = arith.constant 0 : index
    %6 = vector.load %arg18[%c2, %c0_6] : memref<20x128xf32, #tpu.memory_space<vmem>>, vector<16x128xf32>
    tpu.vector_store %arg18[%c2, %c0_6], %1 {strides = array<i32>} : memref<20x128xf32, #tpu.memory_space<vmem>>, vector<16x128xf32>,
    %c0_7 = arith.constant 0 : index
    %c0_8 = arith.constant 0 : index
    %7 = vector.load %arg18[%c0_7, %c0_8] : memref<20x128xf32, #tpu.memory_space<vmem>>, vector<16x128xf32>
    %8 = arith.truncf %7 : vector<16x128xf32> to vector<16x128xbf16>
    %c0_9 = arith.constant 0 : index
    %c0_10 = arith.constant 0 : index
    %c0_11 = arith.constant 0 : index
    %9 = vector.load %arg4[%c0_9, %c0_10, %c0_11] : memref<15x128x128xbf16, #tpu.memory_space<vmem>>, vector<1x128x128xbf16>
    %10 = vector.shape_cast %9 : vector<1x128x128xbf16> to vector<128x128xbf16>
    %cst_12 = arith.constant dense<0.000000e+00> : vector<16x128xf32>
    %11 = tpu.matmul %8, %10, %cst_12 {dimension_numbers = #tpu.dot_dimension_numbers<[1], [0], [0], [1], [0, 0, 1, 1], [], []>} : vector<16x128xbf16>, vector<128x128xbf16>, vector<16x128xf32> -> vector<16x128xf32>
    %c1 = arith.constant 1 : index
    %c0_13 = arith.constant 0 : index
    %12 = vector.load %arg18[%c1, %c0_13] : memref<20x128xf32, #tpu.memory_space<vmem>>, vector<16x128xf32>
    %13 = arith.truncf %12 : vector<16x128xf32> to vector<16x128xbf16>
    %c1_14 = arith.constant 1 : index
    %c0_15 = arith.constant 0 : index
    %c0_16 = arith.constant 0 : index
    %14 = vector.load %arg4[%c1_14, %c0_15, %c0_16] : memref<15x128x128xbf16, #tpu.memory_space<vmem>>, vector<1x128x128xbf16>
    %15 = vector.shape_cast %14 : vector<1x128x128xbf16> to vector<128x128xbf16>
    %cst_17 = arith.constant dense<0.000000e+00> : vector<16x128xf32>
    %16 = tpu.matmul %13, %15, %cst_17 {dimension_numbers = #tpu.dot_dimension_numbers<[1], [0], [0], [1], [0, 0, 1, 1], [], []>} : vector<16x128xbf16>, vector<128x128xbf16>, vector<16x128xf32> -> vector<16x128xf32>
    %17 = arith.addf %11, %16 : vector<16x128xf32>
    %c2_18 = arith.constant 2 : index
    %c0_19 = arith.constant 0 : index
    %18 = vector.load %arg18[%c2_18, %c0_19] : memref<20x128xf32, #tpu.memory_space<vmem>>, vector<16x128xf32>
    %19 = arith.truncf %18 : vector<16x128xf32> to vector<16x128xbf16>
    %c2_20 = arith.constant 2 : index
    %c0_21 = arith.constant 0 : index
    %c0_22 = arith.constant 0 : index
    %20 = vector.load %arg4[%c2_20, %c0_21, %c0_22] : memref<15x128x128xbf16, #tpu.memory_space<vmem>>, vector<1x128x128xbf16>
    %21 = vector.shape_cast %20 : vector<1x128x128xbf16> to vector<128x128xbf16>
    %cst_23 = arith.constant dense<0.000000e+00> : vector<16x128xf32>
    %22 = tpu.matmul %19, %21, %cst_23 {dimension_numbers = #tpu.dot_dimension_numbers<[1], [0], [0], [1], [0, 0, 1, 1], [], []>} : vector<16x128xbf16>, vector<128x128xbf16>, vector<16x128xf32> -> vector<16x128xf32>
    %23 = arith.addf %17, %22 : vector<16x128xf32>
    %c3 = arith.constant 3 : index
    %c0_24 = arith.constant 0 : index
    %24 = vector.load %arg18[%c3, %c0_24] : memref<20x128xf32, #tpu.memory_space<vmem>>, vector<16x128xf32>
    %25 = arith.truncf %24 : vector<16x128xf32> to vector<16x128xbf16>
    %c3_25 = arith.constant 3 : index
    %c0_26 = arith.constant 0 : index
    %c0_27 = arith.constant 0 : index
    %26 = vector.load %arg4[%c3_25, %c0_26, %c0_27] : memref<15x128x128xbf16, #tpu.memory_space<vmem>>, vector<1x128x128xbf16>
    %27 = vector.shape_cast %26 : vector<1x128x128xbf16> to vector<128x128xbf16>
    %cst_28 = arith.constant dense<0.000000e+00> : vector<16x128xf32>
    %28 = tpu.matmul %25, %27, %cst_28 {dimension_numbers = #tpu.dot_dimension_numbers<[1], [0], [0], [1], [0, 0, 1, 1], [], []>} : vector<16x128xbf16>, vector<128x128xbf16>, vector<16x128xf32> -> vector<16x128xf32>
    %29 = arith.addf %23, %28 : vector<16x128xf32>
    %c4 = arith.constant 4 : index
    %c0_29 = arith.constant 0 : index
    %30 = vector.load %arg18[%c4, %c0_29] : memref<20x128xf32, #tpu.memory_space<vmem>>, vector<16x128xf32>
    %31 = arith.truncf %30 : vector<16x128xf32> to vector<16x128xbf16>
    %c4_30 = arith.constant 4 : index
    %c0_31 = arith.constant 0 : index
    %c0_32 = arith.constant 0 : index
    %32 = vector.load %arg4[%c4_30, %c0_31, %c0_32] : memref<15x128x128xbf16, #tpu.memory_space<vmem>>, vector<1x128x128xbf16>
    %33 = vector.shape_cast %32 : vector<1x128x128xbf16> to vector<128x128xbf16>
    %cst_33 = arith.constant dense<0.000000e+00> : vector<16x128xf32>
    %34 = tpu.matmul %31, %33, %cst_33 {dimension_numbers = #tpu.dot_dimension_numbers<[1], [0], [0], [1], [0, 0, 1, 1], [], []>} : vector<16x128xbf16>, vector<128x128xbf16>, vector<16x128xf32> -> vector<16x128xf32>
    %35 = arith.addf %29, %34 : vector<16x128xf32>
    %c0_34 = arith.constant 0 : index
    %c0_35 = arith.constant 0 : index
    %c0_36 = arith.constant 0 : index
    %36 = vector.load %arg5[%c0_34, %c0_35, %c0_36] : memref<3x1x128xf32, #tpu.memory_space<vmem>>, vector<1x1x128xf32>
    %37 = vector.shape_cast %36 : vector<1x1x128xf32> to vector<1x128xf32>
    %38 = vector.broadcast %37 : vector<1x128xf32> to vector<16x128xf32>
    %39 = arith.mulf %35, %38 : vector<16x128xf32>
    %c0_37 = arith.constant 0 : index
    %c0_38 = arith.constant 0 : index
    %c0_39 = arith.constant 0 : index
    %40 = vector.load %arg6[%c0_37, %c0_38, %c0_39] : memref<3x1x128xf32, #tpu.memory_space<vmem>>, vector<1x1x128xf32>
    %41 = vector.shape_cast %40 : vector<1x1x128xf32> to vector<1x128xf32>
    %42 = vector.broadcast %41 : vector<1x128xf32> to vector<16x128xf32>
    %43 = arith.addf %39, %42 : vector<16x128xf32>
    %cst_40 = arith.constant 0.000000e+00 : f32
    %44 = vector.broadcast %cst_40 : f32 to vector<16x128xf32>
    %45 = arith.maximumf %43, %44 : vector<16x128xf32>
    %c2_41 = arith.constant 2 : index
    %c0_42 = arith.constant 0 : index
    %46 = vector.load %arg18[%c2_41, %c0_42] : memref<20x128xf32, #tpu.memory_space<vmem>>, vector<16x128xf32>
    tpu.vector_store %arg18[%c2_41, %c0_42], %45 {strides = array<i32>} : memref<20x128xf32, #tpu.memory_space<vmem>>, vector<16x128xf32>,
    %c0_43 = arith.constant 0 : index
    %c0_44 = arith.constant 0 : index
    %47 = vector.load %arg18[%c0_43, %c0_44] : memref<20x128xf32, #tpu.memory_space<vmem>>, vector<16x128xf32>
    %48 = arith.truncf %47 : vector<16x128xf32> to vector<16x128xbf16>
    %c5 = arith.constant 5 : index
    %c0_45 = arith.constant 0 : index
    %c0_46 = arith.constant 0 : index
    %49 = vector.load %arg4[%c5, %c0_45, %c0_46] : memref<15x128x128xbf16, #tpu.memory_space<vmem>>, vector<1x128x128xbf16>
    %50 = vector.shape_cast %49 : vector<1x128x128xbf16> to vector<128x128xbf16>
    %cst_47 = arith.constant dense<0.000000e+00> : vector<16x128xf32>
    %51 = tpu.matmul %48, %50, %cst_47 {dimension_numbers = #tpu.dot_dimension_numbers<[1], [0], [0], [1], [0, 0, 1, 1], [], []>} : vector<16x128xbf16>, vector<128x128xbf16>, vector<16x128xf32> -> vector<16x128xf32>
    %c1_48 = arith.constant 1 : index
    %c0_49 = arith.constant 0 : index
    %52 = vector.load %arg18[%c1_48, %c0_49] : memref<20x128xf32, #tpu.memory_space<vmem>>, vector<16x128xf32>
    %53 = arith.truncf %52 : vector<16x128xf32> to vector<16x128xbf16>
    %c6 = arith.constant 6 : index
    %c0_50 = arith.constant 0 : index
    %c0_51 = arith.constant 0 : index
    %54 = vector.load %arg4[%c6, %c0_50, %c0_51] : memref<15x128x128xbf16, #tpu.memory_space<vmem>>, vector<1x128x128xbf16>
    %55 = vector.shape_cast %54 : vector<1x128x128xbf16> to vector<128x128xbf16>
    %cst_52 = arith.constant dense<0.000000e+00> : vector<16x128xf32>
    %56 = tpu.matmul %53, %55, %cst_52 {dimension_numbers = #tpu.dot_dimension_numbers<[1], [0], [0], [1], [0, 0, 1, 1], [], []>} : vector<16x128xbf16>, vector<128x128xbf16>, vector<16x128xf32> -> vector<16x128xf32>
    %57 = arith.addf %51, %56 : vector<16x128xf32>
    %c2_53 = arith.constant 2 : index
    %c0_54 = arith.constant 0 : index
    %58 = vector.load %arg18[%c2_53, %c0_54] : memref<20x128xf32, #tpu.memory_space<vmem>>, vector<16x128xf32>
    %59 = arith.truncf %58 : vector<16x128xf32> to vector<16x128xbf16>
    %c7 = arith.constant 7 : index
    %c0_55 = arith.constant 0 : index
    %c0_56 = arith.constant 0 : index
    %60 = vector.load %arg4[%c7, %c0_55, %c0_56] : memref<15x128x128xbf16, #tpu.memory_space<vmem>>, vector<1x128x128xbf16>
    %61 = vector.shape_cast %60 : vector<1x128x128xbf16> to vector<128x128xbf16>
    %cst_57 = arith.constant dense<0.000000e+00> : vector<16x128xf32>
    %62 = tpu.matmul %59, %61, %cst_57 {dimension_numbers = #tpu.dot_dimension_numbers<[1], [0], [0], [1], [0, 0, 1, 1], [], []>} : vector<16x128xbf16>, vector<128x128xbf16>, vector<16x128xf32> -> vector<16x128xf32>
    %63 = arith.addf %57, %62 : vector<16x128xf32>
    %c3_58 = arith.constant 3 : index
    %c0_59 = arith.constant 0 : index
    %64 = vector.load %arg18[%c3_58, %c0_59] : memref<20x128xf32, #tpu.memory_space<vmem>>, vector<16x128xf32>
    %65 = arith.truncf %64 : vector<16x128xf32> to vector<16x128xbf16>
    %c8 = arith.constant 8 : index
    %c0_60 = arith.constant 0 : index
    %c0_61 = arith.constant 0 : index
    %66 = vector.load %arg4[%c8, %c0_60, %c0_61] : memref<15x128x128xbf16, #tpu.memory_space<vmem>>, vector<1x128x128xbf16>
    %67 = vector.shape_cast %66 : vector<1x128x128xbf16> to vector<128x128xbf16>
    %cst_62 = arith.constant dense<0.000000e+00> : vector<16x128xf32>
    %68 = tpu.matmul %65, %67, %cst_62 {dimension_numbers = #tpu.dot_dimension_numbers<[1], [0], [0], [1], [0, 0, 1, 1], [], []>} : vector<16x128xbf16>, vector<128x128xbf16>, vector<16x128xf32> -> vector<16x128xf32>
    %69 = arith.addf %63, %68 : vector<16x128xf32>
    %c4_63 = arith.constant 4 : index
    %c0_64 = arith.constant 0 : index
    %70 = vector.load %arg18[%c4_63, %c0_64] : memref<20x128xf32, #tpu.memory_space<vmem>>, vector<16x128xf32>
    %71 = arith.truncf %70 : vector<16x128xf32> to vector<16x128xbf16>
    %c9 = arith.constant 9 : index
    %c0_65 = arith.constant 0 : index
    %c0_66 = arith.constant 0 : index
    %72 = vector.load %arg4[%c9, %c0_65, %c0_66] : memref<15x128x128xbf16, #tpu.memory_space<vmem>>, vector<1x128x128xbf16>
    %73 = vector.shape_cast %72 : vector<1x128x128xbf16> to vector<128x128xbf16>
    %cst_67 = arith.constant dense<0.000000e+00> : vector<16x128xf32>
    %74 = tpu.matmul %71, %73, %cst_67 {dimension_numbers = #tpu.dot_dimension_numbers<[1], [0], [0], [1], [0, 0, 1, 1], [], []>} : vector<16x128xbf16>, vector<128x128xbf16>, vector<16x128xf32> -> vector<16x128xf32>
    %75 = arith.addf %69, %74 : vector<16x128xf32>
    %c1_68 = arith.constant 1 : index
    %c0_69 = arith.constant 0 : index
    %c0_70 = arith.constant 0 : index
    %76 = vector.load %arg5[%c1_68, %c0_69, %c0_70] : memref<3x1x128xf32, #tpu.memory_space<vmem>>, vector<1x1x128xf32>
    %77 = vector.shape_cast %76 : vector<1x1x128xf32> to vector<1x128xf32>
    %78 = vector.broadcast %77 : vector<1x128xf32> to vector<16x128xf32>
    %79 = arith.mulf %75, %78 : vector<16x128xf32>
    %c1_71 = arith.constant 1 : index
    %c0_72 = arith.constant 0 : index
    %c0_73 = arith.constant 0 : index
    %80 = vector.load %arg6[%c1_71, %c0_72, %c0_73] : memref<3x1x128xf32, #tpu.memory_space<vmem>>, vector<1x1x128xf32>
    %81 = vector.shape_cast %80 : vector<1x1x128xf32> to vector<1x128xf32>
    %82 = vector.broadcast %81 : vector<1x128xf32> to vector<16x128xf32>
    %83 = arith.addf %79, %82 : vector<16x128xf32>
    %cst_74 = arith.constant 0.000000e+00 : f32
    %84 = vector.broadcast %cst_74 : f32 to vector<16x128xf32>
    %85 = arith.maximumf %83, %84 : vector<16x128xf32>
    %c2_75 = arith.constant 2 : index
    %c0_76 = arith.constant 0 : index
    %86 = vector.load %arg18[%c2_75, %c0_76] : memref<20x128xf32, #tpu.memory_space<vmem>>, vector<16x128xf32>
    tpu.vector_store %arg18[%c2_75, %c0_76], %85 {strides = array<i32>} : memref<20x128xf32, #tpu.memory_space<vmem>>, vector<16x128xf32>,
    %c0_77 = arith.constant 0 : index
    %c0_78 = arith.constant 0 : index
    %87 = vector.load %arg18[%c0_77, %c0_78] : memref<20x128xf32, #tpu.memory_space<vmem>>, vector<16x128xf32>
    %88 = arith.truncf %87 : vector<16x128xf32> to vector<16x128xbf16>
    %c10 = arith.constant 10 : index
    %c0_79 = arith.constant 0 : index
    %c0_80 = arith.constant 0 : index
    %89 = vector.load %arg4[%c10, %c0_79, %c0_80] : memref<15x128x128xbf16, #tpu.memory_space<vmem>>, vector<1x128x128xbf16>
    %90 = vector.shape_cast %89 : vector<1x128x128xbf16> to vector<128x128xbf16>
    %cst_81 = arith.constant dense<0.000000e+00> : vector<16x128xf32>
    %91 = tpu.matmul %88, %90, %cst_81 {dimension_numbers = #tpu.dot_dimension_numbers<[1], [0], [0], [1], [0, 0, 1, 1], [], []>} : vector<16x128xbf16>, vector<128x128xbf16>, vector<16x128xf32> -> vector<16x128xf32>
    %c1_82 = arith.constant 1 : index
    %c0_83 = arith.constant 0 : index
    %92 = vector.load %arg18[%c1_82, %c0_83] : memref<20x128xf32, #tpu.memory_space<vmem>>, vector<16x128xf32>
    %93 = arith.truncf %92 : vector<16x128xf32> to vector<16x128xbf16>
    %c11 = arith.constant 11 : index
    %c0_84 = arith.constant 0 : index
    %c0_85 = arith.constant 0 : index
    %94 = vector.load %arg4[%c11, %c0_84, %c0_85] : memref<15x128x128xbf16, #tpu.memory_space<vmem>>, vector<1x128x128xbf16>
    %95 = vector.shape_cast %94 : vector<1x128x128xbf16> to vector<128x128xbf16>
    %cst_86 = arith.constant dense<0.000000e+00> : vector<16x128xf32>
    %96 = tpu.matmul %93, %95, %cst_86 {dimension_numbers = #tpu.dot_dimension_numbers<[1], [0], [0], [1], [0, 0, 1, 1], [], []>} : vector<16x128xbf16>, vector<128x128xbf16>, vector<16x128xf32> -> vector<16x128xf32>
    %97 = arith.addf %91, %96 : vector<16x128xf32>
    %c2_87 = arith.constant 2 : index
    %c0_88 = arith.constant 0 : index
    %98 = vector.load %arg18[%c2_87, %c0_88] : memref<20x128xf32, #tpu.memory_space<vmem>>, vector<16x128xf32>
    %99 = arith.truncf %98 : vector<16x128xf32> to vector<16x128xbf16>
    %c12 = arith.constant 12 : index
    %c0_89 = arith.constant 0 : index
    %c0_90 = arith.constant 0 : index
    %100 = vector.load %arg4[%c12, %c0_89, %c0_90] : memref<15x128x128xbf16, #tpu.memory_space<vmem>>, vector<1x128x128xbf16>
    %101 = vector.shape_cast %100 : vector<1x128x128xbf16> to vector<128x128xbf16>
    %cst_91 = arith.constant dense<0.000000e+00> : vector<16x128xf32>
    %102 = tpu.matmul %99, %101, %cst_91 {dimension_numbers = #tpu.dot_dimension_numbers<[1], [0], [0], [1], [0, 0, 1, 1], [], []>} : vector<16x128xbf16>, vector<128x128xbf16>, vector<16x128xf32> -> vector<16x128xf32>
    %103 = arith.addf %97, %102 : vector<16x128xf32>
    %c3_92 = arith.constant 3 : index
    %c0_93 = arith.constant 0 : index
    %104 = vector.load %arg18[%c3_92, %c0_93] : memref<20x128xf32, #tpu.memory_space<vmem>>, vector<16x128xf32>
    %105 = arith.truncf %104 : vector<16x128xf32> to vector<16x128xbf16>
    %c13 = arith.constant 13 : index
    %c0_94 = arith.constant 0 : index
    %c0_95 = arith.constant 0 : index
    %106 = vector.load %arg4[%c13, %c0_94, %c0_95] : memref<15x128x128xbf16, #tpu.memory_space<vmem>>, vector<1x128x128xbf16>
    %107 = vector.shape_cast %106 : vector<1x128x128xbf16> to vector<128x128xbf16>
    %cst_96 = arith.constant dense<0.000000e+00> : vector<16x128xf32>
    %108 = tpu.matmul %105, %107, %cst_96 {dimension_numbers = #tpu.dot_dimension_numbers<[1], [0], [0], [1], [0, 0, 1, 1], [], []>} : vector<16x128xbf16>, vector<128x128xbf16>, vector<16x128xf32> -> vector<16x128xf32>
    %109 = arith.addf %103, %108 : vector<16x128xf32>
    %c4_97 = arith.constant 4 : index
    %c0_98 = arith.constant 0 : index
    %110 = vector.load %arg18[%c4_97, %c0_98] : memref<20x128xf32, #tpu.memory_space<vmem>>, vector<16x128xf32>
    %111 = arith.truncf %110 : vector<16x128xf32> to vector<16x128xbf16>
    %c14 = arith.constant 14 : index
    %c0_99 = arith.constant 0 : index
    %c0_100 = arith.constant 0 : index
    %112 = vector.load %arg4[%c14, %c0_99, %c0_100] : memref<15x128x128xbf16, #tpu.memory_space<vmem>>, vector<1x128x128xbf16>
    %113 = vector.shape_cast %112 : vector<1x128x128xbf16> to vector<128x128xbf16>
    %cst_101 = arith.constant dense<0.000000e+00> : vector<16x128xf32>
    %114 = tpu.matmul %111, %113, %cst_101 {dimension_numbers = #tpu.dot_dimension_numbers<[1], [0], [0], [1], [0, 0, 1, 1], [], []>} : vector<16x128xbf16>, vector<128x128xbf16>, vector<16x128xf32> -> vector<16x128xf32>
    %115 = arith.addf %109, %114 : vector<16x128xf32>
    %c2_102 = arith.constant 2 : index
    %c0_103 = arith.constant 0 : index
    %c0_104 = arith.constant 0 : index
    %116 = vector.load %arg5[%c2_102, %c0_103, %c0_104] : memref<3x1x128xf32, #tpu.memory_space<vmem>>, vector<1x1x128xf32>
    %117 = vector.shape_cast %116 : vector<1x1x128xf32> to vector<1x128xf32>
    %118 = vector.broadcast %117 : vector<1x128xf32> to vector<16x128xf32>
    %119 = arith.mulf %115, %118 : vector<16x128xf32>
    %c2_105 = arith.constant 2 : index
    %c0_106 = arith.constant 0 : index
    %c0_107 = arith.constant 0 : index
    %120 = vector.load %arg6[%c2_105, %c0_106, %c0_107] : memref<3x1x128xf32, #tpu.memory_space<vmem>>, vector<1x1x128xf32>
    %121 = vector.shape_cast %120 : vector<1x1x128xf32> to vector<1x128xf32>
    %122 = vector.broadcast %121 : vector<1x128xf32> to vector<16x128xf32>
    %123 = arith.addf %119, %122 : vector<16x128xf32>
    %cst_108 = arith.constant 0.000000e+00 : f32
    %124 = vector.broadcast %cst_108 : f32 to vector<16x128xf32>
    %125 = arith.maximumf %123, %124 : vector<16x128xf32>
    %126 = arith.truncf %125 : vector<16x128xf32> to vector<16x128xbf16>
    %c0_109 = arith.constant 0 : index
    %c0_110 = arith.constant 0 : index
    %127 = vector.load %arg7[%c0_109, %c0_110] : memref<128x128xbf16, #tpu.memory_space<vmem>>, vector<128x128xbf16>
    %cst_111 = arith.constant dense<0.000000e+00> : vector<16x128xf32>
    %128 = tpu.matmul %126, %127, %cst_111 {dimension_numbers = #tpu.dot_dimension_numbers<[1], [0], [0], [1], [0, 0, 1, 1], [], []>} : vector<16x128xbf16>, vector<128x128xbf16>, vector<16x128xf32> -> vector<16x128xf32>
    %c0_112 = arith.constant 0 : index
    %c0_113 = arith.constant 0 : index
    %129 = vector.load %arg8[%c0_112, %c0_113] : memref<1x128xf32, #tpu.memory_space<vmem>>, vector<1x128xf32>
    %130 = vector.broadcast %129 : vector<1x128xf32> to vector<16x128xf32>
    %131 = arith.addf %128, %130 : vector<16x128xf32>
    %cst_114 = arith.constant 0.000000e+00 : f32
    %132 = vector.broadcast %cst_114 : f32 to vector<16x128xf32>
    %133 = arith.maximumf %131, %132 : vector<16x128xf32>
    %c0_115 = arith.constant 0 : index
    %134 = memref.load %arg13[%c0_115] : memref<1xf32, #tpu.memory_space<smem>>
    %c0_116 = arith.constant 0 : index
    %c0_117 = arith.constant 0 : index
    %c0_118 = arith.constant 0 : index
    %135 = vector.load %arg2[%c0_116, %c0_117, %c0_118] : memref<1x16x128xf32, #tpu.memory_space<vmem>>, vector<1x16x128xf32>
    %136 = vector.shape_cast %135 : vector<1x16x128xf32> to vector<16x128xf32>
    %137 = vector.broadcast %134 : f32 to vector<16x128xf32>
    %138 = arith.mulf %137, %136 : vector<16x128xf32>
    %139 = arith.addf %133, %138 : vector<16x128xf32>
    %c0_119 = arith.constant 0 : index
    %c0_120 = arith.constant 0 : index
    %c0_121 = arith.constant 0 : index
    %140 = vector.load %arg3[%c0_119, %c0_120, %c0_121] : memref<1x1x16xf32, #tpu.memory_space<vmem>>, vector<1x1x16xf32>
    %141 = vector.shape_cast %140 : vector<1x1x16xf32> to vector<1x16xf32>
    %cst_122 = arith.constant -1.000000e+09 : f32
    %142 = vector.broadcast %cst_122 : f32 to vector<1x16xf32>
    %143 = arith.mulf %141, %142 : vector<1x16xf32>
    %144 = vector.shape_cast %143 : vector<1x16xf32> to vector<1x16xf32>
    %145 = vector.broadcast %144 : vector<1x16xf32> to vector<16x16xf32>
    %cst_123 = arith.constant 1.000000e+00 : f32
    %146 = vector.broadcast %cst_123 : f32 to vector<1x16xf32>
    %147 = arith.subf %146, %141 : vector<1x16xf32>
    %148 = vector.shape_cast %147 : vector<1x16xf32> to vector<1x16xf32>
    %149 = vector.broadcast %148 : vector<1x16xf32> to vector<16x16xf32>
    %150 = arith.truncf %139 : vector<16x128xf32> to vector<16x128xbf16>
    %c0_124 = arith.constant 0 : index
    %c0_125 = arith.constant 0 : index
    %c0_126 = arith.constant 0 : index
    %151 = vector.load %arg9[%c0_124, %c0_125, %c0_126] : memref<3x128x384xbf16, #tpu.memory_space<vmem>>, vector<1x128x384xbf16>
    %152 = vector.shape_cast %151 : vector<1x128x384xbf16> to vector<128x384xbf16>
    %cst_127 = arith.constant dense<0.000000e+00> : vector<16x384xf32>
    %153 = tpu.matmul %150, %152, %cst_127 {dimension_numbers = #tpu.dot_dimension_numbers<[1], [0], [0], [1], [0, 0, 1, 1], [], []>} : vector<16x128xbf16>, vector<128x384xbf16>, vector<16x384xf32> -> vector<16x384xf32>
    %c0_128 = arith.constant 0 : index
    %c0_129 = arith.constant 0 : index
    %c0_130 = arith.constant 0 : index
    %154 = vector.load %arg10[%c0_128, %c0_129, %c0_130] : memref<3x1x384xf32, #tpu.memory_space<vmem>>, vector<1x1x384xf32>
    %155 = vector.shape_cast %154 : vector<1x1x384xf32> to vector<1x384xf32>
    %156 = vector.broadcast %155 : vector<1x384xf32> to vector<16x384xf32>
    %157 = arith.addf %153, %156 : vector<16x384xf32>
    %158 = arith.truncf %157 : vector<16x384xf32> to vector<16x384xbf16>
    %159 = vector.extract_strided_slice %158 {offsets = [0, 0], sizes = [16, 32], strides = [1, 1]} : vector<16x384xbf16> to vector<16x32xbf16>
    %160 = vector.extract_strided_slice %158 {offsets = [0, 128], sizes = [16, 32], strides = [1, 1]} : vector<16x384xbf16> to vector<16x32xbf16>
    %161 = vector.extract_strided_slice %158 {offsets = [0, 256], sizes = [16, 32], strides = [1, 1]} : vector<16x384xbf16> to vector<16x32xbf16>
    %cst_131 = arith.constant dense<0.000000e+00> : vector<16x16xf32>
    %162 = tpu.matmul %159, %160, %cst_131 {dimension_numbers = #tpu.dot_dimension_numbers<[1], [1], [0], [0], [0, 0, 1, 0], [], []>} : vector<16x32xbf16>, vector<16x32xbf16>, vector<16x16xf32> -> vector<16x16xf32>
    %cst_132 = arith.constant 0.176776692 : f32
    %163 = vector.broadcast %cst_132 : f32 to vector<16x16xf32>
    %164 = arith.mulf %162, %163 : vector<16x16xf32>
    %165 = arith.addf %164, %145 : vector<16x16xf32>
    %cst_133 = arith.constant dense<0xFF800000> : vector<16xf32>
    %166 = vector.multi_reduction <maximumf>, %165, %cst_133 [1] : vector<16x16xf32> to vector<16xf32>
    %167 = vector.shape_cast %166 : vector<16xf32> to vector<16x1xf32>
    %168 = vector.broadcast %167 : vector<16x1xf32> to vector<16x16xf32>
    %169 = arith.subf %165, %168 : vector<16x16xf32>
    %170 = math.exp %169 : vector<16x16xf32>
    %cst_134 = arith.constant dense<0.000000e+00> : vector<16xf32>
    %171 = vector.multi_reduction <add>, %170, %cst_134 [1] : vector<16x16xf32> to vector<16xf32>
    %172 = vector.shape_cast %171 : vector<16xf32> to vector<16x1xf32>
    %173 = tpu.reciprocal %172 {approx = true} : vector<16x1xf32> -> vector<16x1xf32>
    %174 = vector.broadcast %173 : vector<16x1xf32> to vector<16x16xf32>
    %175 = arith.mulf %170, %174 : vector<16x16xf32>
    %176 = arith.mulf %175, %149 : vector<16x16xf32>
    %177 = arith.truncf %176 : vector<16x16xf32> to vector<16x16xbf16>
    %c0_135 = arith.constant 0 : index
    %c0_136 = arith.constant 0 : index
    %c0_137 = arith.constant 0 : index
    %c0_138 = arith.constant 0 : index
    %178 = vector.load %arg15[%c0_135, %c0_136, %c0_137, %c0_138] : memref<1x4x16x16xbf16, #tpu.memory_space<vmem>>, vector<1x1x16x16xbf16>
    %179 = vector.shape_cast %178 : vector<1x1x16x16xbf16> to vector<16x16xbf16>
    %180 = vector.shape_cast %177 : vector<16x16xbf16> to vector<1x1x16x16xbf16>
    tpu.vector_store %arg15[%c0_135, %c0_136, %c0_137, %c0_138], %180 {strides = array<i32>} : memref<1x4x16x16xbf16, #tpu.memory_space<vmem>>, vector<1x1x16x16xbf16>,
    %181 = arith.truncf %175 : vector<16x16xf32> to vector<16x16xbf16>
    %cst_139 = arith.constant dense<0.000000e+00> : vector<16x32xf32>
    %182 = tpu.matmul %181, %161, %cst_139 {dimension_numbers = #tpu.dot_dimension_numbers<[1], [0], [0], [1], [0, 0, 1, 1], [], []>} : vector<16x16xbf16>, vector<16x32xbf16>, vector<16x32xf32> -> vector<16x32xf32>
    %c0_140 = arith.constant 0 : index
    %c0_141 = arith.constant 0 : index
    %183 = vector.load %arg19[%c0_140, %c0_141] : memref<16x128xf32, #tpu.memory_space<vmem>>, vector<16x32xf32>
    tpu.vector_store %arg19[%c0_140, %c0_141], %182 {strides = array<i32>} : memref<16x128xf32, #tpu.memory_space<vmem>>, vector<16x32xf32>,
    %184 = vector.extract_strided_slice %158 {offsets = [0, 32], sizes = [16, 32], strides = [1, 1]} : vector<16x384xbf16> to vector<16x32xbf16>
    %185 = vector.extract_strided_slice %158 {offsets = [0, 160], sizes = [16, 32], strides = [1, 1]} : vector<16x384xbf16> to vector<16x32xbf16>
    %186 = vector.extract_strided_slice %158 {offsets = [0, 288], sizes = [16, 32], strides = [1, 1]} : vector<16x384xbf16> to vector<16x32xbf16>
    %cst_142 = arith.constant dense<0.000000e+00> : vector<16x16xf32>
    %187 = tpu.matmul %184, %185, %cst_142 {dimension_numbers = #tpu.dot_dimension_numbers<[1], [1], [0], [0], [0, 0, 1, 0], [], []>} : vector<16x32xbf16>, vector<16x32xbf16>, vector<16x16xf32> -> vector<16x16xf32>
    %cst_143 = arith.constant 0.176776692 : f32
    %188 = vector.broadcast %cst_143 : f32 to vector<16x16xf32>
    %189 = arith.mulf %187, %188 : vector<16x16xf32>
    %190 = arith.addf %189, %145 : vector<16x16xf32>
    %cst_144 = arith.constant dense<0xFF800000> : vector<16xf32>
    %191 = vector.multi_reduction <maximumf>, %190, %cst_144 [1] : vector<16x16xf32> to vector<16xf32>
    %192 = vector.shape_cast %191 : vector<16xf32> to vector<16x1xf32>
    %193 = vector.broadcast %192 : vector<16x1xf32> to vector<16x16xf32>
    %194 = arith.subf %190, %193 : vector<16x16xf32>
    %195 = math.exp %194 : vector<16x16xf32>
    %cst_145 = arith.constant dense<0.000000e+00> : vector<16xf32>
    %196 = vector.multi_reduction <add>, %195, %cst_145 [1] : vector<16x16xf32> to vector<16xf32>
    %197 = vector.shape_cast %196 : vector<16xf32> to vector<16x1xf32>
    %198 = tpu.reciprocal %197 {approx = true} : vector<16x1xf32> -> vector<16x1xf32>
    %199 = vector.broadcast %198 : vector<16x1xf32> to vector<16x16xf32>
    %200 = arith.mulf %195, %199 : vector<16x16xf32>
    %201 = arith.mulf %200, %149 : vector<16x16xf32>
    %202 = arith.truncf %201 : vector<16x16xf32> to vector<16x16xbf16>
    %c0_146 = arith.constant 0 : index
    %c1_147 = arith.constant 1 : index
    %c0_148 = arith.constant 0 : index
    %c0_149 = arith.constant 0 : index
    %203 = vector.load %arg15[%c0_146, %c1_147, %c0_148, %c0_149] : memref<1x4x16x16xbf16, #tpu.memory_space<vmem>>, vector<1x1x16x16xbf16>
    %204 = vector.shape_cast %203 : vector<1x1x16x16xbf16> to vector<16x16xbf16>
    %205 = vector.shape_cast %202 : vector<16x16xbf16> to vector<1x1x16x16xbf16>
    tpu.vector_store %arg15[%c0_146, %c1_147, %c0_148, %c0_149], %205 {strides = array<i32>} : memref<1x4x16x16xbf16, #tpu.memory_space<vmem>>, vector<1x1x16x16xbf16>,
    %206 = arith.truncf %200 : vector<16x16xf32> to vector<16x16xbf16>
    %cst_150 = arith.constant dense<0.000000e+00> : vector<16x32xf32>
    %207 = tpu.matmul %206, %186, %cst_150 {dimension_numbers = #tpu.dot_dimension_numbers<[1], [0], [0], [1], [0, 0, 1, 1], [], []>} : vector<16x16xbf16>, vector<16x32xbf16>, vector<16x32xf32> -> vector<16x32xf32>
    %c0_151 = arith.constant 0 : index
    %c32 = arith.constant 32 : index
    %208 = vector.load %arg19[%c0_151, %c32] : memref<16x128xf32, #tpu.memory_space<vmem>>, vector<16x32xf32>
    tpu.vector_store %arg19[%c0_151, %c32], %207 {strides = array<i32>} : memref<16x128xf32, #tpu.memory_space<vmem>>, vector<16x32xf32>,
    %209 = vector.extract_strided_slice %158 {offsets = [0, 64], sizes = [16, 32], strides = [1, 1]} : vector<16x384xbf16> to vector<16x32xbf16>
    %210 = vector.extract_strided_slice %158 {offsets = [0, 192], sizes = [16, 32], strides = [1, 1]} : vector<16x384xbf16> to vector<16x32xbf16>
    %211 = vector.extract_strided_slice %158 {offsets = [0, 320], sizes = [16, 32], strides = [1, 1]} : vector<16x384xbf16> to vector<16x32xbf16>
    %cst_152 = arith.constant dense<0.000000e+00> : vector<16x16xf32>
    %212 = tpu.matmul %209, %210, %cst_152 {dimension_numbers = #tpu.dot_dimension_numbers<[1], [1], [0], [0], [0, 0, 1, 0], [], []>} : vector<16x32xbf16>, vector<16x32xbf16>, vector<16x16xf32> -> vector<16x16xf32>
    %cst_153 = arith.constant 0.176776692 : f32
    %213 = vector.broadcast %cst_153 : f32 to vector<16x16xf32>
    %214 = arith.mulf %212, %213 : vector<16x16xf32>
    %215 = arith.addf %214, %145 : vector<16x16xf32>
    %cst_154 = arith.constant dense<0xFF800000> : vector<16xf32>
    %216 = vector.multi_reduction <maximumf>, %215, %cst_154 [1] : vector<16x16xf32> to vector<16xf32>
    %217 = vector.shape_cast %216 : vector<16xf32> to vector<16x1xf32>
    %218 = vector.broadcast %217 : vector<16x1xf32> to vector<16x16xf32>
    %219 = arith.subf %215, %218 : vector<16x16xf32>
    %220 = math.exp %219 : vector<16x16xf32>
    %cst_155 = arith.constant dense<0.000000e+00> : vector<16xf32>
    %221 = vector.multi_reduction <add>, %220, %cst_155 [1] : vector<16x16xf32> to vector<16xf32>
    %222 = vector.shape_cast %221 : vector<16xf32> to vector<16x1xf32>
    %223 = tpu.reciprocal %222 {approx = true} : vector<16x1xf32> -> vector<16x1xf32>
    %224 = vector.broadcast %223 : vector<16x1xf32> to vector<16x16xf32>
    %225 = arith.mulf %220, %224 : vector<16x16xf32>
    %226 = arith.mulf %225, %149 : vector<16x16xf32>
    %227 = arith.truncf %226 : vector<16x16xf32> to vector<16x16xbf16>
    %c0_156 = arith.constant 0 : index
    %c2_157 = arith.constant 2 : index
    %c0_158 = arith.constant 0 : index
    %c0_159 = arith.constant 0 : index
    %228 = vector.load %arg15[%c0_156, %c2_157, %c0_158, %c0_159] : memref<1x4x16x16xbf16, #tpu.memory_space<vmem>>, vector<1x1x16x16xbf16>
    %229 = vector.shape_cast %228 : vector<1x1x16x16xbf16> to vector<16x16xbf16>
    %230 = vector.shape_cast %227 : vector<16x16xbf16> to vector<1x1x16x16xbf16>
    tpu.vector_store %arg15[%c0_156, %c2_157, %c0_158, %c0_159], %230 {strides = array<i32>} : memref<1x4x16x16xbf16, #tpu.memory_space<vmem>>, vector<1x1x16x16xbf16>,
    %231 = arith.truncf %225 : vector<16x16xf32> to vector<16x16xbf16>
    %cst_160 = arith.constant dense<0.000000e+00> : vector<16x32xf32>
    %232 = tpu.matmul %231, %211, %cst_160 {dimension_numbers = #tpu.dot_dimension_numbers<[1], [0], [0], [1], [0, 0, 1, 1], [], []>} : vector<16x16xbf16>, vector<16x32xbf16>, vector<16x32xf32> -> vector<16x32xf32>
    %c0_161 = arith.constant 0 : index
    %c64 = arith.constant 64 : index
    %233 = vector.load %arg19[%c0_161, %c64] : memref<16x128xf32, #tpu.memory_space<vmem>>, vector<16x32xf32>
    tpu.vector_store %arg19[%c0_161, %c64], %232 {strides = array<i32>} : memref<16x128xf32, #tpu.memory_space<vmem>>, vector<16x32xf32>,
    %234 = vector.extract_strided_slice %158 {offsets = [0, 96], sizes = [16, 32], strides = [1, 1]} : vector<16x384xbf16> to vector<16x32xbf16>
    %235 = vector.extract_strided_slice %158 {offsets = [0, 224], sizes = [16, 32], strides = [1, 1]} : vector<16x384xbf16> to vector<16x32xbf16>
    %236 = vector.extract_strided_slice %158 {offsets = [0, 352], sizes = [16, 32], strides = [1, 1]} : vector<16x384xbf16> to vector<16x32xbf16>
    %cst_162 = arith.constant dense<0.000000e+00> : vector<16x16xf32>
    %237 = tpu.matmul %234, %235, %cst_162 {dimension_numbers = #tpu.dot_dimension_numbers<[1], [1], [0], [0], [0, 0, 1, 0], [], []>} : vector<16x32xbf16>, vector<16x32xbf16>, vector<16x16xf32> -> vector<16x16xf32>
    %cst_163 = arith.constant 0.176776692 : f32
    %238 = vector.broadcast %cst_163 : f32 to vector<16x16xf32>
    %239 = arith.mulf %237, %238 : vector<16x16xf32>
    %240 = arith.addf %239, %145 : vector<16x16xf32>
    %cst_164 = arith.constant dense<0xFF800000> : vector<16xf32>
    %241 = vector.multi_reduction <maximumf>, %240, %cst_164 [1] : vector<16x16xf32> to vector<16xf32>
    %242 = vector.shape_cast %241 : vector<16xf32> to vector<16x1xf32>
    %243 = vector.broadcast %242 : vector<16x1xf32> to vector<16x16xf32>
    %244 = arith.subf %240, %243 : vector<16x16xf32>
    %245 = math.exp %244 : vector<16x16xf32>
    %cst_165 = arith.constant dense<0.000000e+00> : vector<16xf32>
    %246 = vector.multi_reduction <add>, %245, %cst_165 [1] : vector<16x16xf32> to vector<16xf32>
    %247 = vector.shape_cast %246 : vector<16xf32> to vector<16x1xf32>
    %248 = tpu.reciprocal %247 {approx = true} : vector<16x1xf32> -> vector<16x1xf32>
    %249 = vector.broadcast %248 : vector<16x1xf32> to vector<16x16xf32>
    %250 = arith.mulf %245, %249 : vector<16x16xf32>
    %251 = arith.mulf %250, %149 : vector<16x16xf32>
    %252 = arith.truncf %251 : vector<16x16xf32> to vector<16x16xbf16>
    %c0_166 = arith.constant 0 : index
    %c3_167 = arith.constant 3 : index
    %c0_168 = arith.constant 0 : index
    %c0_169 = arith.constant 0 : index
    %253 = vector.load %arg15[%c0_166, %c3_167, %c0_168, %c0_169] : memref<1x4x16x16xbf16, #tpu.memory_space<vmem>>, vector<1x1x16x16xbf16>
    %254 = vector.shape_cast %253 : vector<1x1x16x16xbf16> to vector<16x16xbf16>
    %255 = vector.shape_cast %252 : vector<16x16xbf16> to vector<1x1x16x16xbf16>
    tpu.vector_store %arg15[%c0_166, %c3_167, %c0_168, %c0_169], %255 {strides = array<i32>} : memref<1x4x16x16xbf16, #tpu.memory_space<vmem>>, vector<1x1x16x16xbf16>,
    %256 = arith.truncf %250 : vector<16x16xf32> to vector<16x16xbf16>
    %cst_170 = arith.constant dense<0.000000e+00> : vector<16x32xf32>
    %257 = tpu.matmul %256, %236, %cst_170 {dimension_numbers = #tpu.dot_dimension_numbers<[1], [0], [0], [1], [0, 0, 1, 1], [], []>} : vector<16x16xbf16>, vector<16x32xbf16>, vector<16x32xf32> -> vector<16x32xf32>
    %c0_171 = arith.constant 0 : index
    %c96 = arith.constant 96 : index
    %258 = vector.load %arg19[%c0_171, %c96] : memref<16x128xf32, #tpu.memory_space<vmem>>, vector<16x32xf32>
    tpu.vector_store %arg19[%c0_171, %c96], %257 {strides = array<i32>} : memref<16x128xf32, #tpu.memory_space<vmem>>, vector<16x32xf32>,
    %c0_172 = arith.constant 0 : index
    %c0_173 = arith.constant 0 : index
    %259 = vector.load %arg19[%c0_172, %c0_173] : memref<16x128xf32, #tpu.memory_space<vmem>>, vector<16x128xf32>
    %260 = arith.truncf %259 : vector<16x128xf32> to vector<16x128xbf16>
    %c0_174 = arith.constant 0 : index
    %c0_175 = arith.constant 0 : index
    %c0_176 = arith.constant 0 : index
    %261 = vector.load %arg11[%c0_174, %c0_175, %c0_176] : memref<3x128x128xbf16, #tpu.memory_space<vmem>>, vector<1x128x128xbf16>
    %262 = vector.shape_cast %261 : vector<1x128x128xbf16> to vector<128x128xbf16>
    %cst_177 = arith.constant dense<0.000000e+00> : vector<16x128xf32>
    %263 = tpu.matmul %260, %262, %cst_177 {dimension_numbers = #tpu.dot_dimension_numbers<[1], [0], [0], [1], [0, 0, 1, 1], [], []>} : vector<16x128xbf16>, vector<128x128xbf16>, vector<16x128xf32> -> vector<16x128xf32>
    %c0_178 = arith.constant 0 : index
    %c0_179 = arith.constant 0 : index
    %c0_180 = arith.constant 0 : index
    %264 = vector.load %arg12[%c0_178, %c0_179, %c0_180] : memref<3x1x128xf32, #tpu.memory_space<vmem>>, vector<1x1x128xf32>
    %265 = vector.shape_cast %264 : vector<1x1x128xf32> to vector<1x128xf32>
    %266 = vector.broadcast %265 : vector<1x128xf32> to vector<16x128xf32>
    %267 = arith.addf %263, %266 : vector<16x128xf32>
    %268 = arith.addf %139, %267 : vector<16x128xf32>
    %269 = arith.truncf %268 : vector<16x128xf32> to vector<16x128xbf16>
    %c1_181 = arith.constant 1 : index
    %c0_182 = arith.constant 0 : index
    %c0_183 = arith.constant 0 : index
    %270 = vector.load %arg9[%c1_181, %c0_182, %c0_183] : memref<3x128x384xbf16, #tpu.memory_space<vmem>>, vector<1x128x384xbf16>
    %271 = vector.shape_cast %270 : vector<1x128x384xbf16> to vector<128x384xbf16>
    %cst_184 = arith.constant dense<0.000000e+00> : vector<16x384xf32>
    %272 = tpu.matmul %269, %271, %cst_184 {dimension_numbers = #tpu.dot_dimension_numbers<[1], [0], [0], [1], [0, 0, 1, 1], [], []>} : vector<16x128xbf16>, vector<128x384xbf16>, vector<16x384xf32> -> vector<16x384xf32>
    %c1_185 = arith.constant 1 : index
    %c0_186 = arith.constant 0 : index
    %c0_187 = arith.constant 0 : index
    %273 = vector.load %arg10[%c1_185, %c0_186, %c0_187] : memref<3x1x384xf32, #tpu.memory_space<vmem>>, vector<1x1x384xf32>
    %274 = vector.shape_cast %273 : vector<1x1x384xf32> to vector<1x384xf32>
    %275 = vector.broadcast %274 : vector<1x384xf32> to vector<16x384xf32>
    %276 = arith.addf %272, %275 : vector<16x384xf32>
    %277 = arith.truncf %276 : vector<16x384xf32> to vector<16x384xbf16>
    %278 = vector.extract_strided_slice %277 {offsets = [0, 0], sizes = [16, 32], strides = [1, 1]} : vector<16x384xbf16> to vector<16x32xbf16>
    %279 = vector.extract_strided_slice %277 {offsets = [0, 128], sizes = [16, 32], strides = [1, 1]} : vector<16x384xbf16> to vector<16x32xbf16>
    %280 = vector.extract_strided_slice %277 {offsets = [0, 256], sizes = [16, 32], strides = [1, 1]} : vector<16x384xbf16> to vector<16x32xbf16>
    %cst_188 = arith.constant dense<0.000000e+00> : vector<16x16xf32>
    %281 = tpu.matmul %278, %279, %cst_188 {dimension_numbers = #tpu.dot_dimension_numbers<[1], [1], [0], [0], [0, 0, 1, 0], [], []>} : vector<16x32xbf16>, vector<16x32xbf16>, vector<16x16xf32> -> vector<16x16xf32>
    %cst_189 = arith.constant 0.176776692 : f32
    %282 = vector.broadcast %cst_189 : f32 to vector<16x16xf32>
    %283 = arith.mulf %281, %282 : vector<16x16xf32>
    %284 = arith.addf %283, %145 : vector<16x16xf32>
    %cst_190 = arith.constant dense<0xFF800000> : vector<16xf32>
    %285 = vector.multi_reduction <maximumf>, %284, %cst_190 [1] : vector<16x16xf32> to vector<16xf32>
    %286 = vector.shape_cast %285 : vector<16xf32> to vector<16x1xf32>
    %287 = vector.broadcast %286 : vector<16x1xf32> to vector<16x16xf32>
    %288 = arith.subf %284, %287 : vector<16x16xf32>
    %289 = math.exp %288 : vector<16x16xf32>
    %cst_191 = arith.constant dense<0.000000e+00> : vector<16xf32>
    %290 = vector.multi_reduction <add>, %289, %cst_191 [1] : vector<16x16xf32> to vector<16xf32>
    %291 = vector.shape_cast %290 : vector<16xf32> to vector<16x1xf32>
    %292 = tpu.reciprocal %291 {approx = true} : vector<16x1xf32> -> vector<16x1xf32>
    %293 = vector.broadcast %292 : vector<16x1xf32> to vector<16x16xf32>
    %294 = arith.mulf %289, %293 : vector<16x16xf32>
    %295 = arith.mulf %294, %149 : vector<16x16xf32>
    %296 = arith.truncf %295 : vector<16x16xf32> to vector<16x16xbf16>
    %c0_192 = arith.constant 0 : index
    %c0_193 = arith.constant 0 : index
    %c0_194 = arith.constant 0 : index
    %c0_195 = arith.constant 0 : index
    %297 = vector.load %arg16[%c0_192, %c0_193, %c0_194, %c0_195] : memref<1x4x16x16xbf16, #tpu.memory_space<vmem>>, vector<1x1x16x16xbf16>
    %298 = vector.shape_cast %297 : vector<1x1x16x16xbf16> to vector<16x16xbf16>
    %299 = vector.shape_cast %296 : vector<16x16xbf16> to vector<1x1x16x16xbf16>
    tpu.vector_store %arg16[%c0_192, %c0_193, %c0_194, %c0_195], %299 {strides = array<i32>} : memref<1x4x16x16xbf16, #tpu.memory_space<vmem>>, vector<1x1x16x16xbf16>,
    %300 = arith.truncf %294 : vector<16x16xf32> to vector<16x16xbf16>
    %cst_196 = arith.constant dense<0.000000e+00> : vector<16x32xf32>
    %301 = tpu.matmul %300, %280, %cst_196 {dimension_numbers = #tpu.dot_dimension_numbers<[1], [0], [0], [1], [0, 0, 1, 1], [], []>} : vector<16x16xbf16>, vector<16x32xbf16>, vector<16x32xf32> -> vector<16x32xf32>
    %c0_197 = arith.constant 0 : index
    %c0_198 = arith.constant 0 : index
    %302 = vector.load %arg19[%c0_197, %c0_198] : memref<16x128xf32, #tpu.memory_space<vmem>>, vector<16x32xf32>
    tpu.vector_store %arg19[%c0_197, %c0_198], %301 {strides = array<i32>} : memref<16x128xf32, #tpu.memory_space<vmem>>, vector<16x32xf32>,
    %303 = vector.extract_strided_slice %277 {offsets = [0, 32], sizes = [16, 32], strides = [1, 1]} : vector<16x384xbf16> to vector<16x32xbf16>
    %304 = vector.extract_strided_slice %277 {offsets = [0, 160], sizes = [16, 32], strides = [1, 1]} : vector<16x384xbf16> to vector<16x32xbf16>
    %305 = vector.extract_strided_slice %277 {offsets = [0, 288], sizes = [16, 32], strides = [1, 1]} : vector<16x384xbf16> to vector<16x32xbf16>
    %cst_199 = arith.constant dense<0.000000e+00> : vector<16x16xf32>
    %306 = tpu.matmul %303, %304, %cst_199 {dimension_numbers = #tpu.dot_dimension_numbers<[1], [1], [0], [0], [0, 0, 1, 0], [], []>} : vector<16x32xbf16>, vector<16x32xbf16>, vector<16x16xf32> -> vector<16x16xf32>
    %cst_200 = arith.constant 0.176776692 : f32
    %307 = vector.broadcast %cst_200 : f32 to vector<16x16xf32>
    %308 = arith.mulf %306, %307 : vector<16x16xf32>
    %309 = arith.addf %308, %145 : vector<16x16xf32>
    %cst_201 = arith.constant dense<0xFF800000> : vector<16xf32>
    %310 = vector.multi_reduction <maximumf>, %309, %cst_201 [1] : vector<16x16xf32> to vector<16xf32>
    %311 = vector.shape_cast %310 : vector<16xf32> to vector<16x1xf32>
    %312 = vector.broadcast %311 : vector<16x1xf32> to vector<16x16xf32>
    %313 = arith.subf %309, %312 : vector<16x16xf32>
    %314 = math.exp %313 : vector<16x16xf32>
    %cst_202 = arith.constant dense<0.000000e+00> : vector<16xf32>
    %315 = vector.multi_reduction <add>, %314, %cst_202 [1] : vector<16x16xf32> to vector<16xf32>
    %316 = vector.shape_cast %315 : vector<16xf32> to vector<16x1xf32>
    %317 = tpu.reciprocal %316 {approx = true} : vector<16x1xf32> -> vector<16x1xf32>
    %318 = vector.broadcast %317 : vector<16x1xf32> to vector<16x16xf32>
    %319 = arith.mulf %314, %318 : vector<16x16xf32>
    %320 = arith.mulf %319, %149 : vector<16x16xf32>
    %321 = arith.truncf %320 : vector<16x16xf32> to vector<16x16xbf16>
    %c0_203 = arith.constant 0 : index
    %c1_204 = arith.constant 1 : index
    %c0_205 = arith.constant 0 : index
    %c0_206 = arith.constant 0 : index
    %322 = vector.load %arg16[%c0_203, %c1_204, %c0_205, %c0_206] : memref<1x4x16x16xbf16, #tpu.memory_space<vmem>>, vector<1x1x16x16xbf16>
    %323 = vector.shape_cast %322 : vector<1x1x16x16xbf16> to vector<16x16xbf16>
    %324 = vector.shape_cast %321 : vector<16x16xbf16> to vector<1x1x16x16xbf16>
    tpu.vector_store %arg16[%c0_203, %c1_204, %c0_205, %c0_206], %324 {strides = array<i32>} : memref<1x4x16x16xbf16, #tpu.memory_space<vmem>>, vector<1x1x16x16xbf16>,
    %325 = arith.truncf %319 : vector<16x16xf32> to vector<16x16xbf16>
    %cst_207 = arith.constant dense<0.000000e+00> : vector<16x32xf32>
    %326 = tpu.matmul %325, %305, %cst_207 {dimension_numbers = #tpu.dot_dimension_numbers<[1], [0], [0], [1], [0, 0, 1, 1], [], []>} : vector<16x16xbf16>, vector<16x32xbf16>, vector<16x32xf32> -> vector<16x32xf32>
    %c0_208 = arith.constant 0 : index
    %c32_209 = arith.constant 32 : index
    %327 = vector.load %arg19[%c0_208, %c32_209] : memref<16x128xf32, #tpu.memory_space<vmem>>, vector<16x32xf32>
    tpu.vector_store %arg19[%c0_208, %c32_209], %326 {strides = array<i32>} : memref<16x128xf32, #tpu.memory_space<vmem>>, vector<16x32xf32>,
    %328 = vector.extract_strided_slice %277 {offsets = [0, 64], sizes = [16, 32], strides = [1, 1]} : vector<16x384xbf16> to vector<16x32xbf16>
    %329 = vector.extract_strided_slice %277 {offsets = [0, 192], sizes = [16, 32], strides = [1, 1]} : vector<16x384xbf16> to vector<16x32xbf16>
    %330 = vector.extract_strided_slice %277 {offsets = [0, 320], sizes = [16, 32], strides = [1, 1]} : vector<16x384xbf16> to vector<16x32xbf16>
    %cst_210 = arith.constant dense<0.000000e+00> : vector<16x16xf32>
    %331 = tpu.matmul %328, %329, %cst_210 {dimension_numbers = #tpu.dot_dimension_numbers<[1], [1], [0], [0], [0, 0, 1, 0], [], []>} : vector<16x32xbf16>, vector<16x32xbf16>, vector<16x16xf32> -> vector<16x16xf32>
    %cst_211 = arith.constant 0.176776692 : f32
    %332 = vector.broadcast %cst_211 : f32 to vector<16x16xf32>
    %333 = arith.mulf %331, %332 : vector<16x16xf32>
    %334 = arith.addf %333, %145 : vector<16x16xf32>
    %cst_212 = arith.constant dense<0xFF800000> : vector<16xf32>
    %335 = vector.multi_reduction <maximumf>, %334, %cst_212 [1] : vector<16x16xf32> to vector<16xf32>
    %336 = vector.shape_cast %335 : vector<16xf32> to vector<16x1xf32>
    %337 = vector.broadcast %336 : vector<16x1xf32> to vector<16x16xf32>
    %338 = arith.subf %334, %337 : vector<16x16xf32>
    %339 = math.exp %338 : vector<16x16xf32>
    %cst_213 = arith.constant dense<0.000000e+00> : vector<16xf32>
    %340 = vector.multi_reduction <add>, %339, %cst_213 [1] : vector<16x16xf32> to vector<16xf32>
    %341 = vector.shape_cast %340 : vector<16xf32> to vector<16x1xf32>
    %342 = tpu.reciprocal %341 {approx = true} : vector<16x1xf32> -> vector<16x1xf32>
    %343 = vector.broadcast %342 : vector<16x1xf32> to vector<16x16xf32>
    %344 = arith.mulf %339, %343 : vector<16x16xf32>
    %345 = arith.mulf %344, %149 : vector<16x16xf32>
    %346 = arith.truncf %345 : vector<16x16xf32> to vector<16x16xbf16>
    %c0_214 = arith.constant 0 : index
    %c2_215 = arith.constant 2 : index
    %c0_216 = arith.constant 0 : index
    %c0_217 = arith.constant 0 : index
    %347 = vector.load %arg16[%c0_214, %c2_215, %c0_216, %c0_217] : memref<1x4x16x16xbf16, #tpu.memory_space<vmem>>, vector<1x1x16x16xbf16>
    %348 = vector.shape_cast %347 : vector<1x1x16x16xbf16> to vector<16x16xbf16>
    %349 = vector.shape_cast %346 : vector<16x16xbf16> to vector<1x1x16x16xbf16>
    tpu.vector_store %arg16[%c0_214, %c2_215, %c0_216, %c0_217], %349 {strides = array<i32>} : memref<1x4x16x16xbf16, #tpu.memory_space<vmem>>, vector<1x1x16x16xbf16>,
    %350 = arith.truncf %344 : vector<16x16xf32> to vector<16x16xbf16>
    %cst_218 = arith.constant dense<0.000000e+00> : vector<16x32xf32>
    %351 = tpu.matmul %350, %330, %cst_218 {dimension_numbers = #tpu.dot_dimension_numbers<[1], [0], [0], [1], [0, 0, 1, 1], [], []>} : vector<16x16xbf16>, vector<16x32xbf16>, vector<16x32xf32> -> vector<16x32xf32>
    %c0_219 = arith.constant 0 : index
    %c64_220 = arith.constant 64 : index
    %352 = vector.load %arg19[%c0_219, %c64_220] : memref<16x128xf32, #tpu.memory_space<vmem>>, vector<16x32xf32>
    tpu.vector_store %arg19[%c0_219, %c64_220], %351 {strides = array<i32>} : memref<16x128xf32, #tpu.memory_space<vmem>>, vector<16x32xf32>,
    %353 = vector.extract_strided_slice %277 {offsets = [0, 96], sizes = [16, 32], strides = [1, 1]} : vector<16x384xbf16> to vector<16x32xbf16>
    %354 = vector.extract_strided_slice %277 {offsets = [0, 224], sizes = [16, 32], strides = [1, 1]} : vector<16x384xbf16> to vector<16x32xbf16>
    %355 = vector.extract_strided_slice %277 {offsets = [0, 352], sizes = [16, 32], strides = [1, 1]} : vector<16x384xbf16> to vector<16x32xbf16>
    %cst_221 = arith.constant dense<0.000000e+00> : vector<16x16xf32>
    %356 = tpu.matmul %353, %354, %cst_221 {dimension_numbers = #tpu.dot_dimension_numbers<[1], [1], [0], [0], [0, 0, 1, 0], [], []>} : vector<16x32xbf16>, vector<16x32xbf16>, vector<16x16xf32> -> vector<16x16xf32>
    %cst_222 = arith.constant 0.176776692 : f32
    %357 = vector.broadcast %cst_222 : f32 to vector<16x16xf32>
    %358 = arith.mulf %356, %357 : vector<16x16xf32>
    %359 = arith.addf %358, %145 : vector<16x16xf32>
    %cst_223 = arith.constant dense<0xFF800000> : vector<16xf32>
    %360 = vector.multi_reduction <maximumf>, %359, %cst_223 [1] : vector<16x16xf32> to vector<16xf32>
    %361 = vector.shape_cast %360 : vector<16xf32> to vector<16x1xf32>
    %362 = vector.broadcast %361 : vector<16x1xf32> to vector<16x16xf32>
    %363 = arith.subf %359, %362 : vector<16x16xf32>
    %364 = math.exp %363 : vector<16x16xf32>
    %cst_224 = arith.constant dense<0.000000e+00> : vector<16xf32>
    %365 = vector.multi_reduction <add>, %364, %cst_224 [1] : vector<16x16xf32> to vector<16xf32>
    %366 = vector.shape_cast %365 : vector<16xf32> to vector<16x1xf32>
    %367 = tpu.reciprocal %366 {approx = true} : vector<16x1xf32> -> vector<16x1xf32>
    %368 = vector.broadcast %367 : vector<16x1xf32> to vector<16x16xf32>
    %369 = arith.mulf %364, %368 : vector<16x16xf32>
    %370 = arith.mulf %369, %149 : vector<16x16xf32>
    %371 = arith.truncf %370 : vector<16x16xf32> to vector<16x16xbf16>
    %c0_225 = arith.constant 0 : index
    %c3_226 = arith.constant 3 : index
    %c0_227 = arith.constant 0 : index
    %c0_228 = arith.constant 0 : index
    %372 = vector.load %arg16[%c0_225, %c3_226, %c0_227, %c0_228] : memref<1x4x16x16xbf16, #tpu.memory_space<vmem>>, vector<1x1x16x16xbf16>
    %373 = vector.shape_cast %372 : vector<1x1x16x16xbf16> to vector<16x16xbf16>
    %374 = vector.shape_cast %371 : vector<16x16xbf16> to vector<1x1x16x16xbf16>
    tpu.vector_store %arg16[%c0_225, %c3_226, %c0_227, %c0_228], %374 {strides = array<i32>} : memref<1x4x16x16xbf16, #tpu.memory_space<vmem>>, vector<1x1x16x16xbf16>,
    %375 = arith.truncf %369 : vector<16x16xf32> to vector<16x16xbf16>
    %cst_229 = arith.constant dense<0.000000e+00> : vector<16x32xf32>
    %376 = tpu.matmul %375, %355, %cst_229 {dimension_numbers = #tpu.dot_dimension_numbers<[1], [0], [0], [1], [0, 0, 1, 1], [], []>} : vector<16x16xbf16>, vector<16x32xbf16>, vector<16x32xf32> -> vector<16x32xf32>
    %c0_230 = arith.constant 0 : index
    %c96_231 = arith.constant 96 : index
    %377 = vector.load %arg19[%c0_230, %c96_231] : memref<16x128xf32, #tpu.memory_space<vmem>>, vector<16x32xf32>
    tpu.vector_store %arg19[%c0_230, %c96_231], %376 {strides = array<i32>} : memref<16x128xf32, #tpu.memory_space<vmem>>, vector<16x32xf32>,
    %c0_232 = arith.constant 0 : index
    %c0_233 = arith.constant 0 : index
    %378 = vector.load %arg19[%c0_232, %c0_233] : memref<16x128xf32, #tpu.memory_space<vmem>>, vector<16x128xf32>
    %379 = arith.truncf %378 : vector<16x128xf32> to vector<16x128xbf16>
    %c1_234 = arith.constant 1 : index
    %c0_235 = arith.constant 0 : index
    %c0_236 = arith.constant 0 : index
    %380 = vector.load %arg11[%c1_234, %c0_235, %c0_236] : memref<3x128x128xbf16, #tpu.memory_space<vmem>>, vector<1x128x128xbf16>
    %381 = vector.shape_cast %380 : vector<1x128x128xbf16> to vector<128x128xbf16>
    %cst_237 = arith.constant dense<0.000000e+00> : vector<16x128xf32>
    %382 = tpu.matmul %379, %381, %cst_237 {dimension_numbers = #tpu.dot_dimension_numbers<[1], [0], [0], [1], [0, 0, 1, 1], [], []>} : vector<16x128xbf16>, vector<128x128xbf16>, vector<16x128xf32> -> vector<16x128xf32>
    %c1_238 = arith.constant 1 : index
    %c0_239 = arith.constant 0 : index
    %c0_240 = arith.constant 0 : index
    %383 = vector.load %arg12[%c1_238, %c0_239, %c0_240] : memref<3x1x128xf32, #tpu.memory_space<vmem>>, vector<1x1x128xf32>
    %384 = vector.shape_cast %383 : vector<1x1x128xf32> to vector<1x128xf32>
    %385 = vector.broadcast %384 : vector<1x128xf32> to vector<16x128xf32>
    %386 = arith.addf %382, %385 : vector<16x128xf32>
    %387 = arith.addf %268, %386 : vector<16x128xf32>
    %388 = arith.truncf %387 : vector<16x128xf32> to vector<16x128xbf16>
    %c2_241 = arith.constant 2 : index
    %c0_242 = arith.constant 0 : index
    %c0_243 = arith.constant 0 : index
    %389 = vector.load %arg9[%c2_241, %c0_242, %c0_243] : memref<3x128x384xbf16, #tpu.memory_space<vmem>>, vector<1x128x384xbf16>
    %390 = vector.shape_cast %389 : vector<1x128x384xbf16> to vector<128x384xbf16>
    %cst_244 = arith.constant dense<0.000000e+00> : vector<16x384xf32>
    %391 = tpu.matmul %388, %390, %cst_244 {dimension_numbers = #tpu.dot_dimension_numbers<[1], [0], [0], [1], [0, 0, 1, 1], [], []>} : vector<16x128xbf16>, vector<128x384xbf16>, vector<16x384xf32> -> vector<16x384xf32>
    %c2_245 = arith.constant 2 : index
    %c0_246 = arith.constant 0 : index
    %c0_247 = arith.constant 0 : index
    %392 = vector.load %arg10[%c2_245, %c0_246, %c0_247] : memref<3x1x384xf32, #tpu.memory_space<vmem>>, vector<1x1x384xf32>
    %393 = vector.shape_cast %392 : vector<1x1x384xf32> to vector<1x384xf32>
    %394 = vector.broadcast %393 : vector<1x384xf32> to vector<16x384xf32>
    %395 = arith.addf %391, %394 : vector<16x384xf32>
    %396 = arith.truncf %395 : vector<16x384xf32> to vector<16x384xbf16>
    %397 = vector.extract_strided_slice %396 {offsets = [0, 0], sizes = [16, 32], strides = [1, 1]} : vector<16x384xbf16> to vector<16x32xbf16>
    %398 = vector.extract_strided_slice %396 {offsets = [0, 128], sizes = [16, 32], strides = [1, 1]} : vector<16x384xbf16> to vector<16x32xbf16>
    %399 = vector.extract_strided_slice %396 {offsets = [0, 256], sizes = [16, 32], strides = [1, 1]} : vector<16x384xbf16> to vector<16x32xbf16>
    %cst_248 = arith.constant dense<0.000000e+00> : vector<16x16xf32>
    %400 = tpu.matmul %397, %398, %cst_248 {dimension_numbers = #tpu.dot_dimension_numbers<[1], [1], [0], [0], [0, 0, 1, 0], [], []>} : vector<16x32xbf16>, vector<16x32xbf16>, vector<16x16xf32> -> vector<16x16xf32>
    %cst_249 = arith.constant 0.176776692 : f32
    %401 = vector.broadcast %cst_249 : f32 to vector<16x16xf32>
    %402 = arith.mulf %400, %401 : vector<16x16xf32>
    %403 = arith.addf %402, %145 : vector<16x16xf32>
    %cst_250 = arith.constant dense<0xFF800000> : vector<16xf32>
    %404 = vector.multi_reduction <maximumf>, %403, %cst_250 [1] : vector<16x16xf32> to vector<16xf32>
    %405 = vector.shape_cast %404 : vector<16xf32> to vector<16x1xf32>
    %406 = vector.broadcast %405 : vector<16x1xf32> to vector<16x16xf32>
    %407 = arith.subf %403, %406 : vector<16x16xf32>
    %408 = math.exp %407 : vector<16x16xf32>
    %cst_251 = arith.constant dense<0.000000e+00> : vector<16xf32>
    %409 = vector.multi_reduction <add>, %408, %cst_251 [1] : vector<16x16xf32> to vector<16xf32>
    %410 = vector.shape_cast %409 : vector<16xf32> to vector<16x1xf32>
    %411 = tpu.reciprocal %410 {approx = true} : vector<16x1xf32> -> vector<16x1xf32>
    %412 = vector.broadcast %411 : vector<16x1xf32> to vector<16x16xf32>
    %413 = arith.mulf %408, %412 : vector<16x16xf32>
    %414 = arith.mulf %413, %149 : vector<16x16xf32>
    %415 = arith.truncf %414 : vector<16x16xf32> to vector<16x16xbf16>
    %c0_252 = arith.constant 0 : index
    %c0_253 = arith.constant 0 : index
    %c0_254 = arith.constant 0 : index
    %c0_255 = arith.constant 0 : index
    %416 = vector.load %arg17[%c0_252, %c0_253, %c0_254, %c0_255] : memref<1x4x16x16xbf16, #tpu.memory_space<vmem>>, vector<1x1x16x16xbf16>
    %417 = vector.shape_cast %416 : vector<1x1x16x16xbf16> to vector<16x16xbf16>
    %418 = vector.shape_cast %415 : vector<16x16xbf16> to vector<1x1x16x16xbf16>
    tpu.vector_store %arg17[%c0_252, %c0_253, %c0_254, %c0_255], %418 {strides = array<i32>} : memref<1x4x16x16xbf16, #tpu.memory_space<vmem>>, vector<1x1x16x16xbf16>,
    %419 = arith.truncf %413 : vector<16x16xf32> to vector<16x16xbf16>
    %cst_256 = arith.constant dense<0.000000e+00> : vector<16x32xf32>
    %420 = tpu.matmul %419, %399, %cst_256 {dimension_numbers = #tpu.dot_dimension_numbers<[1], [0], [0], [1], [0, 0, 1, 1], [], []>} : vector<16x16xbf16>, vector<16x32xbf16>, vector<16x32xf32> -> vector<16x32xf32>
    %c0_257 = arith.constant 0 : index
    %c0_258 = arith.constant 0 : index
    %421 = vector.load %arg19[%c0_257, %c0_258] : memref<16x128xf32, #tpu.memory_space<vmem>>, vector<16x32xf32>
    tpu.vector_store %arg19[%c0_257, %c0_258], %420 {strides = array<i32>} : memref<16x128xf32, #tpu.memory_space<vmem>>, vector<16x32xf32>,
    %422 = vector.extract_strided_slice %396 {offsets = [0, 32], sizes = [16, 32], strides = [1, 1]} : vector<16x384xbf16> to vector<16x32xbf16>
    %423 = vector.extract_strided_slice %396 {offsets = [0, 160], sizes = [16, 32], strides = [1, 1]} : vector<16x384xbf16> to vector<16x32xbf16>
    %424 = vector.extract_strided_slice %396 {offsets = [0, 288], sizes = [16, 32], strides = [1, 1]} : vector<16x384xbf16> to vector<16x32xbf16>
    %cst_259 = arith.constant dense<0.000000e+00> : vector<16x16xf32>
    %425 = tpu.matmul %422, %423, %cst_259 {dimension_numbers = #tpu.dot_dimension_numbers<[1], [1], [0], [0], [0, 0, 1, 0], [], []>} : vector<16x32xbf16>, vector<16x32xbf16>, vector<16x16xf32> -> vector<16x16xf32>
    %cst_260 = arith.constant 0.176776692 : f32
    %426 = vector.broadcast %cst_260 : f32 to vector<16x16xf32>
    %427 = arith.mulf %425, %426 : vector<16x16xf32>
    %428 = arith.addf %427, %145 : vector<16x16xf32>
    %cst_261 = arith.constant dense<0xFF800000> : vector<16xf32>
    %429 = vector.multi_reduction <maximumf>, %428, %cst_261 [1] : vector<16x16xf32> to vector<16xf32>
    %430 = vector.shape_cast %429 : vector<16xf32> to vector<16x1xf32>
    %431 = vector.broadcast %430 : vector<16x1xf32> to vector<16x16xf32>
    %432 = arith.subf %428, %431 : vector<16x16xf32>
    %433 = math.exp %432 : vector<16x16xf32>
    %cst_262 = arith.constant dense<0.000000e+00> : vector<16xf32>
    %434 = vector.multi_reduction <add>, %433, %cst_262 [1] : vector<16x16xf32> to vector<16xf32>
    %435 = vector.shape_cast %434 : vector<16xf32> to vector<16x1xf32>
    %436 = tpu.reciprocal %435 {approx = true} : vector<16x1xf32> -> vector<16x1xf32>
    %437 = vector.broadcast %436 : vector<16x1xf32> to vector<16x16xf32>
    %438 = arith.mulf %433, %437 : vector<16x16xf32>
    %439 = arith.mulf %438, %149 : vector<16x16xf32>
    %440 = arith.truncf %439 : vector<16x16xf32> to vector<16x16xbf16>
    %c0_263 = arith.constant 0 : index
    %c1_264 = arith.constant 1 : index
    %c0_265 = arith.constant 0 : index
    %c0_266 = arith.constant 0 : index
    %441 = vector.load %arg17[%c0_263, %c1_264, %c0_265, %c0_266] : memref<1x4x16x16xbf16, #tpu.memory_space<vmem>>, vector<1x1x16x16xbf16>
    %442 = vector.shape_cast %441 : vector<1x1x16x16xbf16> to vector<16x16xbf16>
    %443 = vector.shape_cast %440 : vector<16x16xbf16> to vector<1x1x16x16xbf16>
    tpu.vector_store %arg17[%c0_263, %c1_264, %c0_265, %c0_266], %443 {strides = array<i32>} : memref<1x4x16x16xbf16, #tpu.memory_space<vmem>>, vector<1x1x16x16xbf16>,
    %444 = arith.truncf %438 : vector<16x16xf32> to vector<16x16xbf16>
    %cst_267 = arith.constant dense<0.000000e+00> : vector<16x32xf32>
    %445 = tpu.matmul %444, %424, %cst_267 {dimension_numbers = #tpu.dot_dimension_numbers<[1], [0], [0], [1], [0, 0, 1, 1], [], []>} : vector<16x16xbf16>, vector<16x32xbf16>, vector<16x32xf32> -> vector<16x32xf32>
    %c0_268 = arith.constant 0 : index
    %c32_269 = arith.constant 32 : index
    %446 = vector.load %arg19[%c0_268, %c32_269] : memref<16x128xf32, #tpu.memory_space<vmem>>, vector<16x32xf32>
    tpu.vector_store %arg19[%c0_268, %c32_269], %445 {strides = array<i32>} : memref<16x128xf32, #tpu.memory_space<vmem>>, vector<16x32xf32>,
    %447 = vector.extract_strided_slice %396 {offsets = [0, 64], sizes = [16, 32], strides = [1, 1]} : vector<16x384xbf16> to vector<16x32xbf16>
    %448 = vector.extract_strided_slice %396 {offsets = [0, 192], sizes = [16, 32], strides = [1, 1]} : vector<16x384xbf16> to vector<16x32xbf16>
    %449 = vector.extract_strided_slice %396 {offsets = [0, 320], sizes = [16, 32], strides = [1, 1]} : vector<16x384xbf16> to vector<16x32xbf16>
    %cst_270 = arith.constant dense<0.000000e+00> : vector<16x16xf32>
    %450 = tpu.matmul %447, %448, %cst_270 {dimension_numbers = #tpu.dot_dimension_numbers<[1], [1], [0], [0], [0, 0, 1, 0], [], []>} : vector<16x32xbf16>, vector<16x32xbf16>, vector<16x16xf32> -> vector<16x16xf32>
    %cst_271 = arith.constant 0.176776692 : f32
    %451 = vector.broadcast %cst_271 : f32 to vector<16x16xf32>
    %452 = arith.mulf %450, %451 : vector<16x16xf32>
    %453 = arith.addf %452, %145 : vector<16x16xf32>
    %cst_272 = arith.constant dense<0xFF800000> : vector<16xf32>
    %454 = vector.multi_reduction <maximumf>, %453, %cst_272 [1] : vector<16x16xf32> to vector<16xf32>
    %455 = vector.shape_cast %454 : vector<16xf32> to vector<16x1xf32>
    %456 = vector.broadcast %455 : vector<16x1xf32> to vector<16x16xf32>
    %457 = arith.subf %453, %456 : vector<16x16xf32>
    %458 = math.exp %457 : vector<16x16xf32>
    %cst_273 = arith.constant dense<0.000000e+00> : vector<16xf32>
    %459 = vector.multi_reduction <add>, %458, %cst_273 [1] : vector<16x16xf32> to vector<16xf32>
    %460 = vector.shape_cast %459 : vector<16xf32> to vector<16x1xf32>
    %461 = tpu.reciprocal %460 {approx = true} : vector<16x1xf32> -> vector<16x1xf32>
    %462 = vector.broadcast %461 : vector<16x1xf32> to vector<16x16xf32>
    %463 = arith.mulf %458, %462 : vector<16x16xf32>
    %464 = arith.mulf %463, %149 : vector<16x16xf32>
    %465 = arith.truncf %464 : vector<16x16xf32> to vector<16x16xbf16>
    %c0_274 = arith.constant 0 : index
    %c2_275 = arith.constant 2 : index
    %c0_276 = arith.constant 0 : index
    %c0_277 = arith.constant 0 : index
    %466 = vector.load %arg17[%c0_274, %c2_275, %c0_276, %c0_277] : memref<1x4x16x16xbf16, #tpu.memory_space<vmem>>, vector<1x1x16x16xbf16>
    %467 = vector.shape_cast %466 : vector<1x1x16x16xbf16> to vector<16x16xbf16>
    %468 = vector.shape_cast %465 : vector<16x16xbf16> to vector<1x1x16x16xbf16>
    tpu.vector_store %arg17[%c0_274, %c2_275, %c0_276, %c0_277], %468 {strides = array<i32>} : memref<1x4x16x16xbf16, #tpu.memory_space<vmem>>, vector<1x1x16x16xbf16>,
    %469 = arith.truncf %463 : vector<16x16xf32> to vector<16x16xbf16>
    %cst_278 = arith.constant dense<0.000000e+00> : vector<16x32xf32>
    %470 = tpu.matmul %469, %449, %cst_278 {dimension_numbers = #tpu.dot_dimension_numbers<[1], [0], [0], [1], [0, 0, 1, 1], [], []>} : vector<16x16xbf16>, vector<16x32xbf16>, vector<16x32xf32> -> vector<16x32xf32>
    %c0_279 = arith.constant 0 : index
    %c64_280 = arith.constant 64 : index
    %471 = vector.load %arg19[%c0_279, %c64_280] : memref<16x128xf32, #tpu.memory_space<vmem>>, vector<16x32xf32>
    tpu.vector_store %arg19[%c0_279, %c64_280], %470 {strides = array<i32>} : memref<16x128xf32, #tpu.memory_space<vmem>>, vector<16x32xf32>,
    %472 = vector.extract_strided_slice %396 {offsets = [0, 96], sizes = [16, 32], strides = [1, 1]} : vector<16x384xbf16> to vector<16x32xbf16>
    %473 = vector.extract_strided_slice %396 {offsets = [0, 224], sizes = [16, 32], strides = [1, 1]} : vector<16x384xbf16> to vector<16x32xbf16>
    %474 = vector.extract_strided_slice %396 {offsets = [0, 352], sizes = [16, 32], strides = [1, 1]} : vector<16x384xbf16> to vector<16x32xbf16>
    %cst_281 = arith.constant dense<0.000000e+00> : vector<16x16xf32>
    %475 = tpu.matmul %472, %473, %cst_281 {dimension_numbers = #tpu.dot_dimension_numbers<[1], [1], [0], [0], [0, 0, 1, 0], [], []>} : vector<16x32xbf16>, vector<16x32xbf16>, vector<16x16xf32> -> vector<16x16xf32>
    %cst_282 = arith.constant 0.176776692 : f32
    %476 = vector.broadcast %cst_282 : f32 to vector<16x16xf32>
    %477 = arith.mulf %475, %476 : vector<16x16xf32>
    %478 = arith.addf %477, %145 : vector<16x16xf32>
    %cst_283 = arith.constant dense<0xFF800000> : vector<16xf32>
    %479 = vector.multi_reduction <maximumf>, %478, %cst_283 [1] : vector<16x16xf32> to vector<16xf32>
    %480 = vector.shape_cast %479 : vector<16xf32> to vector<16x1xf32>
    %481 = vector.broadcast %480 : vector<16x1xf32> to vector<16x16xf32>
    %482 = arith.subf %478, %481 : vector<16x16xf32>
    %483 = math.exp %482 : vector<16x16xf32>
    %cst_284 = arith.constant dense<0.000000e+00> : vector<16xf32>
    %484 = vector.multi_reduction <add>, %483, %cst_284 [1] : vector<16x16xf32> to vector<16xf32>
    %485 = vector.shape_cast %484 : vector<16xf32> to vector<16x1xf32>
    %486 = tpu.reciprocal %485 {approx = true} : vector<16x1xf32> -> vector<16x1xf32>
    %487 = vector.broadcast %486 : vector<16x1xf32> to vector<16x16xf32>
    %488 = arith.mulf %483, %487 : vector<16x16xf32>
    %489 = arith.mulf %488, %149 : vector<16x16xf32>
    %490 = arith.truncf %489 : vector<16x16xf32> to vector<16x16xbf16>
    %c0_285 = arith.constant 0 : index
    %c3_286 = arith.constant 3 : index
    %c0_287 = arith.constant 0 : index
    %c0_288 = arith.constant 0 : index
    %491 = vector.load %arg17[%c0_285, %c3_286, %c0_287, %c0_288] : memref<1x4x16x16xbf16, #tpu.memory_space<vmem>>, vector<1x1x16x16xbf16>
    %492 = vector.shape_cast %491 : vector<1x1x16x16xbf16> to vector<16x16xbf16>
    %493 = vector.shape_cast %490 : vector<16x16xbf16> to vector<1x1x16x16xbf16>
    tpu.vector_store %arg17[%c0_285, %c3_286, %c0_287, %c0_288], %493 {strides = array<i32>} : memref<1x4x16x16xbf16, #tpu.memory_space<vmem>>, vector<1x1x16x16xbf16>,
    %494 = arith.truncf %488 : vector<16x16xf32> to vector<16x16xbf16>
    %cst_289 = arith.constant dense<0.000000e+00> : vector<16x32xf32>
    %495 = tpu.matmul %494, %474, %cst_289 {dimension_numbers = #tpu.dot_dimension_numbers<[1], [0], [0], [1], [0, 0, 1, 1], [], []>} : vector<16x16xbf16>, vector<16x32xbf16>, vector<16x32xf32> -> vector<16x32xf32>
    %c0_290 = arith.constant 0 : index
    %c96_291 = arith.constant 96 : index
    %496 = vector.load %arg19[%c0_290, %c96_291] : memref<16x128xf32, #tpu.memory_space<vmem>>, vector<16x32xf32>
    tpu.vector_store %arg19[%c0_290, %c96_291], %495 {strides = array<i32>} : memref<16x128xf32, #tpu.memory_space<vmem>>, vector<16x32xf32>,
    %c0_292 = arith.constant 0 : index
    %c0_293 = arith.constant 0 : index
    %497 = vector.load %arg19[%c0_292, %c0_293] : memref<16x128xf32, #tpu.memory_space<vmem>>, vector<16x128xf32>
    %498 = arith.truncf %497 : vector<16x128xf32> to vector<16x128xbf16>
    %c2_294 = arith.constant 2 : index
    %c0_295 = arith.constant 0 : index
    %c0_296 = arith.constant 0 : index
    %499 = vector.load %arg11[%c2_294, %c0_295, %c0_296] : memref<3x128x128xbf16, #tpu.memory_space<vmem>>, vector<1x128x128xbf16>
    %500 = vector.shape_cast %499 : vector<1x128x128xbf16> to vector<128x128xbf16>
    %cst_297 = arith.constant dense<0.000000e+00> : vector<16x128xf32>
    %501 = tpu.matmul %498, %500, %cst_297 {dimension_numbers = #tpu.dot_dimension_numbers<[1], [0], [0], [1], [0, 0, 1, 1], [], []>} : vector<16x128xbf16>, vector<128x128xbf16>, vector<16x128xf32> -> vector<16x128xf32>
    %c2_298 = arith.constant 2 : index
    %c0_299 = arith.constant 0 : index
    %c0_300 = arith.constant 0 : index
    %502 = vector.load %arg12[%c2_298, %c0_299, %c0_300] : memref<3x1x128xf32, #tpu.memory_space<vmem>>, vector<1x1x128xf32>
    %503 = vector.shape_cast %502 : vector<1x1x128xf32> to vector<1x128xf32>
    %504 = vector.broadcast %503 : vector<1x128xf32> to vector<16x128xf32>
    %505 = arith.addf %501, %504 : vector<16x128xf32>
    %506 = arith.addf %387, %505 : vector<16x128xf32>
    %c0_301 = arith.constant 0 : index
    %c0_302 = arith.constant 0 : index
    %c0_303 = arith.constant 0 : index
    %507 = vector.load %arg14[%c0_301, %c0_302, %c0_303] : memref<1x16x128xf32, #tpu.memory_space<vmem>>, vector<1x16x128xf32>
    %508 = vector.shape_cast %507 : vector<1x16x128xf32> to vector<16x128xf32>
    %509 = vector.shape_cast %506 : vector<16x128xf32> to vector<1x16x128xf32>
    tpu.vector_store %arg14[%c0_301, %c0_302, %c0_303], %509 {strides = array<i32>} : memref<1x16x128xf32, #tpu.memory_space<vmem>>, vector<1x16x128xf32>,
    return
  }
  func.func @transform_0(%arg0: i32) -> (i32, i32, i32) {
    %c0_i32 = arith.constant 0 : i32
    %c0_i32_0 = arith.constant 0 : i32
    %c0_i32_1 = arith.constant 0 : i32
    return %arg0, %c0_i32, %c0_i32_0 : i32, i32, i32
  }
  func.func @transform_1(%arg0: i32) -> (i32, i32, i32) {
    %c0_i32 = arith.constant 0 : i32
    %c0_i32_0 = arith.constant 0 : i32
    %c0_i32_1 = arith.constant 0 : i32
    return %arg0, %c0_i32, %c0_i32_0 : i32, i32, i32
  }
  func.func @transform_2(%arg0: i32) -> (i32, i32, i32) {
    %c0_i32 = arith.constant 0 : i32
    %c0_i32_0 = arith.constant 0 : i32
    %c0_i32_1 = arith.constant 0 : i32
    return %arg0, %c0_i32, %c0_i32_0 : i32, i32, i32
  }
  func.func @transform_3(%arg0: i32) -> (i32, i32, i32) {
    %c0_i32 = arith.constant 0 : i32
    %c0_i32_0 = arith.constant 0 : i32
    %c0_i32_1 = arith.constant 0 : i32
    %c0_i32_2 = arith.constant 0 : i32
    return %c0_i32, %c0_i32_0, %c0_i32_1 : i32, i32, i32
  }
  func.func @transform_4(%arg0: i32) -> (i32, i32, i32) {
    %c0_i32 = arith.constant 0 : i32
    %c0_i32_0 = arith.constant 0 : i32
    %c0_i32_1 = arith.constant 0 : i32
    %c0_i32_2 = arith.constant 0 : i32
    return %c0_i32, %c0_i32_0, %c0_i32_1 : i32, i32, i32
  }
  func.func @transform_5(%arg0: i32) -> (i32, i32, i32) {
    %c0_i32 = arith.constant 0 : i32
    %c0_i32_0 = arith.constant 0 : i32
    %c0_i32_1 = arith.constant 0 : i32
    %c0_i32_2 = arith.constant 0 : i32
    return %c0_i32, %c0_i32_0, %c0_i32_1 : i32, i32, i32
  }
  func.func @transform_6(%arg0: i32) -> (i32, i32) {
    %c0_i32 = arith.constant 0 : i32
    %c0_i32_0 = arith.constant 0 : i32
    %c0_i32_1 = arith.constant 0 : i32
    return %c0_i32, %c0_i32_0 : i32, i32
  }
  func.func @transform_7(%arg0: i32) -> (i32, i32) {
    %c0_i32 = arith.constant 0 : i32
    %c0_i32_0 = arith.constant 0 : i32
    %c0_i32_1 = arith.constant 0 : i32
    return %c0_i32, %c0_i32_0 : i32, i32
  }
  func.func @transform_8(%arg0: i32) -> (i32, i32, i32) {
    %c0_i32 = arith.constant 0 : i32
    %c0_i32_0 = arith.constant 0 : i32
    %c0_i32_1 = arith.constant 0 : i32
    %c0_i32_2 = arith.constant 0 : i32
    return %c0_i32, %c0_i32_0, %c0_i32_1 : i32, i32, i32
  }
  func.func @transform_9(%arg0: i32) -> (i32, i32, i32) {
    %c0_i32 = arith.constant 0 : i32
    %c0_i32_0 = arith.constant 0 : i32
    %c0_i32_1 = arith.constant 0 : i32
    %c0_i32_2 = arith.constant 0 : i32
    return %c0_i32, %c0_i32_0, %c0_i32_1 : i32, i32, i32
  }
  func.func @transform_10(%arg0: i32) -> (i32, i32, i32) {
    %c0_i32 = arith.constant 0 : i32
    %c0_i32_0 = arith.constant 0 : i32
    %c0_i32_1 = arith.constant 0 : i32
    %c0_i32_2 = arith.constant 0 : i32
    return %c0_i32, %c0_i32_0, %c0_i32_1 : i32, i32, i32
  }
  func.func @transform_11(%arg0: i32) -> (i32, i32, i32) {
    %c0_i32 = arith.constant 0 : i32
    %c0_i32_0 = arith.constant 0 : i32
    %c0_i32_1 = arith.constant 0 : i32
    %c0_i32_2 = arith.constant 0 : i32
    return %c0_i32, %c0_i32_0, %c0_i32_1 : i32, i32, i32
  }
  func.func @transform_12(%arg0: i32) -> i32 {
    %c0_i32 = arith.constant 0 : i32
    %c0_i32_0 = arith.constant 0 : i32
    return %c0_i32 : i32
  }
  func.func @transform_13(%arg0: i32) -> (i32, i32, i32) {
    %c0_i32 = arith.constant 0 : i32
    %c0_i32_0 = arith.constant 0 : i32
    %c0_i32_1 = arith.constant 0 : i32
    return %arg0, %c0_i32, %c0_i32_0 : i32, i32, i32
  }
  func.func @transform_14(%arg0: i32) -> (i32, i32, i32, i32) {
    %c0_i32 = arith.constant 0 : i32
    %c0_i32_0 = arith.constant 0 : i32
    %c0_i32_1 = arith.constant 0 : i32
    %c0_i32_2 = arith.constant 0 : i32
    return %arg0, %c0_i32, %c0_i32_0, %c0_i32_1 : i32, i32, i32, i32
  }
  func.func @transform_15(%arg0: i32) -> (i32, i32, i32, i32) {
    %c0_i32 = arith.constant 0 : i32
    %c0_i32_0 = arith.constant 0 : i32
    %c0_i32_1 = arith.constant 0 : i32
    %c0_i32_2 = arith.constant 0 : i32
    return %arg0, %c0_i32, %c0_i32_0, %c0_i32_1 : i32, i32, i32, i32
  }
  func.func @transform_16(%arg0: i32) -> (i32, i32, i32, i32) {
    %c0_i32 = arith.constant 0 : i32
    %c0_i32_0 = arith.constant 0 : i32
    %c0_i32_1 = arith.constant 0 : i32
    %c0_i32_2 = arith.constant 0 : i32
    return %arg0, %c0_i32, %c0_i32_0, %c0_i32_1 : i32, i32, i32, i32
  }
}

</mosaic_0001>

<bundles_post_ra>
// kernel: tpu_custom_call.1
= control target key start
LH: loop header
LB: loop body
LE: loop exit
PB: predicated region body
PF: predicated region fallthrough
CT: control target
= control target key end

     0   :  { %s9199_s0 = inlined_call_operand.hbm [shape: f32[2,16,128], index: 0, kind: input, shape index: {}]   ;;  %s9200_s1 = inlined_call_operand.hbm [shape: f32[2,16,128], index: 1, kind: input, shape index: {}]   ;;  %s9201_s2 = inlined_call_operand.hbm [shape: f32[2,1,16], index: 2, kind: input, shape index: {}]   ;;  %s9202_s3 = inlined_call_operand.hbm [shape: bf16[15,128,128], index: 3, kind: input, shape index: {}]   ;;  %s9203_s4 = inlined_call_operand.vmem [shape: f32[3,1,128], index: 4, kind: input, shape index: {}]   ;;  %s9204_s5 = inlined_call_operand.vmem [shape: f32[3,1,128], index: 5, kind: input, shape index: {}]   ;;  %s9205_s6 = inlined_call_operand.hbm [shape: bf16[128,128], index: 6, kind: input, shape index: {}]   ;;  %s9206_s7 = inlined_call_operand.vmem [shape: f32[1,128], index: 7, kind: input, shape index: {}]   ;;  %s9207_s8 = inlined_call_operand.hbm [shape: bf16[3,128,384], index: 8, kind: input, shape index: {}]   ;;  %s9208_s9 = inlined_call_operand.vmem [shape: f32[3,1,384], index: 9, kind: input, shape index: {}]   ;;  %s9209_s10 = inlined_call_operand.hbm [shape: bf16[3,128,128], index: 10, kind: input, shape index: {}]   ;;  %s9210_s11 = inlined_call_operand.vmem [shape: f32[3,1,128], index: 11, kind: input, shape index: {}]   ;;  %s9211_s12 = inlined_call_operand.<no memory space> [shape: f32[1], index: 12, kind: input, shape index: {}]   ;;  %s9212_s13 = inlined_call_operand.hbm [shape: f32[2,16,128], index: 13, kind: output, shape index: {0}]   ;;  %s9213_s14 = inlined_call_operand.hbm [shape: bf16[2,4,16,16], index: 14, kind: output, shape index: {1}]   ;;  %s9214_s15 = inlined_call_operand.hbm [shape: bf16[2,4,16,16], index: 15, kind: output, shape index: {2}]   ;;  %s9215_s16 = inlined_call_operand.hbm [shape: bf16[2,4,16,16], index: 16, kind: output, shape index: {3}]  }
   0x1   :  { %9251 = sst [smem:[#allocation36_spill]] %s9199_s0 }
   0x2   :  { %9252 = sst [smem:[#allocation37_spill]] %s9200_s1 }
   0x3   :  { %9253 = sst [smem:[#allocation38_spill]] %s9202_s3 }
   0x4   :  { %9254 = sst [smem:[#allocation39_spill]] %s9205_s6 }
   0x5   :  { %9255 = sst [smem:[#allocation40_spill]] %s9207_s8 }
   0x6   :  { %9256 = sst [smem:[#allocation41_spill]] %s9208_s9 }
   0x7   :  { %9257 = sst [smem:[#allocation42_spill]] %s9209_s10 }
   0x8   :  { %9258 = sst [smem:[#allocation43_spill]] %s9210_s11 }
   0x9   :  { %9259 = sst [smem:[#allocation44_spill]] %s9212_s13 }
   0xa   :  { %9260 = sst [smem:[#allocation45_spill]] %s9213_s14 }
   0xb   :  { %9261 = sst [smem:[#allocation46_spill]] %s9214_s15 }
   0xc   :  { %9262 = sst [smem:[#allocation47_spill]] %s9215_s16 }
   0xd   :  { %22 = sst [smem:[#allocation4]] %s9211_s12 }
   0xe   :  { %23 = vsyncpa [#allocation6], 0 }
   0xf   :  { %25 = vsyncpa [#allocation6 + $0x1], 0 }
  0x10   :  { %26 = vsyncpa [#allocation9], 0 }
  0x11   :  { %28 = vsyncpa [#allocation9 + $0x1], 0 }
  0x12   :  { %29 = vsyncpa [#allocation12], 0 }
  0x13   :  { %30 = vsyncpa [#allocation15], 0 }
  0x14   :  { %31 = vsyncpa [#allocation7], 0 }
  0x15   :  { %33 = vsyncpa [#allocation7 + $0x1], 0 }
  0x16   :  { %34 = vsyncpa [#allocation19], 0 }
  0x17   :  { %36 = vsyncpa [#allocation19 + $0x1], 0 }
  0x18   :  { %37 = vsyncpa [#allocation22], 0 }
  0x19   :  { %39 = vsyncpa [#allocation22 + $0x1], 0  ;;  %s7997_s23 = smov 0   ;;  %s7999_s24 = smov 0  }
  0x1a   :  { %s8001_s25 = smov 0   ;;  %s8003_s26 = smov 0  }
  0x1b LB: > { %9263 = sst [smem:[#allocation30_spill]] %s7869_s23  ;;  %s8018_s12 = sadd.s32 4294967295, %s7881_s26   ;;  %s7881_s26 = sphi %s8003_s26, %s9315_s26   ;;  %s7877_s25 = sphi %s8001_s25, %s9317_s25   ;;  %s7873_s24 = sphi %s7999_s24, %s9319_s24   ;;  %s7869_s23 = sphi %s7997_s23, %s9318_s23  }
  0x1c   : > { %9264 = sst [smem:[#allocation31_spill]] %s7877_s25  ;;  %s9217_s27 = sadd.s32 4294967294, %s7881_s26  }
  0x1d   : > { %p65_p0 = scmp.ne.s32.totalorder %s7873_s24, %s7869_s23  ;;  %p9221_p1 = scmp.eq.s32.totalorder %s8018_s12, 0 }
  0x1e   : > { %p357_p3 = scmp.eq.s32.totalorder %s9217_s27, 1  ;;  %p5784_p5 = scmp.ge.s32.totalorder %s7881_s26, 1 }
  0x1f   : > { %p8029_p4 = por %p9221_p1, %p65_p0  ;;  %p442_p7 = scmp.lt.s32.totalorder %s7881_s26, 3 }
  0x20   : > { %p8034_p6 = por %p357_p3, %p65_p0  ;;  %s7883_s0 = smov [#allocation11]  }
  0x21   : > { %s9265_s28 = scalar_select %p8029_p4, 1, 0 }
  0x22   : > { %s9266_s29 = scalar_select %p8034_p6, 1, 0 }
  0x23   : > { %p8039_p8 = pnand %p5784_p5, %p442_p7  ;;  %s454_s17 = sshll.u32 %s7883_s0, 4  ;;  %s8043_s17 = int_to_ptr.vmem [resolvable:$true] %s454_s17 }
  0x24   : > { %9267 = sst [smem:[#allocation32_spill]] %s9266_s29  ;;  %s7884_s19 = smov [#allocation14]  }
  0x25   : > { %s9268_s30 = scalar_select %p8039_p8, 1, 0 }
  0x26   : > { %p7068_p9 = pneg %p8039_p8  ;;  %s489_s20 = sshll.u32 %s7884_s19, 4  ;;  %s8054_s20 = int_to_ptr.vmem [resolvable:$true] %s489_s20 }
  0x27   : > { %s9270_s3 = sld [smem:[#allocation38_spill]] }
  0x28   : > { %p8050_p11 = pnand %p7068_p9, %p9221_p1 }
  0x2a   : > { %s9269_s18 = scalar_select %p8050_p11, 1, 0 }
  0x2b   : > { %p8064_p13 = pneg %p8050_p11 }
  0x2d   : > { %s7509_s27 = scalar_lea.hbm %s9270_s3, 15360 }
  0x2e   : > { %p7510_p12 = scmp.ne.s32.totalorder %s9270_s3, %s7509_s27  ;;  %p7516_p5 = scmp.lt.u32.totalorder %s7509_s27, %s9270_s3 }
  0x2f   : > { %s9271_s23 = scalar_select %p8064_p13, 1, 0 }
  0x30   : > { %p7512_p0 = pnand %p8064_p13, %p7510_p12 }
  0x32   : > { %p7513_p3 = pneg %p7512_p0 }
  0x34   : > { %p7518_p7 = pnand %p7516_p5, %p7513_p3 }
  0x36   : > { %7521 = shalt.err (!%p7518_p7)
}
  0x37   : > { %s7522_s29 = scalar_lea.vmem %s8043_s17, 15360  ;;  %p7530_p2 = scmp.lt.s32.totalorder %s8043_s17, %s8043_s17 }
  0x38   : > { %p7523_p9 = scmp.ne.s32.totalorder %s8043_s17, %s7522_s29  ;;  %p7531_p6 = scmp.lt.s32.totalorder %s7522_s29, %s7522_s29 }
  0x3a   : > { %p7525_p10 = pnand %p7523_p9, %p8064_p13  ;;  %p7532_p12 = por %p7531_p6, %p7530_p2 }
  0x3c   : > { %p7526_p1 = pneg %p7525_p10 }
  0x3e   : > { %p7533_p0 = pnand %p7532_p12, %p7526_p1 }
  0x40   : > { %7536 = shalt.err (!%p7533_p0)
}
  0x41   : > { %s9226_s21 = smov 64   ;;  %s9228_s13 = smov 4  }
  0x42   : > { %7071 = dma.hbm_to_vmem [thread:$0]  (!%p8050_p11), %s9270_s3, 15360, %s8043_s17, [#allocation12], %s9226_s21, %s9226_s21, %s9228_s13  }
  0x43   : > { %s9272_s8 = sld [smem:[#allocation40_spill]] }
  0x49   : > { %s7537_s29 = scalar_lea.hbm %s9272_s8, 9216 }
  0x4a   : > { %p7538_p1 = scmp.ne.s32.totalorder %s9272_s8, %s7537_s29  ;;  %p7544_p10 = scmp.lt.u32.totalorder %s7537_s29, %s9272_s8 }
  0x4c   : > { %p7540_p2 = pnand %p7538_p1, %p8064_p13 }
  0x4e   : > { %p7541_p6 = pneg %p7540_p2 }
  0x50   : > { %p7546_p3 = pnand %p7544_p10, %p7541_p6 }
  0x52   : > { %7549 = shalt.err (!%p7546_p3)
}
  0x53   : > { %s7550_s17 = scalar_lea.vmem %s8054_s20, 9216  ;;  %p7558_p12 = scmp.lt.s32.totalorder %s8054_s20, %s8054_s20 }
  0x54   : > { %p7551_p5 = scmp.ne.s32.totalorder %s8054_s20, %s7550_s17  ;;  %p7559_p0 = scmp.lt.s32.totalorder %s7550_s17, %s7550_s17 }
  0x56   : > { %p7553_p7 = pnand %p7551_p5, %p8064_p13  ;;  %p7560_p1 = por %p7559_p0, %p7558_p12 }
  0x58   : > { %p7554_p9 = pneg %p7553_p7 }
  0x5a   : > { %p7561_p2 = pnand %p7560_p1, %p7554_p9 }
  0x5c   : > { %7564 = shalt.err (!%p7561_p2)
}
  0x5d   : > { %s7887_s15 = smov 192   ;;  %s7888_s11 = smov 12  }
  0x5e   : > { %7077 = dma.hbm_to_vmem [thread:$0]  (!%p8050_p11), %s9272_s8, 9216, %s8054_s20, [#allocation15], %s7887_s15, %s7887_s15, %s7888_s11  }
  0x5f   : > { %s8112_s27 = sadd.s32 1, %s7881_s26   ;;  %s52_s0 = sadd.s32 1, %s7877_s25 }
  0x60   : > { %9273 = sst [smem:[#allocation33_spill]] %s8112_s27  ;;  %s49_s22 = ssub.s32 %s7881_s26, %s8112_s27 }
  0x61   : > { %p50_p6 = scmp.eq.s32.totalorder %s49_s22, 0  ;;  %p59_p10 = scmp.ne.s32.totalorder %s7877_s25, %s7873_s24 }
  0x62   : > { %p60_p3 = scmp.eq.s32.totalorder %s7881_s26, 0  ;;  %p9275_p7 = scmp.eq.s32.totalorder %s8018_s12, 1 }
  0x63   : > { %s8121_s19 = scalar_select %p50_p6, %s7877_s25, %s52_s0  }
  0x64   : > { %p61_p5 = por %p60_p3, %p59_p10  ;;  %p8125_p9 = por %p9275_p7, %p59_p10 }
  0x65   : > { %9274 = sst [smem:[#allocation34_spill]] %s8121_s19  ;;  %p7108_p12 = scmp.lt.s32.totalorder %s7881_s26, 2 }
  0x66   : > { %s9276_s29 = scalar_select %p8125_p9, 1, 0 }
  0x67   : > { %s8131_s17 = sand.u32 1, %s7877_s25   ;;  %s9232_s15 = sshll.u32 %s7881_s26, 8 }
  0x68   : > { %9277 = sst [smem:[#allocation35_spill]] %s9276_s29  ;;  %s9231_s20 = sshll.u32 %s8131_s17, 4 }
  0x69   : > { %p8135_p0 = pnand %p7108_p12, %p61_p5  ;;  %s546_s14 = sand.u32 1, %s7881_s26  }
  0x6a   : > { %s9279_s1 = sld [smem:[#allocation37_spill]]  ;;  %s550_s21 = scalar_lea.vmem [#allocation8], %s9231_s20 }
  0x6b   : > { %s9278_s11 = scalar_select %p8135_p0, 1, 0 }
  0x6c   : > { %s557_s13 = sshll.u32 %s550_s21, 4  ;;  %s7889_s3 = smov [#allocation13]   ;;  %s8149_s13 = int_to_ptr.vmem [resolvable:$true] %s557_s13 }
  0x6d   : > { %s8151_s8 = sshll.u32 %s7889_s3, 4  ;;  %s8153_s19 = scalar_lea.sflag [#allocation9], %s546_s14  ;;  %s474_s8 = int_to_ptr.vmem [resolvable:$true] %s8151_s8 }
  0x6e   : > { %p8159_p2 = pneg %p8135_p0 }
  0x70   : > { %s8145_s0 = scalar_lea.hbm %s9279_s1, %s9232_s15  ;;  %s7570_s20 = scalar_lea.hbm %s9279_s1, 512 }
  0x71   : > { %s7565_s25 = scalar_lea.hbm %s8145_s0, 256  ;;  %p7571_p3 = scmp.lt.u32.totalorder %s8145_s0, %s9279_s1 }
  0x72   : > { %p7566_p1 = scmp.ne.s32.totalorder %s8145_s0, %s7565_s25  ;;  %p7572_p5 = scmp.lt.u32.totalorder %s7570_s20, %s7565_s25 }
  0x73   : > { %s9280_s16 = scalar_select %p8159_p2, 1, 0 }
  0x74   : > { %p7568_p6 = pnand %p8159_p2, %p7566_p1  ;;  %p7573_p7 = por %p7572_p5, %p7571_p3 }
  0x75   : > { %p7574_p12 = scmp.lt.u32.totalorder %s7565_s25, %s8145_s0 }
  0x76   : > { %p7569_p10 = pneg %p7568_p6 }
  0x77   : > { %p7575_p9 = por %p7574_p12, %p7573_p7 }
  0x79   : > { %p7576_p4 = pnand %p7575_p9, %p7569_p10 }
  0x7b   : > { %7579 = shalt.err (!%p7576_p4)
}
  0x7c   : > { %s7580_s14 = scalar_lea.vmem %s8149_s13, 256  ;;  %s7890_s22 = smov [#allocation8]  }
  0x7d   : > { %p7581_p1 = scmp.ne.s32.totalorder %s8149_s13, %s7580_s14  ;;  %s7585_s21 = sshll.u32 %s7890_s22, 4  ;;  %s7586_s21 = int_to_ptr.vmem [resolvable:$false] %s7585_s21 }
  0x7e   : > { %s7587_s15 = scalar_lea.vmem %s7586_s21, 512  ;;  %p7588_p11 = scmp.lt.s32.totalorder %s8149_s13, %s7586_s21 }
  0x7f   : > { %p7583_p6 = pnand %p7581_p1, %p8159_p2  ;;  %p7589_p13 = scmp.lt.s32.totalorder %s7587_s15, %s7580_s14 }
  0x81   : > { %p7584_p8 = pneg %p7583_p6  ;;  %p7590_p3 = por %p7589_p13, %p7588_p11 }
  0x83   : > { %p7591_p5 = pnand %p7590_p3, %p7584_p8 }
  0x85   : > { %7594 = shalt.err (!%p7591_p5)
}
  0x86   : > { %s9246_s25 = smov 128   ;;  %s9247_s20 = smov 8  }
  0x87   : > { %7087 = dma.hbm_to_vmem [thread:$0]  (!%p8135_p0), %s8145_s0, 256, %s8149_s13, %s8153_s19, %s9246_s25, %s9246_s25, %s9247_s20  }
  0x88   : > { %s9281_s6 = sld [smem:[#allocation39_spill]]  ;;  %p9282_p8 = scmp.ne.s32.totalorder %s9271_s23, 0 }
  0x8e   : > { %s7595_s14 = scalar_lea.hbm %s9281_s6, 1024 }
  0x8f   : > { %p7596_p4 = scmp.ne.s32.totalorder %s9281_s6, %s7595_s14  ;;  %p7602_p9 = scmp.lt.u32.totalorder %s7595_s14, %s9281_s6 }
  0x91   : > { %p7598_p11 = pnand %p7596_p4, %p9282_p8 }
  0x93   : > { %p7599_p13 = pneg %p7598_p11 }
  0x95   : > { %p7604_p10 = pnand %p7602_p9, %p7599_p13 }
  0x97   : > { %7607 = shalt.err (!%p7604_p10)
}
  0x98   : > { %s7608_s29 = scalar_lea.vmem %s474_s8, 1024  ;;  %p7616_p6 = scmp.lt.s32.totalorder %s474_s8, %s474_s8 }
  0x99   : > { %p7609_p7 = scmp.ne.s32.totalorder %s474_s8, %s7608_s29  ;;  %p7617_p3 = scmp.lt.s32.totalorder %s7608_s29, %s7608_s29 }
  0x9b   : > { %p7611_p12 = pnand %p7609_p7, %p9282_p8  ;;  %p7618_p5 = por %p7617_p3, %p7616_p6 }
  0x9d   : > { %p7612_p1 = pneg %p7611_p12 }
  0x9f   : > { %p7619_p0 = pnand %p7618_p5, %p7612_p1 }
  0xa1   : > { %7622 = shalt.err (!%p7619_p0)
}
  0xa2   : > { %p9283_p4 = scmp.ne.s32.totalorder %s9269_s18, 0  ;;  %s9284_s13 = smov 4  }
  0xa3   : > { %s9285_s0 = smov 64   ;;  %s7893_s3 = smov [#allocation16]  }
  0xa4   : > { %7074 = dma.hbm_to_vmem [thread:$0]  (!%p9283_p4), %s9281_s6, 1024, %s474_s8, [#allocation12], %s9285_s0, %s9285_s0, %s9284_s13  }
  0xa5   : > { %s505_s22 = sshll.u32 %s7893_s3, 4  ;;  %s9286_s10 = sld [smem:[#allocation42_spill]]  ;;  %s506_s22 = int_to_ptr.vmem [resolvable:$true] %s505_s22 }
  0xab   : > { %s7623_s29 = scalar_lea.hbm %s9286_s10, 3072 }
  0xac   : > { %p7624_p0 = scmp.ne.s32.totalorder %s9286_s10, %s7623_s29  ;;  %p7630_p9 = scmp.lt.u32.totalorder %s7623_s29, %s9286_s10 }
  0xae   : > { %p7626_p11 = pnand %p7624_p0, %p9282_p8 }
  0xb0   : > { %p7627_p13 = pneg %p7626_p11 }
  0xb2   : > { %p7632_p10 = pnand %p7630_p9, %p7627_p13 }
  0xb4   : > { %7635 = shalt.err (!%p7632_p10)
}
  0xb5   : > { %s7636_s8 = scalar_lea.vmem %s506_s22, 3072  ;;  %p7644_p6 = scmp.lt.s32.totalorder %s506_s22, %s506_s22 }
  0xb6   : > { %p7637_p7 = scmp.ne.s32.totalorder %s506_s22, %s7636_s8  ;;  %p7645_p3 = scmp.lt.s32.totalorder %s7636_s8, %s7636_s8 }
  0xb8   : > { %p7639_p12 = pnand %p7637_p7, %p9282_p8  ;;  %p7646_p5 = por %p7645_p3, %p7644_p6 }
  0xba   : > { %p7640_p1 = pneg %p7639_p12 }
  0xbc   : > { %p7647_p2 = pnand %p7646_p5, %p7640_p1 }
  0xbe   : > { %7650 = shalt.err (!%p7647_p2)
}
  0xbf   : > { %7080 = dma.hbm_to_vmem [thread:$0]  (!%p9283_p4), %s9286_s10, 3072, %s506_s22, [#allocation15], %s9285_s0, %s9285_s0, %s9284_s13  }
  0xc0   : > { %s9287_s23 = sshll.u32 %s7881_s26, 8  ;;  %s9288_s27 = sld [smem:[#allocation36_spill]] }
  0xc1   : > { %s9289_s14 = sshll.u32 %s8131_s17, 4  ;;  %s526_s29 = scalar_lea.sflag [#allocation6], %s8131_s17 }
  0xc2   : > { %s529_s18 = scalar_lea.vmem [#allocation5], %s9289_s14  ;;  %p9290_p8 = scmp.ne.s32.totalorder %s9280_s16, 0 }
  0xc3   : > { %s536_s21 = sshll.u32 %s529_s18, 4  ;;  %s8238_s21 = int_to_ptr.vmem [resolvable:$true] %s536_s21 }
  0xc6   : > { %s8234_s3 = scalar_lea.hbm %s9288_s27, %s9287_s23  ;;  %s7656_s22 = scalar_lea.hbm %s9288_s27, 512 }
  0xc7   : > { %s7651_s15 = scalar_lea.hbm %s8234_s3, 256  ;;  %p7657_p11 = scmp.lt.u32.totalorder %s8234_s3, %s9288_s27 }
  0xc8   : > { %p7652_p2 = scmp.ne.s32.totalorder %s8234_s3, %s7651_s15  ;;  %p7658_p13 = scmp.lt.u32.totalorder %s7656_s22, %s7651_s15 }
  0xc9   : > { %p7660_p10 = scmp.lt.u32.totalorder %s7651_s15, %s8234_s3 }
  0xca   : > { %p7654_p4 = pnand %p7652_p2, %p9290_p8  ;;  %p7659_p9 = por %p7658_p13, %p7657_p11 }
  0xcc   : > { %p7655_p0 = pneg %p7654_p4  ;;  %p7661_p7 = por %p7660_p10, %p7659_p9 }
  0xce   : > { %p7662_p12 = pnand %p7661_p7, %p7655_p0 }
  0xd0   : > { %7665 = shalt.err (!%p7662_p12)
}
  0xd1   : > { %s7666_s25 = scalar_lea.vmem %s8238_s21, 256  ;;  %s7894_s23 = smov [#allocation5]  }
  0xd2   : > { %p7667_p1 = scmp.ne.s32.totalorder %s8238_s21, %s7666_s25  ;;  %s7671_s20 = sshll.u32 %s7894_s23, 4  ;;  %s7672_s20 = int_to_ptr.vmem [resolvable:$false] %s7671_s20 }
  0xd3   : > { %s7673_s1 = scalar_lea.vmem %s7672_s20, 512  ;;  %p7674_p5 = scmp.lt.s32.totalorder %s8238_s21, %s7672_s20 }
  0xd4   : > { %p7669_p6 = pnand %p7667_p1, %p9290_p8  ;;  %p7675_p2 = scmp.lt.s32.totalorder %s7673_s1, %s7666_s25 }
  0xd6   : > { %p7670_p3 = pneg %p7669_p6  ;;  %p7676_p4 = por %p7675_p2, %p7674_p5 }
  0xd8   : > { %p7677_p11 = pnand %p7676_p4, %p7670_p3 }
  0xda   : > { %7680 = shalt.err (!%p7677_p11)
}
  0xdb   : > { %p9291_p0 = scmp.ne.s32.totalorder %s9278_s11, 0  ;;  %s9292_s14 = smov 8  }
  0xdc   : > { %s9293_s18 = smov 128   ;;  %s5796_s15 = sshll.u32 %s7881_s26, 4 }
  0xdd   : > { %7084 = dma.hbm_to_vmem [thread:$0]  (!%p9291_p0), %s8234_s3, 256, %s8238_s21, %s526_s29, %s9293_s18, %s9293_s18, %s9292_s14  }
  0xde   : > { %s570_s13 = scalar_lea.vmem [#allocation10], %s8131_s17  ;;  %s575_s9 = scalar_lea.hbm %s9201_s2, %s5796_s15 }
  0xdf   : > { %s577_s0 = sshll.u32 %s570_s13, 4  ;;  %s7681_s25 = scalar_lea.hbm %s575_s9, 16  ;;  %s578_s0 = int_to_ptr.vmem [resolvable:$true] %s577_s0 }
  0xe0   : > { %p7682_p13 = scmp.ne.s32.totalorder %s575_s9, %s7681_s25  ;;  %s7686_s1 = scalar_lea.hbm %s9201_s2, 32 }
  0xe1   : > { %p7687_p7 = scmp.lt.u32.totalorder %s575_s9, %s9201_s2  ;;  %p7688_p12 = scmp.lt.u32.totalorder %s7686_s1, %s7681_s25 }
  0xe2   : > { %p7684_p9 = pnand %p7682_p13, %p9290_p8  ;;  %p7690_p6 = scmp.lt.u32.totalorder %s7681_s25, %s575_s9 }
  0xe3   : > { %p7689_p1 = por %p7688_p12, %p7687_p7 }
  0xe4   : > { %p7685_p10 = pneg %p7684_p9 }
  0xe5   : > { %p7691_p3 = por %p7690_p6, %p7689_p1 }
  0xe7   : > { %p7692_p5 = pnand %p7691_p3, %p7685_p10 }
  0xe9   : > { %7695 = shalt.err (!%p7692_p5)
}
  0xea   : > { %s7696_s17 = scalar_lea.vmem %s578_s0, 16  ;;  %s7895_s3 = smov [#allocation10]  }
  0xeb   : > { %p7697_p2 = scmp.ne.s32.totalorder %s578_s0, %s7696_s17  ;;  %s7701_s21 = sshll.u32 %s7895_s3, 4  ;;  %s7702_s21 = int_to_ptr.vmem [resolvable:$false] %s7701_s21 }
  0xec   : > { %s7703_s29 = scalar_lea.vmem %s7702_s21, 32  ;;  %p7704_p13 = scmp.lt.s32.totalorder %s578_s0, %s7702_s21 }
  0xed   : > { %p7699_p4 = pnand %p7697_p2, %p9290_p8  ;;  %p7705_p9 = scmp.lt.s32.totalorder %s7703_s29, %s7696_s17 }
  0xef   : > { %p7700_p11 = pneg %p7699_p4  ;;  %p7706_p0 = por %p7705_p9, %p7704_p13 }
  0xf1   : > { %p7707_p7 = pnand %p7706_p0, %p7700_p11 }
  0xf3   : > { %7710 = shalt.err (!%p7707_p7)
}
  0xf4   : > { %p9294_p12 = scmp.ne.s32.totalorder %s9278_s11, 0  ;;  %p9295_p10 = scmp.ne.s32.totalorder %s9268_s30, 0 }
  0xf5   : > { %s8288_s6 = sand.u32 (!%p9295_p10), 1, %s7873_s24   ;;  %p9296_p8 = scmp.ne.s32.totalorder (!%p9295_p10), %s9265_s28, 0 }
  0xf6   : > { %7090 = dma.hbm_to_vmem [thread:$0]  (!%p9294_p12), %s575_s9, 16, %s578_s0, %s8153_s19  }
  0xf7   : > { %586 = sbr.rel (%p9295_p10) target bundleno = 9394 (0x24b2), region = 72  ;;  %s8291_s10 = sshll.u32 (!%p9295_p10), %s8288_s6, 4 }
  0xf8   : > { %s589_s16 = scalar_lea.sflag (!%p9295_p10), [#allocation6], %s8288_s6  ;;  %s592_s14 = scalar_lea.vmem (!%p9295_p10), [#allocation5], %s8291_s10 }
  0xfe   : > { %7840 = dma.done.wait (%p9296_p8), %s589_s16, 256  }
  0xff   : > { %7842 = vsyncadd (%p9296_p8), %s589_s16, 4294967040  ;;  %s597_s30 = sand.u32 1, %s8018_s12   ;;  %s601_s11 = scalar_lea.vmem [#allocation8], %s8291_s10 }
 0x100   : > { %s598_s19 = scalar_lea.sflag [#allocation9], %s597_s30 }
 0x101   : > { %7844 = dma.done.wait (%p9296_p8), %s598_s19, 272  }
 0x102   : > { %7846 = vsyncadd (%p9296_p8), %s598_s19, 4294967024  ;;  %s609_s18 = scalar_lea.vmem [#allocation10], %s8288_s6  ;;  %p9297_p0 = scmp.eq.s32.totalorder %s8018_s12, 0 }
 0x104   : > { %7848 = dma.done.wait (%p9297_p0), [#allocation12], 16384   ;;  %p9298_p1 = pmov %p9297_p0 }
 0x105   : > { %p9299_p6 = pmov %p9297_p0 }
 0x106   : > { %7850 = vsyncadd (%p9298_p1), [#allocation12], 4294950912 }
 0x107   : > { %7852 = dma.done.wait (%p9299_p6), [#allocation15], 12288   ;;  %p9300_p3 = pmov %p9297_p0 }
 0x108   : > { %v7896_v0 = vmov 0.0   ;;  %vm7897_vm0 = vmmov 0   ;;  %v7165_v1 = vld [vmem:[#allocation11 + $0x40] sm:$0xff]   ;;  %v7166_v2 = vld [vmem:[#allocation11 + $0x48] sm:$0xff]   ;;  %v7167_v3 = vld [vmem:[#allocation11 + $0x50] sm:$0xff]   ;;  %s2540_s3 = sld [smem:[#allocation4]] }
 0x109   : > { %7854 = vsyncadd (%p9300_p3), [#allocation15], 4294955008  ;;  %6406 = vmatprep.subr.bf16.mxu0 %v7896_v0  ;;  %701 = vst [vmem:[#allocation2] sm:$0x3] %v7896_v0  ;;  %6422 = vmatprep.mubr.msk.bf16.mxu0 %vm7897_vm0, %v7896_v0  ;;  %v8326_v4 = vld [vmem:[%s592_s14] sm:$0xff]  ;;  %v8328_v5 = vld [vmem:[%s592_s14 + $0x8] sm:$0xff] }
 0x10a   : > { %702 = vst [vmem:[#allocation2 + $0x12] sm:$0x3] %v7896_v0  ;;  %6506 = vmatprep.subr.bf16.mxu1 %v7896_v0  ;;  %6522 = vmatprep.mubr.msk.bf16.mxu1 %vm7897_vm0, %v7896_v0  ;;  %703 = vst [vmem:[#allocation2 + $0x2] sm:$0xff] %v8326_v4  ;;  %v924_v6 = vpack.c.bf16 %v8328_v5, %v8326_v4  ;;  %v7168_v7 = vld [vmem:[#allocation11 + $0x58] sm:$0xff]   ;;  %v7169_v8 = vld [vmem:[#allocation11 + $0x60] sm:$0xff]   ;;  %s9301_s19 = sld [smem:[#allocation41_spill]] }
 0x10b   : > { %6407 = vmatpush3.bf16.msra.mxu0 %v7165_v1  ;;  %704 = vst [vmem:[#allocation2 + $0xa] sm:$0xff] %v8328_v5  ;;  %v7170_v9 = vld [vmem:[#allocation11 + $0x68] sm:$0xff]   ;;  %v7171_v10 = vld [vmem:[#allocation11 + $0x70] sm:$0xff]   ;;  %v7172_v11 = vld [vmem:[#allocation11 + $0x78] sm:$0xff]   ;;  %vm2828_vm1 = vcmask 261120   ;;  %vm2880_vm2 = vcmask 130048  }
 0x10c   : > { %6408 = vmatprep.subr.bf16.mxu0 %v7896_v0  ;;  %v7173_v15 = vld [vmem:[#allocation11] sm:$0xff]   ;;  %v7174_v16 = vld [vmem:[#allocation11 + $0x8] sm:$0xff]   ;;  %v7175_v17 = vld [vmem:[#allocation11 + $0x10] sm:$0xff]   ;;  %vm2913_vm3 = vcmask 125952   ;;  %s7900_s15 = smov 64   ;;  %s7901_s13 = smov 32  }
 0x10d   : > { %v7176_v18 = vld [vmem:[#allocation11 + $0x18] sm:$0xff]   ;;  %v7205_v19 = vld [vmem:[#allocation11 + $0x180] sm:$0xff]   ;;  %v7206_v21 = vld [vmem:[#allocation11 + $0x188] sm:$0xff]   ;;  %vm3112_vm4 = vcmask 523520   ;;  %vm3261_vm5 = vcmask 785920   ;;  %vm3410_vm6 = vcmask 1048320  }
 0x10e   : > { %v7177_v20 = vld [vmem:[#allocation11 + $0x20] sm:$0xff]   ;;  %6507 = vmatpush3.bf16.msra.mxu1 %v7205_v19  ;;  %v7178_v22 = vld [vmem:[#allocation11 + $0x28] sm:$0xff]   ;;  %v7207_v23 = vld [vmem:[#allocation11 + $0x190] sm:$0xff]   ;;  %s9302_s8 = sld [smem:[#allocation43_spill]]  ;;  %s9303_s29 = sld [smem:[#allocation35_spill]] }
 0x10f   : > { %6409 = vmatpush3.bf16.msra.mxu0 %v7166_v2  ;;  %6508 = vmatprep.subr.bf16.mxu1 %v7896_v0  ;;  %v7179_v24 = vld [vmem:[#allocation11 + $0x30] sm:$0xff]   ;;  %v7208_v25 = vld [vmem:[#allocation11 + $0x198] sm:$0xff]   ;;  %v7181_v29 = vld [vmem:[#allocation11 + $0x80] sm:$0xff]   ;;  %s9031_s16 = sshll.u32 %s8018_s12, 9  ;;  %s9044_s22 = scalar_lea.sflag [#allocation19], %s597_s30 }
 0x110   : > { %6410 = vmatprep.subr.bf16.mxu0 %v7896_v0  ;;  %v7180_v26 = vld [vmem:[#allocation11 + $0x38] sm:$0xff]   ;;  %v7182_v31 = vld [vmem:[#allocation11 + $0x88] sm:$0xff]   ;;  %v7183_v32 = vld [vmem:[#allocation11 + $0x90] sm:$0xff]   ;;  %s7902_s25 = smov [#allocation18]  }
 0x111   : > { %v724_v12 = vld [vmem:[#allocation2 + $0x1] sm:$0xff]  ;;  %v7185_v34 = vld [vmem:[#allocation11 + $0xa0] sm:$0xff]   ;;  %v7186_v35 = vld [vmem:[#allocation11 + $0xa8] sm:$0xff]   ;;  %s7715_s20 = sshll.u32 %s7902_s25, 4  ;;  %s7716_s20 = int_to_ptr.vmem [resolvable:$false] %s7715_s20 }
 0x112   : > { %v725_v13 = vld [vmem:[#allocation2 + $0x9] sm:$0xff]  ;;  %6509 = vmatpush3.bf16.msra.mxu1 %v7206_v21  ;;  %v705_v27 = vld [vmem:[#allocation2] sm:$0xff]  ;;  %v7190_v39 = vld [vmem:[#allocation11 + $0xc8] sm:$0xff]   ;;  %s7717_s1 = scalar_lea.vmem %s7716_s20, 1024 }
 0x113   : > { %6411 = vmatpush3.bf16.msra.mxu0 %v7167_v3  ;;  %v726_v14 = vpack.c.bf16 %v725_v13, %v724_v12  ;;  %6510 = vmatprep.subr.bf16.mxu1 %v7896_v0  ;;  %v706_v28 = vld [vmem:[#allocation2 + $0x8] sm:$0xff]  ;;  %v7187_v36 = vld [vmem:[#allocation11 + $0xb0] sm:$0xff]   ;;  %v7194_v43 = vld [vmem:[#allocation11 + $0xe8] sm:$0xff]  }
 0x114   : > { %6412 = vmatprep.subr.bf16.mxu0 %v7896_v0  ;;  %v707_v30 = vpack.c.bf16 %v706_v28, %v705_v27  ;;  %v7184_v33 = vld [vmem:[#allocation11 + $0x98] sm:$0xff]   ;;  %v7189_v38 = vld [vmem:[#allocation11 + $0xc0] sm:$0xff]   ;;  %v7191_v40 = vld [vmem:[#allocation11 + $0xd0] sm:$0xff]   ;;  %p9305_p2 = scmp.ne.s32.totalorder %s9303_s29, 0 }
 0x115   : > { %v7188_v37 = vld [vmem:[#allocation11 + $0xb8] sm:$0xff]   ;;  %v7193_v42 = vld [vmem:[#allocation11 + $0xe0] sm:$0xff]   ;;  %v7195_v44 = vld [vmem:[#allocation11 + $0xf0] sm:$0xff]  }
 0x116   : > { %6511 = vmatpush3.bf16.msra.mxu1 %v7207_v23  ;;  %v7192_v41 = vld [vmem:[#allocation11 + $0xd8] sm:$0xff]   ;;  %v1034_v47 = vld [vmem:[#allocation2 + $0xb] sm:$0xff]  ;;  %v7199_v51 = vld [vmem:[#allocation11 + $0x110] sm:$0xff]  }
 0x117   : > { %6413 = vmatpush3.bf16.msra.mxu0 %v7168_v7  ;;  %6512 = vmatprep.subr.bf16.mxu1 %v7896_v0  ;;  %v7196_v45 = vld [vmem:[#allocation11 + $0xf8] sm:$0xff]   ;;  %v7197_v48 = vld [vmem:[#allocation11 + $0x100] sm:$0xff]   ;;  %v7198_v50 = vld [vmem:[#allocation11 + $0x108] sm:$0xff]  }
 0x118   : > { %6414 = vmatprep.subr.bf16.mxu0 %v7896_v0  ;;  %v1033_v46 = vld [vmem:[#allocation2 + $0x3] sm:$0xff]  ;;  %v7202_v54 = vld [vmem:[#allocation11 + $0x128] sm:$0xff]   ;;  %v7203_v55 = vld [vmem:[#allocation11 + $0x130] sm:$0xff]  }
 0x119   : > { %v1035_v49 = vpack.c.bf16 %v1034_v47, %v1033_v46  ;;  %v7200_v52 = vld [vmem:[#allocation11 + $0x118] sm:$0xff]   ;;  %v7201_v53 = vld [vmem:[#allocation11 + $0x120] sm:$0xff]   ;;  %v7210_v61 = vld [vmem:[#allocation11 + $0x1a8] sm:$0xff]  }
 0x11a   : > { %6513 = vmatpush3.bf16.msra.mxu1 %v7208_v25  ;;  %v7204_v56 = vld [vmem:[#allocation11 + $0x138] sm:$0xff]   ;;  %v1145_v58 = vld [vmem:[#allocation2 + $0xc] sm:$0xff]  ;;  %v7211_v62 = vld [vmem:[#allocation11 + $0x1b0] sm:$0xff]  }
 0x11b   : > { %6415 = vmatpush3.bf16.msra.mxu0 %v7169_v8  ;;  %6514 = vmatprep.subr.bf16.mxu1 %v7896_v0  ;;  %v1144_v57 = vld [vmem:[#allocation2 + $0x4] sm:$0xff]  ;;  %v5848_v1 = vld [vmem:[%s9203_s4] ss:$0 sm:$0xff]  ;;  %v7214_v19 = vld [vmem:[#allocation11 + $0x148] sm:$0xff]  }
 0x11c   : > { %6416 = vmatprep.subr.bf16.mxu0 %v7896_v0  ;;  %v1146_v59 = vpack.c.bf16 %v1145_v58, %v1144_v57  ;;  %v7209_v60 = vld [vmem:[#allocation11 + $0x1a0] sm:$0xff]   ;;  %v7212_v63 = vld [vmem:[#allocation11 + $0x1b8] sm:$0xff]   ;;  %v5849_v3 = vld [vmem:[%s9204_s5] ss:$0 sm:$0xff] }
 0x11d   : > { %v7215_v21 = vld [vmem:[#allocation11 + $0x150] sm:$0xff]   ;;  %v7216_v23 = vld [vmem:[#allocation11 + $0x158] sm:$0xff]   ;;  %v7217_v25 = vld [vmem:[#allocation11 + $0x160] sm:$0xff]  }
 0x11e   : > { %6515 = vmatpush3.bf16.msra.mxu1 %v7209_v60  ;;  %v7219_v27 = vld [vmem:[#allocation11 + $0x170] sm:$0xff]   ;;  %v7220_v28 = vld [vmem:[#allocation11 + $0x178] sm:$0xff]  }
 0x11f   : > { %6417 = vmatpush3.bf16.msra.mxu0 %v7170_v9  ;;  %6516 = vmatprep.subr.bf16.mxu1 %v7896_v0  ;;  %v7235_v46 = vld [vmem:[#allocation11 + $0x230] sm:$0xff]   ;;  %v7236_v47 = vld [vmem:[#allocation11 + $0x238] sm:$0xff]  }
 0x120   : > { %6418 = vmatprep.subr.bf16.mxu0 %v7896_v0  ;;  %v7243_v57 = vld [vmem:[#allocation11 + $0x270] sm:$0xff]   ;;  %v7244_v58 = vld [vmem:[#allocation11 + $0x278] sm:$0xff]  }
 0x122   : > { %6517 = vmatpush3.bf16.msra.mxu1 %v7210_v61 }
 0x123   : > { %6419 = vmatpush3.bf16.msra.mxu0 %v7171_v10  ;;  %6518 = vmatprep.subr.bf16.mxu1 %v7896_v0 }
 0x124   : > { %6420 = vmatprep.subr.bf16.mxu0 %v7896_v0 }
 0x126   : > { %6519 = vmatpush3.bf16.msra.mxu1 %v7211_v62  ;;  %v7249_v62 = vld [vmem:[#allocation11 + $0x2e0] sm:$0xff]  }
 0x127   : > { %6421 = vmatpush3.bf16.msra.mxu0 %v7172_v11  ;;  %6520 = vmatprep.subr.bf16.mxu1 %v7896_v0 }
 0x128   : > { %6426 = vmatprep.subr.bf16.mxu0 %v7896_v0 }
 0x12a   : > { %6423 = vmatmul.mubr.bf16.vlgmr.msra.gmra.mrb[0].mxu0 %v726_v14  ;;  %6521 = vmatpush3.bf16.msra.mxu1 %v7212_v63  ;;  %v7250_v63 = vld [vmem:[#allocation11 + $0x2e8] sm:$0xff]  }
 0x12b   : > { %6427 = vmatpush3.bf16.msra.mxu0 %v7173_v15  ;;  %6442 = vmatprep.mubr.msk.bf16.mxu0 %vm7897_vm0, %v7896_v0 }
 0x12c   : > { %6428 = vmatprep.subr.bf16.mxu0 %v7896_v0  ;;  %6526 = vmatprep.subr.bf16.mxu1 %v7896_v0 }
 0x12f   : > { %6429 = vmatpush3.bf16.msra.mxu0 %v7174_v16  ;;  %v7213_v16 = vld [vmem:[#allocation11 + $0x140] sm:$0xff]  }
 0x130   : > { %6430 = vmatprep.subr.bf16.mxu0 %v7896_v0 }
 0x133   : > { %6431 = vmatpush3.bf16.msra.mxu0 %v7175_v17 }
 0x134   : > { %6432 = vmatprep.subr.bf16.mxu0 %v7896_v0 }
 0x137   : > { %6433 = vmatpush3.bf16.msra.mxu0 %v7176_v18  ;;  %v7245_v18 = vld [vmem:[#allocation11 + $0x2c0] sm:$0xff]  }
 0x138   : > { %6434 = vmatprep.subr.bf16.mxu0 %v7896_v0 }
 0x13b   : > { %6435 = vmatpush3.bf16.msra.mxu0 %v7177_v20  ;;  %v7246_v20 = vld [vmem:[#allocation11 + $0x2c8] sm:$0xff]  }
 0x13c   : > { %6436 = vmatprep.subr.bf16.mxu0 %v7896_v0 }
 0x13f   : > { %6437 = vmatpush3.bf16.msra.mxu0 %v7178_v22  ;;  %v7247_v22 = vld [vmem:[#allocation11 + $0x2d0] sm:$0xff]  }
 0x140   : > { %6438 = vmatprep.subr.bf16.mxu0 %v7896_v0 }
 0x143   : > { %6439 = vmatpush3.bf16.msra.mxu0 %v7179_v24  ;;  %v7248_v24 = vld [vmem:[#allocation11 + $0x2d8] sm:$0xff]  }
 0x144   : > { %6440 = vmatprep.subr.bf16.mxu0 %v7896_v0 }
 0x147   : > { %6441 = vmatpush3.bf16.msra.mxu0 %v7180_v26  ;;  %v7218_v26 = vld [vmem:[#allocation11 + $0x168] sm:$0xff]  }
 0x148   : > { %6446 = vmatprep.subr.bf16.mxu0 %v7896_v0 }
 0x14a   : > { %6443 = vmatmul.mubr.bf16.vlgmr.msra.gmra.mrb[0].mxu0 %v707_v30 }
 0x14b   : > { %6447 = vmatpush3.bf16.msra.mxu0 %v7181_v29  ;;  %6462 = vmatprep.mubr.msk.bf16.mxu0 %vm7897_vm0, %v7896_v0 }
 0x14c   : > { %6448 = vmatprep.subr.bf16.mxu0 %v7896_v0 }
 0x14f   : > { %6449 = vmatpush3.bf16.msra.mxu0 %v7182_v31  ;;  %v7221_v31 = vld [vmem:[#allocation11 + $0x1c0] sm:$0xff]  }
 0x150   : > { %6450 = vmatprep.subr.bf16.mxu0 %v7896_v0 }
 0x153   : > { %6451 = vmatpush3.bf16.msra.mxu0 %v7183_v32 }
 0x154   : > { %6452 = vmatprep.subr.bf16.mxu0 %v7896_v0 }
 0x157   : > { %6453 = vmatpush3.bf16.msra.mxu0 %v7184_v33  ;;  %v7222_v33 = vld [vmem:[#allocation11 + $0x1c8] sm:$0xff]  }
 0x158   : > { %6454 = vmatprep.subr.bf16.mxu0 %v7896_v0 }
 0x15b   : > { %6455 = vmatpush3.bf16.msra.mxu0 %v7185_v34  ;;  %v7223_v34 = vld [vmem:[#allocation11 + $0x1d0] sm:$0xff]  }
 0x15c   : > { %6456 = vmatprep.subr.bf16.mxu0 %v7896_v0 }
 0x15f   : > { %6457 = vmatpush3.bf16.msra.mxu0 %v7186_v35  ;;  %v7224_v35 = vld [vmem:[#allocation11 + $0x1d8] sm:$0xff]  }
 0x160   : > { %6458 = vmatprep.subr.bf16.mxu0 %v7896_v0 }
 0x163   : > { %6459 = vmatpush3.bf16.msra.mxu0 %v7187_v36  ;;  %v7225_v36 = vld [vmem:[#allocation11 + $0x1e0] sm:$0xff]  }
 0x164   : > { %6460 = vmatprep.subr.bf16.mxu0 %v7896_v0 }
 0x167   : > { %6461 = vmatpush3.bf16.msra.mxu0 %v7188_v37  ;;  %v7226_v37 = vld [vmem:[#allocation11 + $0x1e8] sm:$0xff]  }
 0x168   : > { %6466 = vmatprep.subr.bf16.mxu0 %v7896_v0 }
 0x16a   : > { %6463 = vmatmul.mubr.bf16.vlgmr.msra.gmra.mrb[0].mxu0 %v924_v6 }
 0x16b   : > { %6467 = vmatpush3.bf16.msra.mxu0 %v7189_v38  ;;  %6482 = vmatprep.mubr.msk.bf16.mxu0 %vm7897_vm0, %v7896_v0  ;;  %v7227_v38 = vld [vmem:[#allocation11 + $0x1f0] sm:$0xff]  }
 0x16c   : > { %6468 = vmatprep.subr.bf16.mxu0 %v7896_v0 }
 0x16f   : > { %6469 = vmatpush3.bf16.msra.mxu0 %v7190_v39  ;;  %v7228_v39 = vld [vmem:[#allocation11 + $0x1f8] sm:$0xff]  }
 0x170   : > { %6470 = vmatprep.subr.bf16.mxu0 %v7896_v0 }
 0x173   : > { %6471 = vmatpush3.bf16.msra.mxu0 %v7191_v40  ;;  %v7229_v40 = vld [vmem:[#allocation11 + $0x200] sm:$0xff]  }
 0x174   : > { %6472 = vmatprep.subr.bf16.mxu0 %v7896_v0 }
 0x177   : > { %6473 = vmatpush3.bf16.msra.mxu0 %v7192_v41  ;;  %v7230_v41 = vld [vmem:[#allocation11 + $0x208] sm:$0xff]  }
 0x178   : > { %6474 = vmatprep.subr.bf16.mxu0 %v7896_v0 }
 0x17b   : > { %6475 = vmatpush3.bf16.msra.mxu0 %v7193_v42  ;;  %v7231_v42 = vld [vmem:[#allocation11 + $0x210] sm:$0xff]  }
 0x17c   : > { %6476 = vmatprep.subr.bf16.mxu0 %v7896_v0 }
 0x17f   : > { %6477 = vmatpush3.bf16.msra.mxu0 %v7194_v43  ;;  %v7232_v43 = vld [vmem:[#allocation11 + $0x218] sm:$0xff]  }
 0x180   : > { %6478 = vmatprep.subr.bf16.mxu0 %v7896_v0 }
 0x183   : > { %6479 = vmatpush3.bf16.msra.mxu0 %v7195_v44  ;;  %v7233_v44 = vld [vmem:[#allocation11 + $0x220] sm:$0xff]  }
 0x184   : > { %6480 = vmatprep.subr.bf16.mxu0 %v7896_v0 }
 0x187   : > { %6481 = vmatpush3.bf16.msra.mxu0 %v7196_v45  ;;  %v7234_v45 = vld [vmem:[#allocation11 + $0x228] sm:$0xff]  }
 0x188   : > { %6486 = vmatprep.subr.bf16.mxu0 %v7896_v0 }
 0x18a   : > { %6483 = vmatmul.mubr.bf16.vlgmr.msra.gmra.mrb[0].mxu0 %v1035_v49 }
 0x18b   : > { %6487 = vmatpush3.bf16.msra.mxu0 %v7197_v48  ;;  %6502 = vmatprep.mubr.msk.bf16.mxu0 %vm7897_vm0, %v7896_v0 }
 0x18c   : > { %6488 = vmatprep.subr.bf16.mxu0 %v7896_v0 }
 0x18f   : > { %6489 = vmatpush3.bf16.msra.mxu0 %v7198_v50  ;;  %v7237_v50 = vld [vmem:[#allocation11 + $0x240] sm:$0xff]  }
 0x190   : > { %6490 = vmatprep.subr.bf16.mxu0 %v7896_v0 }
 0x193   : > { %6491 = vmatpush3.bf16.msra.mxu0 %v7199_v51 }
 0x194   : > { %6492 = vmatprep.subr.bf16.mxu0 %v7896_v0 }
 0x197   : > { %6493 = vmatpush3.bf16.msra.mxu0 %v7200_v52  ;;  %v7238_v52 = vld [vmem:[#allocation11 + $0x248] sm:$0xff]  }
 0x198   : > { %6494 = vmatprep.subr.bf16.mxu0 %v7896_v0 }
 0x19b   : > { %6495 = vmatpush3.bf16.msra.mxu0 %v7201_v53  ;;  %v7239_v53 = vld [vmem:[#allocation11 + $0x250] sm:$0xff]  }
 0x19c   : > { %6496 = vmatprep.subr.bf16.mxu0 %v7896_v0 }
 0x19f   : > { %6497 = vmatpush3.bf16.msra.mxu0 %v7202_v54  ;;  %v7240_v54 = vld [vmem:[#allocation11 + $0x258] sm:$0xff]  }
 0x1a0   : > { %6498 = vmatprep.subr.bf16.mxu0 %v7896_v0 }
 0x1a3   : > { %6499 = vmatpush3.bf16.msra.mxu0 %v7203_v55  ;;  %v7241_v55 = vld [vmem:[#allocation11 + $0x260] sm:$0xff]  }
 0x1a4   : > { %6500 = vmatprep.subr.bf16.mxu0 %v7896_v0 }
 0x1a7   : > { %6501 = vmatpush3.bf16.msra.mxu0 %v7204_v56  ;;  %v7242_v56 = vld [vmem:[#allocation11 + $0x268] sm:$0xff]  }
 0x1a8   : > { %6606 = vmatprep.subr.bf16.mxu0 %v7896_v0 }
 0x1aa   : > { %6503 = vmatmul.mubr.bf16.vlgmr.msra.gmra.mrb[0].mxu0 %v1146_v59 }
 0x1ab   : > { %6622 = vmatprep.mubr.msk.bf16.mxu0 %vm7897_vm0, %v7896_v0  ;;  %6607 = vmatpush3.bf16.msra.mxu0 %v7245_v18  ;;  %v7253_v18 = vld [vmem:[#allocation11 + $0x280] sm:$0xff]  }
 0x1ac   : > { %6608 = vmatprep.subr.bf16.mxu0 %v7896_v0 }
 0x1af   : > { %6609 = vmatpush3.bf16.msra.mxu0 %v7246_v20  ;;  %v7285_v20 = vld [vmem:[#allocation13] sm:$0xff]  }
 0x1b0   : > { %6610 = vmatprep.subr.bf16.mxu0 %v7896_v0 }
 0x1b3   : > { %6611 = vmatpush3.bf16.msra.mxu0 %v7247_v22  ;;  %v7286_v22 = vld [vmem:[#allocation13 + $0x8] sm:$0xff]  }
 0x1b4   : > { %6612 = vmatprep.subr.bf16.mxu0 %v7896_v0 }
 0x1b7   : > { %6613 = vmatpush3.bf16.msra.mxu0 %v7248_v24  ;;  %v7287_v24 = vld [vmem:[#allocation13 + $0x10] sm:$0xff]  }
 0x1b8   : > { %6614 = vmatprep.subr.bf16.mxu0 %v7896_v0 }
 0x1bb   : > { %6615 = vmatpush3.bf16.msra.mxu0 %v7249_v62 }
 0x1bc   : > { %6616 = vmatprep.subr.bf16.mxu0 %v7896_v0 }
 0x1bf   : > { %6617 = vmatpush3.bf16.msra.mxu0 %v7250_v63 }
 0x1c0   : > { %6618 = vmatprep.subr.bf16.mxu0 %v7896_v0 }
 0x27d   : > { %v1246_v2 = vpop.f32.mrb[0].mxu0 }
 0x27e   : > { %v1262_v4 = vmul.f32 %v5848_v1, %v1246_v2  ;;  %v6504_v5 = vpop.f32.mrb[1].mxu0  ;;  %v7252_v2 = vld [vmem:[#allocation11 + $0x2f8] sm:$0xff]  }
 0x27f   : > { %v1249_v6 = vpop.f32.mrb[2].mxu0  ;;  %v5893_v5 = vld [vmem:[%s9204_s5 + $0x1] ss:$0 sm:$0xff] }
 0x280   : > { %v1271_v7 = vadd.f32 %v5849_v3, %v1262_v4  ;;  %v1263_v8 = vmul.f32 %v5848_v1, %v1249_v6  ;;  %v6505_v9 = vpop.f32.mrb[3].mxu0  ;;  %v7251_v1 = vld [vmem:[#allocation11 + $0x2f0] sm:$0xff]  }
 0x281   : > { %6619 = vmatpush3.bf16.msra.mxu0 %v7251_v1 }
 0x282   : > { %v1273_v10 = vmax.f32 %v1271_v7, 0.0  ;;  %v1272_v11 = vadd.f32 %v5849_v3, %v1263_v8  ;;  %6620 = vmatprep.subr.bf16.mxu0 %v7896_v0  ;;  %v5891_v3 = vld [vmem:[%s9203_s4 + $0x1] ss:$0 sm:$0xff] }
 0x284   : > { %1275 = vst [vmem:[#allocation2 + $0x2] sm:$0xff] %v1273_v10  ;;  %v1274_v12 = vmax.f32 %v1272_v11, 0.0 }
 0x285   : > { %6621 = vmatpush3.bf16.msra.mxu0 %v7252_v2  ;;  %v7290_v2 = vld [vmem:[#allocation13 + $0x28] sm:$0xff]  }
 0x286   : > { %1276 = vst [vmem:[#allocation2 + $0xa] sm:$0xff] %v1274_v12  ;;  %v8399_v13 = vpack.c.bf16 %v1274_v12, %v1273_v10  ;;  %6626 = vmatprep.subr.bf16.mxu0 %v7896_v0 }
 0x28b   : > { %v1297_v14 = vld [vmem:[#allocation2 + $0x1] sm:$0xff] }
 0x28c   : > { %v1277_v30 = vld [vmem:[#allocation2] sm:$0xff] }
 0x28d   : > { %v1298_v15 = vld [vmem:[#allocation2 + $0x9] sm:$0xff] }
 0x28e   : > { %v1299_v17 = vpack.c.bf16 %v1298_v15, %v1297_v14  ;;  %v1278_v29 = vld [vmem:[#allocation2 + $0x8] sm:$0xff] }
 0x28f   : > { %v1279_v32 = vpack.c.bf16 %v1278_v29, %v1277_v30  ;;  %v1606_v48 = vld [vmem:[#allocation2 + $0x3] sm:$0xff]  ;;  %v1607_v49 = vld [vmem:[#allocation2 + $0xb] sm:$0xff]  ;;  %v7259_v30 = vld [vmem:[#allocation11 + $0x2b0] sm:$0xff]  }
 0x290   : > { %6523 = vmatmul.mubr.bf16.vlgmr.msra.gmra.mrb[0].mxu1 %v1299_v17  ;;  %v1608_v51 = vpack.c.bf16 %v1607_v49, %v1606_v48  ;;  %v1717_v59 = vld [vmem:[#allocation2 + $0x4] sm:$0xff]  ;;  %v1718_v60 = vld [vmem:[#allocation2 + $0xc] sm:$0xff]  ;;  %v7275_v49 = vld [vmem:[#allocation11 + $0x370] sm:$0xff]  }
 0x291   : > { %6527 = vmatpush3.bf16.msra.mxu1 %v7213_v16  ;;  %6542 = vmatprep.mubr.msk.bf16.mxu1 %vm7897_vm0, %v7896_v0  ;;  %v1719_v61 = vpack.c.bf16 %v1718_v60, %v1717_v59  ;;  %v7258_v29 = vld [vmem:[#allocation11 + $0x2a8] sm:$0xff]   ;;  %v7283_v60 = vld [vmem:[#allocation11 + $0x3b0] sm:$0xff]  }
 0x292   : > { %6528 = vmatprep.subr.bf16.mxu1 %v7896_v0  ;;  %v7274_v48 = vld [vmem:[#allocation11 + $0x368] sm:$0xff]  }
 0x293   : > { %v7282_v59 = vld [vmem:[#allocation11 + $0x3a8] sm:$0xff]  }
 0x295   : > { %6529 = vmatpush3.bf16.msra.mxu1 %v7214_v19 }
 0x296   : > { %6530 = vmatprep.subr.bf16.mxu1 %v7896_v0 }
 0x299   : > { %6531 = vmatpush3.bf16.msra.mxu1 %v7215_v21  ;;  %v7254_v21 = vld [vmem:[#allocation11 + $0x288] sm:$0xff]  }
 0x29a   : > { %6532 = vmatprep.subr.bf16.mxu1 %v7896_v0 }
 0x29d   : > { %6533 = vmatpush3.bf16.msra.mxu1 %v7216_v23  ;;  %v7255_v23 = vld [vmem:[#allocation11 + $0x290] sm:$0xff]  }
 0x29e   : > { %6534 = vmatprep.subr.bf16.mxu1 %v7896_v0 }
 0x2a1   : > { %6535 = vmatpush3.bf16.msra.mxu1 %v7217_v25  ;;  %v7256_v25 = vld [vmem:[#allocation11 + $0x298] sm:$0xff]  }
 0x2a2   : > { %6536 = vmatprep.subr.bf16.mxu1 %v7896_v0 }
 0x2a5   : > { %6537 = vmatpush3.bf16.msra.mxu1 %v7218_v26  ;;  %v7288_v26 = vld [vmem:[#allocation13 + $0x18] sm:$0xff]  }
 0x2a6   : > { %6538 = vmatprep.subr.bf16.mxu1 %v7896_v0 }
 0x2a9   : > { %6539 = vmatpush3.bf16.msra.mxu1 %v7219_v27  ;;  %v7257_v27 = vld [vmem:[#allocation11 + $0x2a0] sm:$0xff]  }
 0x2aa   : > { %6540 = vmatprep.subr.bf16.mxu1 %v7896_v0 }
 0x2ad   : > { %6541 = vmatpush3.bf16.msra.mxu1 %v7220_v28  ;;  %v7289_v28 = vld [vmem:[#allocation13 + $0x20] sm:$0xff]  }
 0x2ae   : > { %6546 = vmatprep.subr.bf16.mxu1 %v7896_v0 }
 0x2b0   : > { %6543 = vmatmul.mubr.bf16.vlgmr.msra.gmra.mrb[0].mxu1 %v1279_v32 }
 0x2b1   : > { %6547 = vmatpush3.bf16.msra.mxu1 %v7221_v31  ;;  %6562 = vmatprep.mubr.msk.bf16.mxu1 %vm7897_vm0, %v7896_v0  ;;  %v7260_v31 = vld [vmem:[#allocation11 + $0x2b8] sm:$0xff]  }
 0x2b2   : > { %6548 = vmatprep.subr.bf16.mxu1 %v7896_v0 }
 0x2b5   : > { %6549 = vmatpush3.bf16.msra.mxu1 %v7222_v33 }
 0x2b6   : > { %6550 = vmatprep.subr.bf16.mxu1 %v7896_v0 }
 0x2b9   : > { %6551 = vmatpush3.bf16.msra.mxu1 %v7223_v34  ;;  %v7261_v34 = vld [vmem:[#allocation11 + $0x300] sm:$0xff]  }
 0x2ba   : > { %6552 = vmatprep.subr.bf16.mxu1 %v7896_v0 }
 0x2bd   : > { %6553 = vmatpush3.bf16.msra.mxu1 %v7224_v35 }
 0x2be   : > { %6554 = vmatprep.subr.bf16.mxu1 %v7896_v0 }
 0x2c1   : > { %6555 = vmatpush3.bf16.msra.mxu1 %v7225_v36  ;;  %v7262_v36 = vld [vmem:[#allocation11 + $0x308] sm:$0xff]  }
 0x2c2   : > { %6556 = vmatprep.subr.bf16.mxu1 %v7896_v0 }
 0x2c5   : > { %6557 = vmatpush3.bf16.msra.mxu1 %v7226_v37  ;;  %v7263_v37 = vld [vmem:[#allocation11 + $0x310] sm:$0xff]  }
 0x2c6   : > { %6558 = vmatprep.subr.bf16.mxu1 %v7896_v0 }
 0x2c9   : > { %6559 = vmatpush3.bf16.msra.mxu1 %v7227_v38  ;;  %v7264_v38 = vld [vmem:[#allocation11 + $0x318] sm:$0xff]  }
 0x2ca   : > { %6560 = vmatprep.subr.bf16.mxu1 %v7896_v0 }
 0x2cd   : > { %6561 = vmatpush3.bf16.msra.mxu1 %v7228_v39  ;;  %v7265_v39 = vld [vmem:[#allocation11 + $0x320] sm:$0xff]  }
 0x2ce   : > { %6566 = vmatprep.subr.bf16.mxu1 %v7896_v0 }
 0x2d0   : > { %6563 = vmatmul.mubr.bf16.vlgmr.msra.gmra.mrb[0].mxu1 %v8399_v13 }
 0x2d1   : > { %6567 = vmatpush3.bf16.msra.mxu1 %v7229_v40  ;;  %6582 = vmatprep.mubr.msk.bf16.mxu1 %vm7897_vm0, %v7896_v0  ;;  %v7266_v40 = vld [vmem:[#allocation11 + $0x328] sm:$0xff]  }
 0x2d2   : > { %6568 = vmatprep.subr.bf16.mxu1 %v7896_v0 }
 0x2d5   : > { %6569 = vmatpush3.bf16.msra.mxu1 %v7230_v41  ;;  %v7267_v41 = vld [vmem:[#allocation11 + $0x330] sm:$0xff]  }
 0x2d6   : > { %6570 = vmatprep.subr.bf16.mxu1 %v7896_v0 }
 0x2d9   : > { %6571 = vmatpush3.bf16.msra.mxu1 %v7231_v42  ;;  %v7268_v42 = vld [vmem:[#allocation11 + $0x338] sm:$0xff]  }
 0x2da   : > { %6572 = vmatprep.subr.bf16.mxu1 %v7896_v0 }
 0x2dd   : > { %6573 = vmatpush3.bf16.msra.mxu1 %v7232_v43  ;;  %v7269_v43 = vld [vmem:[#allocation11 + $0x340] sm:$0xff]  }
 0x2de   : > { %6574 = vmatprep.subr.bf16.mxu1 %v7896_v0 }
 0x2e1   : > { %6575 = vmatpush3.bf16.msra.mxu1 %v7233_v44  ;;  %v7270_v44 = vld [vmem:[#allocation11 + $0x348] sm:$0xff]  }
 0x2e2   : > { %6576 = vmatprep.subr.bf16.mxu1 %v7896_v0 }
 0x2e5   : > { %6577 = vmatpush3.bf16.msra.mxu1 %v7234_v45  ;;  %v7271_v45 = vld [vmem:[#allocation11 + $0x350] sm:$0xff]  }
 0x2e6   : > { %6578 = vmatprep.subr.bf16.mxu1 %v7896_v0 }
 0x2e9   : > { %6579 = vmatpush3.bf16.msra.mxu1 %v7235_v46  ;;  %v7272_v46 = vld [vmem:[#allocation11 + $0x358] sm:$0xff]  }
 0x2ea   : > { %6580 = vmatprep.subr.bf16.mxu1 %v7896_v0 }
 0x2ed   : > { %6581 = vmatpush3.bf16.msra.mxu1 %v7236_v47  ;;  %v7273_v47 = vld [vmem:[#allocation11 + $0x360] sm:$0xff]  }
 0x2ee   : > { %6586 = vmatprep.subr.bf16.mxu1 %v7896_v0 }
 0x2f0   : > { %6583 = vmatmul.mubr.bf16.vlgmr.msra.gmra.mrb[0].mxu1 %v1608_v51 }
 0x2f1   : > { %6587 = vmatpush3.bf16.msra.mxu1 %v7237_v50  ;;  %6602 = vmatprep.mubr.msk.bf16.mxu1 %vm7897_vm0, %v7896_v0  ;;  %v7276_v50 = vld [vmem:[#allocation11 + $0x378] sm:$0xff]  }
 0x2f2   : > { %6588 = vmatprep.subr.bf16.mxu1 %v7896_v0 }
 0x2f5   : > { %6589 = vmatpush3.bf16.msra.mxu1 %v7238_v52 }
 0x2f6   : > { %6590 = vmatprep.subr.bf16.mxu1 %v7896_v0 }
 0x2f9   : > { %6591 = vmatpush3.bf16.msra.mxu1 %v7239_v53  ;;  %v7277_v53 = vld [vmem:[#allocation11 + $0x380] sm:$0xff]  }
 0x2fa   : > { %6592 = vmatprep.subr.bf16.mxu1 %v7896_v0 }
 0x2fd   : > { %6593 = vmatpush3.bf16.msra.mxu1 %v7240_v54 }
 0x2fe   : > { %6594 = vmatprep.subr.bf16.mxu1 %v7896_v0 }
 0x301   : > { %6595 = vmatpush3.bf16.msra.mxu1 %v7241_v55  ;;  %v7278_v55 = vld [vmem:[#allocation11 + $0x388] sm:$0xff]  }
 0x302   : > { %6596 = vmatprep.subr.bf16.mxu1 %v7896_v0 }
 0x305   : > { %6597 = vmatpush3.bf16.msra.mxu1 %v7242_v56  ;;  %v7279_v56 = vld [vmem:[#allocation11 + $0x390] sm:$0xff]  }
 0x306   : > { %6598 = vmatprep.subr.bf16.mxu1 %v7896_v0 }
 0x309   : > { %6599 = vmatpush3.bf16.msra.mxu1 %v7243_v57  ;;  %v7280_v57 = vld [vmem:[#allocation11 + $0x398] sm:$0xff]  }
 0x30a   : > { %6600 = vmatprep.subr.bf16.mxu1 %v7896_v0 }
 0x30d   : > { %6601 = vmatpush3.bf16.msra.mxu1 %v7244_v58  ;;  %v7281_v58 = vld [vmem:[#allocation11 + $0x3a0] sm:$0xff]  }
 0x30e   : > { %6706 = vmatprep.subr.bf16.mxu1 %v7896_v0 }
 0x310   : > { %6603 = vmatmul.mubr.bf16.vlgmr.msra.gmra.mrb[0].mxu1 %v1719_v61  ;;  %v7284_v61 = vld [vmem:[#allocation11 + $0x3b8] sm:$0xff]  }
 0x311   : > { %6722 = vmatprep.mubr.msk.bf16.mxu1 %vm7897_vm0, %v7896_v0  ;;  %6707 = vmatpush3.bf16.msra.mxu1 %v7285_v20  ;;  %v7298_v20 = vld [vmem:[#allocation14 + $0x1c] ss:$12 sps:$4 sm:$0xff]  }
 0x312   : > { %6708 = vmatprep.subr.bf16.mxu1 %v7896_v0 }
 0x315   : > { %6709 = vmatpush3.bf16.msra.mxu1 %v7286_v22  ;;  %v7301_v22 = vld [vmem:[#allocation14 + $0x34] ss:$12 sps:$4 sm:$0xff]  }
 0x316   : > { %6710 = vmatprep.subr.bf16.mxu1 %v7896_v0 }
 0x319   : > { %6711 = vmatpush3.bf16.msra.mxu1 %v7287_v24  ;;  %v7304_v24 = vld [vmem:[#allocation14 + $0x4c] ss:$12 sps:$4 sm:$0xff]  }
 0x31a   : > { %6712 = vmatprep.subr.bf16.mxu1 %v7896_v0 }
 0x31d   : > { %6713 = vmatpush3.bf16.msra.mxu1 %v7288_v26  ;;  %v7307_v26 = vld [vmem:[#allocation14 + $0x64] ss:$12 sps:$4 sm:$0xff]  }
 0x31e   : > { %6714 = vmatprep.subr.bf16.mxu1 %v7896_v0 }
 0x321   : > { %6715 = vmatpush3.bf16.msra.mxu1 %v7289_v28  ;;  %v7310_v28 = vld [vmem:[#allocation14 + $0x7c] ss:$12 sps:$4 sm:$0xff]  }
 0x322   : > { %6716 = vmatprep.subr.bf16.mxu1 %v7896_v0 }
 0x325   : > { %6717 = vmatpush3.bf16.msra.mxu1 %v7290_v2 }
 0x326   : > { %6718 = vmatprep.subr.bf16.mxu1 %v7896_v0 }
 0x3e3   : > { %v1819_v4 = vpop.f32.mrb[0].mxu1 }
 0x3e4   : > { %v1836_v6 = vmul.f32 %v5891_v3, %v1819_v4  ;;  %v6604_v7 = vpop.f32.mrb[1].mxu1  ;;  %v7292_v4 = vld [vmem:[#allocation13 + $0x38] sm:$0xff]  }
 0x3e5   : > { %v1822_v8 = vpop.f32.mrb[2].mxu1 }
 0x3e6   : > { %v1846_v9 = vadd.f32 %v5893_v5, %v1836_v6  ;;  %v1837_v10 = vmul.f32 %v5891_v3, %v1822_v8  ;;  %v6605_v11 = vpop.f32.mrb[3].mxu1  ;;  %v7291_v3 = vld [vmem:[#allocation13 + $0x30] sm:$0xff]   ;;  %v5935_v6 = vld [vmem:[%s9203_s4 + $0x2] ss:$0 sm:$0xff] }
 0x3e7   : > { %6719 = vmatpush3.bf16.msra.mxu1 %v7291_v3  ;;  %v5937_v8 = vld [vmem:[%s9204_s5 + $0x2] ss:$0 sm:$0xff] }
 0x3e8   : > { %v1848_v12 = vmax.f32 %v1846_v9, 0.0  ;;  %v1847_v13 = vadd.f32 %v5893_v5, %v1837_v10  ;;  %6720 = vmatprep.subr.bf16.mxu1 %v7896_v0  ;;  %v7295_v5 = vld [vmem:[#allocation14 + $0x4] ss:$12 sps:$4 sm:$0xff]  }
 0x3ea   : > { %1850 = vst [vmem:[#allocation2 + $0x2] sm:$0xff] %v1848_v12  ;;  %v1849_v14 = vmax.f32 %v1847_v13, 0.0 }
 0x3eb   : > { %6721 = vmatpush3.bf16.msra.mxu1 %v7292_v4 }
 0x3ec   : > { %1851 = vst [vmem:[#allocation2 + $0xa] sm:$0xff] %v1849_v14  ;;  %v8458_v15 = vpack.c.bf16 %v1849_v14, %v1848_v12  ;;  %2741 = vmatprep.subr.bf16.mxu1 %v7295_v5 }
 0x3f1   : > { %v1872_v16 = vld [vmem:[#allocation2 + $0x1] sm:$0xff] }
 0x3f2   : > { %v1852_v33 = vld [vmem:[#allocation2] sm:$0xff] }
 0x3f3   : > { %v1873_v17 = vld [vmem:[#allocation2 + $0x9] sm:$0xff] }
 0x3f4   : > { %v1874_v19 = vpack.c.bf16 %v1873_v17, %v1872_v16  ;;  %v1853_v32 = vld [vmem:[#allocation2 + $0x8] sm:$0xff] }
 0x3f5   : > { %v1854_v35 = vpack.c.bf16 %v1853_v32, %v1852_v33  ;;  %v2181_v51 = vld [vmem:[#allocation2 + $0x3] sm:$0xff]  ;;  %v2182_v52 = vld [vmem:[#allocation2 + $0xb] sm:$0xff] }
 0x3f6   : > { %6623 = vmatmul.mubr.bf16.vlgmr.msra.gmra.mrb[4].mxu0 %v1874_v19  ;;  %v2183_v54 = vpack.c.bf16 %v2182_v52, %v2181_v51  ;;  %v2292_v62 = vld [vmem:[#allocation2 + $0x4] sm:$0xff]  ;;  %v2293_v63 = vld [vmem:[#allocation2 + $0xc] sm:$0xff] }
 0x3f7   : > { %6627 = vmatpush3.bf16.msra.mxu0 %v7253_v18  ;;  %6642 = vmatprep.mubr.msk.bf16.mxu0 %vm7897_vm0, %v7896_v0  ;;  %v2294_v1 = vpack.c.bf16 %v2293_v63, %v2292_v62  ;;  %v7293_v18 = vld [vmem:[#allocation14] ss:$12 sps:$4 sm:$0xff]   ;;  %v7314_v33 = vld [vmem:[#allocation14 + $0xa8] ss:$12 sps:$4 sm:$0xff]  }
 0x3f8   : > { %6628 = vmatprep.subr.bf16.mxu0 %v7896_v0  ;;  %v7316_v32 = vld [vmem:[#allocation14 + $0xac] ss:$12 sps:$4 sm:$0xff]   ;;  %v7317_v51 = vld [vmem:[#allocation14 + $0x8] ss:$12 sps:$4 sm:$0xff]  }
 0x3f9   : > { %v2596_v63 = vld [vmem:[%s9301_s19] sm:$0x7] }
 0x3fb   : > { %6629 = vmatpush3.bf16.msra.mxu0 %v7254_v21  ;;  %v7296_v21 = vld [vmem:[#allocation14 + $0x18] ss:$12 sps:$4 sm:$0xff]  }
 0x3fc   : > { %6630 = vmatprep.subr.bf16.mxu0 %v7896_v0 }
 0x3ff   : > { %6631 = vmatpush3.bf16.msra.mxu0 %v7255_v23  ;;  %v7299_v23 = vld [vmem:[#allocation14 + $0x30] ss:$12 sps:$4 sm:$0xff]  }
 0x400   : > { %6632 = vmatprep.subr.bf16.mxu0 %v7896_v0 }
 0x403   : > { %6633 = vmatpush3.bf16.msra.mxu0 %v7256_v25  ;;  %v7302_v25 = vld [vmem:[#allocation14 + $0x48] ss:$12 sps:$4 sm:$0xff]  }
 0x404   : > { %6634 = vmatprep.subr.bf16.mxu0 %v7896_v0 }
 0x407   : > { %6635 = vmatpush3.bf16.msra.mxu0 %v7257_v27  ;;  %v7305_v27 = vld [vmem:[#allocation14 + $0x60] ss:$12 sps:$4 sm:$0xff]  }
 0x408   : > { %6636 = vmatprep.subr.bf16.mxu0 %v7896_v0 }
 0x40b   : > { %6637 = vmatpush3.bf16.msra.mxu0 %v7258_v29  ;;  %v7308_v29 = vld [vmem:[#allocation14 + $0x78] ss:$12 sps:$4 sm:$0xff]  }
 0x40c   : > { %6638 = vmatprep.subr.bf16.mxu0 %v7896_v0 }
 0x40f   : > { %6639 = vmatpush3.bf16.msra.mxu0 %v7259_v30  ;;  %v7313_v30 = vld [vmem:[#allocation14 + $0x94] ss:$12 sps:$4 sm:$0xff]  }
 0x410   : > { %6640 = vmatprep.subr.bf16.mxu0 %v7896_v0 }
 0x413   : > { %6641 = vmatpush3.bf16.msra.mxu0 %v7260_v31  ;;  %v7311_v31 = vld [vmem:[#allocation14 + $0x90] ss:$12 sps:$4 sm:$0xff]  }
 0x414   : > { %6646 = vmatprep.subr.bf16.mxu0 %v7896_v0 }
 0x416   : > { %6643 = vmatmul.mubr.bf16.vlgmr.msra.gmra.mrb[4].mxu0 %v1854_v35  ;;  %v5938_v35 = vld [vmem:[%s9206_s7] ss:$0 sm:$0xff] }
 0x417   : > { %6647 = vmatpush3.bf16.msra.mxu0 %v7261_v34  ;;  %6662 = vmatprep.mubr.msk.bf16.mxu0 %vm7897_vm0, %v7896_v0  ;;  %v7898_v34 = vmov 0  }
 0x418   : > { %6648 = vmatprep.subr.bf16.mxu0 %v7896_v0 }
 0x41b   : > { %6649 = vmatpush3.bf16.msra.mxu0 %v7262_v36 }
 0x41c   : > { %6650 = vmatprep.subr.bf16.mxu0 %v7896_v0 }
 0x41f   : > { %6651 = vmatpush3.bf16.msra.mxu0 %v7263_v37  ;;  %v2541_v37 = vld [vmem:[%s601_s11] sm:$0xff] }
 0x420   : > { %6652 = vmatprep.subr.bf16.mxu0 %v7896_v0 }
 0x423   : > { %6653 = vmatpush3.bf16.msra.mxu0 %v7264_v38  ;;  %v2543_v38 = vstv %s2540_s3 }
 0x424   : > { %6654 = vmatprep.subr.bf16.mxu0 %v7896_v0 }
 0x427   : > { %6655 = vmatpush3.bf16.msra.mxu0 %v7265_v39  ;;  %v2542_v39 = vld [vmem:[%s601_s11 + $0x8] sm:$0xff]  ;;  %s7899_s11 = smov 96  }
 0x428   : > { %6656 = vmatprep.subr.bf16.mxu0 %v7896_v0 }
 0x42b   : > { %6657 = vmatpush3.bf16.msra.mxu0 %v7266_v40 }
 0x42c   : > { %6658 = vmatprep.subr.bf16.mxu0 %v7896_v0 }
 0x42f   : > { %6659 = vmatpush3.bf16.msra.mxu0 %v7267_v41 }
 0x430   : > { %6660 = vmatprep.subr.bf16.mxu0 %v7896_v0 }
 0x433   : > { %6661 = vmatpush3.bf16.msra.mxu0 %v7268_v42 }
 0x434   : > { %6666 = vmatprep.subr.bf16.mxu0 %v7896_v0 }
 0x436   : > { %6663 = vmatmul.mubr.bf16.vlgmr.msra.gmra.mrb[4].mxu0 %v8458_v15 }
 0x437   : > { %6667 = vmatpush3.bf16.msra.mxu0 %v7269_v43  ;;  %6682 = vmatprep.mubr.msk.bf16.mxu0 %vm7897_vm0, %v7896_v0 }
 0x438   : > { %6668 = vmatprep.subr.bf16.mxu0 %v7896_v0 }
 0x43b   : > { %6669 = vmatpush3.bf16.msra.mxu0 %v7270_v44  ;;  %v2544_v44 = vmul.f32 %v2543_v38, %v2541_v37 }
 0x43c   : > { %6670 = vmatprep.subr.bf16.mxu0 %v7896_v0 }
 0x43f   : > { %6671 = vmatpush3.bf16.msra.mxu0 %v7271_v45 }
 0x440   : > { %6672 = vmatprep.subr.bf16.mxu0 %v7896_v0 }
 0x443   : > { %6673 = vmatpush3.bf16.msra.mxu0 %v7272_v46  ;;  %v2545_v46 = vmul.f32 %v2543_v38, %v2542_v39 }
 0x444   : > { %6674 = vmatprep.subr.bf16.mxu0 %v7896_v0 }
 0x447   : > { %6675 = vmatpush3.bf16.msra.mxu0 %v7273_v47 }
 0x448   : > { %6676 = vmatprep.subr.bf16.mxu0 %v7896_v0 }
 0x44b   : > { %6677 = vmatpush3.bf16.msra.mxu0 %v7274_v48 }
 0x44c   : > { %6678 = vmatprep.subr.bf16.mxu0 %v7896_v0 }
 0x44f   : > { %6679 = vmatpush3.bf16.msra.mxu0 %v7275_v49 }
 0x450   : > { %6680 = vmatprep.subr.bf16.mxu0 %v7896_v0 }
 0x453   : > { %6681 = vmatpush3.bf16.msra.mxu0 %v7276_v50 }
 0x454   : > { %6686 = vmatprep.subr.bf16.mxu0 %v7896_v0 }
 0x456   : > { %6683 = vmatmul.mubr.bf16.vlgmr.msra.gmra.mrb[4].mxu0 %v2183_v54  ;;  %v7319_v54 = vld [vmem:[#allocation14 + $0x38] ss:$12 sps:$4 sm:$0xff]  }
 0x457   : > { %6687 = vmatpush3.bf16.msra.mxu0 %v7277_v53  ;;  %6702 = vmatprep.mubr.msk.bf16.mxu0 %vm7897_vm0, %v7896_v0  ;;  %v7318_v53 = vld [vmem:[#allocation14 + $0x20] ss:$12 sps:$4 sm:$0xff]  }
 0x458   : > { %6688 = vmatprep.subr.bf16.mxu0 %v7896_v0 }
 0x45b   : > { %6689 = vmatpush3.bf16.msra.mxu0 %v7278_v55  ;;  %v7320_v55 = vld [vmem:[#allocation14 + $0x50] ss:$12 sps:$4 sm:$0xff]  }
 0x45c   : > { %6690 = vmatprep.subr.bf16.mxu0 %v7896_v0 }
 0x45f   : > { %6691 = vmatpush3.bf16.msra.mxu0 %v7279_v56  ;;  %v7321_v56 = vld [vmem:[#allocation14 + $0x68] ss:$12 sps:$4 sm:$0xff]  }
 0x460   : > { %6692 = vmatprep.subr.bf16.mxu0 %v7896_v0 }
 0x463   : > { %6693 = vmatpush3.bf16.msra.mxu0 %v7280_v57  ;;  %v7322_v57 = vld [vmem:[#allocation14 + $0x80] ss:$12 sps:$4 sm:$0xff]  }
 0x464   : > { %6694 = vmatprep.subr.bf16.mxu0 %v7896_v0 }
 0x467   : > { %6695 = vmatpush3.bf16.msra.mxu0 %v7281_v58  ;;  %v7323_v58 = vld [vmem:[#allocation14 + $0x98] ss:$12 sps:$4 sm:$0xff]  }
 0x468   : > { %6696 = vmatprep.subr.bf16.mxu0 %v7896_v0 }
 0x46b   : > { %6697 = vmatpush3.bf16.msra.mxu0 %v7282_v59  ;;  %v7324_v59 = vld [vmem:[#allocation14 + $0xb0] ss:$12 sps:$4 sm:$0xff]  }
 0x46c   : > { %6698 = vmatprep.subr.bf16.mxu0 %v7896_v0 }
 0x46f   : > { %6699 = vmatpush3.bf16.msra.mxu0 %v7283_v60  ;;  %v2551_v60 = vlaneseq }
 0x470   : > { %6700 = vmatprep.subr.bf16.mxu0 %v7896_v0 }
 0x473   : > { %6701 = vmatpush3.bf16.msra.mxu0 %v7284_v61  ;;  %v2552_v61 = vshrl.u32 %v2551_v60, 7 }
 0x474   : > { %6794 = vmatprep.subr.bf16.mxu0 %v7896_v0 }
 0x475   : > { %v8543_v62 = vsub.s32 0, %v2552_v61 }
 0x476   : > { %6703 = vmatmul.mubr.bf16.vlgmr.msra.gmra.mrb[4].mxu0 %v2294_v1  ;;  %v8548_v1 = vsub.s32 1, %v2552_v61 }
 0x477   : > { %6810 = vmatprep.mubr.msk.bf16.mxu0 %vm7897_vm0, %v7896_v0  ;;  %v2601_v2 = vrot.slane %v2596_v63, %v8543_v62 }
 0x478   : > { %v2605_v4 = vrot.slane %v2596_v63, %v8548_v1 }
 0x549   : > { %v2394_v7 = vpop.f32.mrb[4].mxu0 }
 0x54a   : > { %v2411_v9 = vmul.f32 %v5935_v6, %v2394_v7  ;;  %v6704_v10 = vpop.f32.mrb[5].mxu0 }
 0x54b   : > { %v2397_v11 = vpop.f32.mrb[6].mxu0 }
 0x54c   : > { %v2421_v12 = vadd.f32 %v5937_v8, %v2411_v9  ;;  %v2412_v13 = vmul.f32 %v5935_v6, %v2397_v11  ;;  %v6705_v14 = vpop.f32.mrb[7].mxu0 }
 0x54e   : > { %v2422_v15 = vadd.f32 %v5937_v8, %v2412_v13  ;;  %v2423_v16 = vmax.f32 %v2421_v12, 0.0 }
 0x550   : > { %v2424_v17 = vmax.f32 %v2422_v15, 0.0  ;;  %v8563_v15 = vsub.s32 2, %v2552_v61 }
 0x552   : > { %v2425_v19 = vpack.c.bf16 %v2424_v17, %v2423_v16  ;;  %v2609_v16 = vrot.slane %v2596_v63, %v8563_v15 }
 0x554   : > { %6723 = vmatmul.mubr.bf16.vlgmr.msra.gmra.mrb[4].mxu1 %v2425_v19 }
 0x555   : > { %2742 = vmatpush1.bf16.msra.mxu1 %v7293_v18  ;;  %2773 = vmatprep.mubr.bf16.mxu1 %v7898_v34 }
 0x556   : > { %2743 = vmatprep.subr.bf16.mxu1 %v7298_v20 }
 0x559   : > { %2744 = vmatpush1.bf16.msra.mxu1 %v7296_v21 }
 0x55a   : > { %2745 = vmatprep.subr.bf16.mxu1 %v7301_v22 }
 0x55d   : > { %2746 = vmatpush1.bf16.msra.mxu1 %v7299_v23 }
 0x55e   : > { %2747 = vmatprep.subr.bf16.mxu1 %v7304_v24  ;;  %v2548_v24 = vld [vmem:[%s609_s18] sm:$0x1]  ;;  %s8589_s18 = sshll.u32 %s8288_s6, 5 }
 0x55f   : > { %s8593_s28 = scalar_lea.vmem [#allocation18], %s8589_s18  ;;  %s8765_s23 = scalar_lea.vmem [#allocation20], %s8589_s18 }
 0x560   : > { %s8940_s21 = scalar_lea.vmem [#allocation21], %s8589_s18  ;;  %s9304_s18 = sld [smem:[#allocation45_spill]] }
 0x561   : > { %2748 = vmatpush1.bf16.msra.mxu1 %v7302_v25  ;;  %v2549_v25 = vmul.f32 -1e+09, %v2548_v24  ;;  %s5507_s0 = sshll.u32 %s8593_s28, 4  ;;  %s9040_s0 = int_to_ptr.vmem [resolvable:$true] %s5507_s0 }
 0x562   : > { %2749 = vmatprep.subr.bf16.mxu1 %v7307_v26  ;;  %s7711_s9 = scalar_lea.vmem %s9040_s0, 512  ;;  %p7718_p13 = scmp.lt.s32.totalorder %s9040_s0, %s7716_s20 }
 0x563   : > { %v8573_v26 = vrot.slane %v2549_v25, %v8543_v62  ;;  %p7712_p5 = scmp.ne.s32.totalorder %s9040_s0, %s7711_s9  ;;  %p7719_p9 = scmp.lt.s32.totalorder %s7717_s1, %s7711_s9 }
 0x565   : > { %2750 = vmatpush1.bf16.msra.mxu1 %v7305_v27  ;;  %p7713_p4 = pnand %p7712_p5, %p9305_p2  ;;  %p7720_p7 = por %p7719_p9, %p7718_p13 }
 0x566   : > { %2751 = vmatprep.subr.bf16.mxu1 %v7310_v28 }
 0x567   : > { %p7714_p11 = pneg %p7713_p4 }
 0x569   : > { %2752 = vmatpush1.bf16.msra.mxu1 %v7308_v29  ;;  %p7721_p12 = pnand %p7720_p7, %p7714_p11 }
 0x56a   : > { %2753 = vmatprep.subr.bf16.mxu1 %v7313_v30 }
 0x56d   : > { %2754 = vmatpush1.bf16.msra.mxu1 %v7311_v31 }
 0x56e   : > { %2755 = vmatprep.subr.bf16.mxu1 %v7316_v32 }
 0x571   : > { %2756 = vmatpush1.bf16.msra.mxu1 %v7314_v33 }
 0x572   : > { %6726 = vmatprep.subr.bf16.mxu1 %v7896_v0 }
 0x627   : > { %v2531_v36 = vpop.f32.mrb[4].mxu1 }
 0x628   : > { %v2532_v40 = vadd.f32 %v5938_v35, %v2531_v36  ;;  %v6724_v41 = vpop.f32.mrb[5].mxu1 }
 0x629   : > { %v2534_v42 = vpop.f32.mrb[6].mxu1 }
 0x62a   : > { %v2538_v43 = vmax.f32 %v2532_v40, 0.0  ;;  %v2535_v45 = vadd.f32 %v5938_v35, %v2534_v42  ;;  %v6725_v47 = vpop.f32.mrb[7].mxu1 }
 0x62c   : > { %v2539_v48 = vmax.f32 %v2535_v45, 0.0  ;;  %v8525_v49 = vadd.f32 %v2544_v44, %v2538_v43 }
 0x62e   : > { %v8527_v50 = vadd.f32 %v2545_v46, %v2539_v48 }
 0x630   : > { %v2563_v52 = vpack.c.bf16 %v8527_v50, %v8525_v49 }
 0x632   : > { %2774 = vmatmul.mubr.bf16.vlgmr.msra.gmra.mrb[8].mxu1 %v2563_v52 }
 0x633   : > { %6727 = vmatpush3.bf16.msra.mxu1 %v7317_v51  ;;  %6742 = vmatprep.mubr.msk.bf16.mxu1 %vm7897_vm0, %v7896_v0 }
 0x634   : > { %6728 = vmatprep.subr.bf16.mxu1 %v7896_v0 }
 0x637   : > { %6729 = vmatpush3.bf16.msra.mxu1 %v7318_v53 }
 0x638   : > { %6730 = vmatprep.subr.bf16.mxu1 %v7896_v0 }
 0x63b   : > { %6731 = vmatpush3.bf16.msra.mxu1 %v7319_v54 }
 0x63c   : > { %6732 = vmatprep.subr.bf16.mxu1 %v7896_v0 }
 0x63f   : > { %6733 = vmatpush3.bf16.msra.mxu1 %v7320_v55 }
 0x640   : > { %6734 = vmatprep.subr.bf16.mxu1 %v7896_v0 }
 0x643   : > { %6735 = vmatpush3.bf16.msra.mxu1 %v7321_v56 }
 0x644   : > { %6736 = vmatprep.subr.bf16.mxu1 %v7896_v0 }
 0x647   : > { %6737 = vmatpush3.bf16.msra.mxu1 %v7322_v57 }
 0x648   : > { %6738 = vmatprep.subr.bf16.mxu1 %v7896_v0 }
 0x64b   : > { %6739 = vmatpush3.bf16.msra.mxu1 %v7323_v58 }
 0x64c   : > { %6740 = vmatprep.subr.bf16.mxu1 %v7896_v0 }
 0x64f   : > { %6741 = vmatpush3.bf16.msra.mxu1 %v7324_v59 }
 0x650   : > { %6746 = vmatprep.subr.bf16.mxu1 %v7896_v0 }
 0x652   : > { %6743 = vmatmul.mubr.bf16.vlgmr.msra.gmra.mrb[12].mxu1 %v2563_v52  ;;  %v2556_v52 = vsub.f32 1.0, %v2548_v24 }
 0x653   : > { %6748 = vmatprep.mubr.msk.bf16.mxu1 %vm7897_vm0, %v7896_v0 }
 0x654   : > { %v8586_v53 = vrot.slane %v2556_v52, %v8543_v62 }
 0x705   : > { %v2775_v3 = vpop.f32.mrb[8].mxu1 }
 0x706   : > { %v2777_v5 = vpop.f32.mrb[9].mxu1  ;;  %v2776_v7 = vadd.f32 %v2775_v3, %v2601_v2 }
 0x707   : > { %v2779_v6 = vpop.f32.mrb[10].mxu1  ;;  %v2778_v10 = vadd.f32 %v2777_v5, %v2605_v4 }
 0x708   : > { %v2780_v8 = vadd.f32 %v2779_v6, %v2601_v2  ;;  %v2781_v9 = vpop.f32.mrb[11].mxu1 }
 0x709   : > { %v2782_v11 = vadd.f32 %v2781_v9, %v2605_v4 }
 0x70a   : > { %v8552_v12 = vpack.c.bf16 %v2780_v8, %v2776_v7 }
 0x70b   : > { %v8554_v13 = vpack.c.bf16 %v2782_v11, %v2778_v10 }
 0x70d   : > { %v2833_v14 = vsel %vm2828_vm1, %v8554_v13, 0 }
 0x70e   : > { %6747 = vmatpush3.bf16.xpose.msra.mxu1 %v2833_v14 }
 0x70f   : > { %6752 = vmatprep.subr.bf16.mxu1 %v7896_v0 }
 0x715   : > { %6749 = vmatmul.mubr.msk.bf16.vlgmr.msra.gmra.mrb[16].mxu1 %vm2828_vm1, %v8552_v12 }
 0x716   : > { %6754 = vmatprep.mubr.msk.bf16.mxu1 %vm7897_vm0, %v7896_v0 }
 0x725   : > { %v2818_v17 = vpop.f32.mrb[12].mxu1 }
 0x726   : > { %v6744_v18 = vpop.f32.mrb[13].mxu1  ;;  %v2819_v20 = vadd.f32 %v2818_v17, %v2609_v16 }
 0x727   : > { %v2821_v19 = vpop.f32.mrb[14].mxu1 }
 0x728   : > { %v2822_v21 = vadd.f32 %v2821_v19, %v2609_v16  ;;  %v6745_v22 = vpop.f32.mrb[15].mxu1 }
 0x72a   : > { %v8566_v23 = vpack.c.bf16 %v2822_v21, %v2819_v20 }
 0x72c   : > { %6753 = vmatpush3.bf16.msra.mxu1 %v8566_v23 }
 0x72d   : > { %6758 = vmatprep.subr.bf16.mxu1 %v7896_v0 }
 0x7e8   : > { %v2869_v27 = vpop.f32.mrb[16].mxu1 }
 0x7e9   : > { %v2876_v28 = vmul.f32 0.17677669, %v2869_v27  ;;  %v6750_v29 = vpop.f32.mrb[17].mxu1 }
 0x7ea   : > { %v2872_v30 = vpop.f32.mrb[18].mxu1 }
 0x7eb   : > { %v2877_v31 = vmul.f32 0.17677669, %v2872_v30  ;;  %v6751_v32 = vpop.f32.mrb[19].mxu1  ;;  %v2878_v33 = vadd.f32 %v2876_v28, %v8573_v26 }
 0x7ed   : > { %v2881_v35 = vsel %vm2880_vm2, %v2878_v33, -inf  ;;  %v2879_v36 = vadd.f32 %v2877_v31, %v8573_v26 }
 0x7ee   : > { %2882 = vmax.xlane.f32.xlu0 %v2881_v35 }
 0x7ef   : > { %v2884_v37 = vsel %vm2880_vm2, %v2879_v36, -inf }
 0x7f2   : > { %2885 = vmax.xlane.f32.xlu0 %v2884_v37 }
 0x808   : > { %2967 = vrot.lane.b32.xlu0 %v8554_v13, %s7899_s11 }
 0x87b   : > { %v2883_v38 = vpop.xlane.xlu0 %2882 }
 0x87c   : > { %v2887_v39 = vsub.f32 %v2878_v33, %v2883_v38 }
 0x87e   : > { %v2889_v40 = vmul.f32 1.442695, %v2887_v39 }
 0x87f   : > { %v2886_v41 = vpop.xlane.xlu0 %2885 }
 0x880   : > { %7413 = vpow2.f32 %v2889_v40  ;;  %v2888_v42 = vsub.f32 %v2879_v36, %v2886_v41 }
 0x882   : > { %v2891_v43 = vmul.f32 1.442695, %v2888_v42 }
 0x883   : > { %v2968_v60 = vpop.permute.xlu0 %2967 }
 0x884   : > { %7415 = vpow2.f32 %v2891_v43  ;;  %v2973_v2 = vsel %vm2828_vm1, %v2968_v60, 0 }
 0x88a   : > { %v7414_v44 = vpop.eup %7413 }
 0x88b   : > { %v2893_v45 = vsel %vm2880_vm2, %v7414_v44, 0.0 }
 0x88c   : > { %2894 = vadd.xlane.f32.xlu1 %v2893_v45 }
 0x88e   : > { %v7416_v46 = vpop.eup %7415 }
 0x88f   : > { %v2896_v47 = vsel %vm2880_vm2, %v7416_v46, 0.0 }
 0x890   : > { %2897 = vadd.xlane.f32.xlu1 %v2896_v47 }
 0x8a1   : > { %2964 = vrot.lane.b32.xlu1 %v8552_v12, %s7899_s11 }
 0x919   : > { %v2895_v48 = vpop.xlane.xlu1 %2894 }
 0x91a   : > { %7417 = vrcp.f32 %v2895_v48 }
 0x91d   : > { %v2898_v51 = vpop.xlane.xlu1 %2897 }
 0x91e   : > { %7419 = vrcp.f32 %v2898_v51 }
 0x921   : > { %v2965_v4 = vpop.permute.xlu1 %2964 }
 0x924   : > { %v7418_v54 = vpop.eup %7417 }
 0x925   : > { %v2901_v55 = vmul.f32 %v7418_v54, %v7414_v44 }
 0x927   : > { %v2903_v56 = vmul.f32 %v2901_v55, %v8586_v53 }
 0x928   : > { %v7420_v57 = vpop.eup %7419 }
 0x929   : > { %v6132_v58 = vpack.c.bf16 %v2903_v56, %v2903_v56  ;;  %v2902_v59 = vmul.f32 %v7420_v57, %v7416_v46 }
 0x92b   : > { %2914 = vst.msk [vmem:[%s8593_s28] sm:$0xf] %vm2913_vm3, %v6132_v58  ;;  %v2904_v61 = vmul.f32 %v2902_v59, %v8586_v53  ;;  %v2916_v63 = vpack.c.bf16 %v2902_v59, %v2901_v55 }
 0x92d   : > { %v6133_v3 = vpack.c.bf16 %v2904_v61, %v2904_v61  ;;  %6755 = vmatmul.mubr.msk.bf16.vlgmr.msra.gmra.mrb[20].mxu1 %vm2880_vm2, %v2916_v63 }
 0x92e   : > { %6759 = vmatpush3.bf16.xpose.msra.mxu1 %v2973_v2  ;;  %6760 = vmatprep.mubr.msk.bf16.mxu1 %vm7897_vm0, %v7896_v0 }
 0x92f   : > { %2915 = vst.msk [vmem:[%s8593_s28 + $0x4] sm:$0xf] %vm2913_vm3, %v6133_v3  ;;  %6764 = vmatprep.subr.bf16.mxu1 %v7896_v0 }
 0x935   : > { %6761 = vmatmul.mubr.msk.bf16.vlgmr.msra.gmra.mrb[24].mxu1 %vm2828_vm1, %v2965_v4 }
 0x936   : > { %6766 = vmatprep.mubr.msk.bf16.mxu1 %vm7897_vm0, %v7896_v0 }
 0xa00   : > { %v2954_v5 = vpop.f32.mrb[20].mxu1 }
 0xa01   : > { %2961 = vst.msk [vmem:[#allocation3] sm:$0xff] %vm2828_vm1, %v2954_v5  ;;  %v6756_v6 = vpop.f32.mrb[21].mxu1 }
 0xa02   : > { %v2957_v7 = vpop.f32.mrb[22].mxu1 }
 0xa03   : > { %2962 = vst.msk [vmem:[#allocation3 + $0x8] sm:$0xff] %vm2828_vm1, %v2957_v7  ;;  %v6757_v8 = vpop.f32.mrb[23].mxu1 }
 0xa08   : > { %v3009_v9 = vpop.f32.mrb[24].mxu1 }
 0xa09   : > { %v3016_v10 = vmul.f32 0.17677669, %v3009_v9  ;;  %v6762_v11 = vpop.f32.mrb[25].mxu1 }
 0xa0a   : > { %v3012_v14 = vpop.f32.mrb[26].mxu1 }
 0xa0b   : > { %v3017_v16 = vmul.f32 0.17677669, %v3012_v14  ;;  %v6763_v17 = vpop.f32.mrb[27].mxu1  ;;  %v3018_v18 = vadd.f32 %v3016_v10, %v8573_v26 }
 0xa0d   : > { %v3020_v19 = vsel %vm2880_vm2, %v3018_v18, -inf  ;;  %v3019_v20 = vadd.f32 %v3017_v16, %v8573_v26 }
 0xa0e   : > { %3021 = vmax.xlane.f32.xlu1 %v3020_v19 }
 0xa0f   : > { %v3023_v21 = vsel %vm2880_vm2, %v3019_v20, -inf }
 0xa10   : > { %3024 = vmax.xlane.f32.xlu0 %v3023_v21 }
 0xa9b   : > { %v3022_v22 = vpop.xlane.xlu1 %3021 }
 0xa9c   : > { %v3026_v24 = vsub.f32 %v3018_v18, %v3022_v22 }
 0xa9d   : > { %v3025_v25 = vpop.xlane.xlu0 %3024 }
 0xa9e   : > { %v3028_v27 = vmul.f32 1.442695, %v3026_v24  ;;  %v3027_v28 = vsub.f32 %v3019_v20, %v3025_v25 }
 0xaa0   : > { %7421 = vpow2.f32 %v3028_v27  ;;  %v3030_v29 = vmul.f32 1.442695, %v3027_v28 }
 0xaa2   : > { %7423 = vpow2.f32 %v3030_v29 }
 0xaaa   : > { %v7422_v30 = vpop.eup %7421 }
 0xaab   : > { %v3032_v31 = vsel %vm2880_vm2, %v7422_v30, 0.0 }
 0xaac   : > { %v7424_v32 = vpop.eup %7423  ;;  %3033 = vadd.xlane.f32.xlu0 %v3032_v31 }
 0xaad   : > { %v3035_v33 = vsel %vm2880_vm2, %v7424_v32, 0.0 }
 0xaae   : > { %3036 = vadd.xlane.f32.xlu1 %v3035_v33 }
 0xabf   : > { %3117 = vrot.lane.b32.xlu1 %v8554_v13, %s7900_s15 }
 0xac2   : > { %3057 = vrot.lane.b32.xlu0 %v8566_v23, %s7899_s11 }
 0xac3   : > { %3115 = vrot.lane.b32.xlu1 %v8552_v12, %s7900_s15 }
 0xb39   : > { %v3034_v35 = vpop.xlane.xlu0 %3033 }
 0xb3a   : > { %7425 = vrcp.f32 %v3034_v35 }
 0xb3b   : > { %v3037_v36 = vpop.xlane.xlu1 %3036 }
 0xb3c   : > { %7427 = vrcp.f32 %v3037_v36 }
 0xb3d   : > { %v3058_v37 = vpop.permute.xlu0 %3057 }
 0xb3e   : > { %6765 = vmatpush3.bf16.msra.mxu1 %v3058_v37 }
 0xb3f   : > { %6770 = vmatprep.subr.bf16.mxu1 %v7896_v0  ;;  %v3118_v43 = vpop.permute.xlu1 %3117 }
 0xb40   : > { %v3123_v48 = vsel %vm2828_vm1, %v3118_v43, 0 }
 0xb43   : > { %v3116_v51 = vpop.permute.xlu1 %3115 }
 0xb44   : > { %v7426_v38 = vpop.eup %7425 }
 0xb45   : > { %v3040_v39 = vmul.f32 %v7426_v38, %v7422_v30 }
 0xb46   : > { %v7428_v40 = vpop.eup %7427 }
 0xb47   : > { %v3042_v41 = vmul.f32 %v3040_v39, %v8586_v53  ;;  %v3041_v42 = vmul.f32 %v7428_v40, %v7424_v32 }
 0xb49   : > { %v6134_v44 = vpack.c.bf16 %v3042_v41, %v3042_v41  ;;  %v3043_v45 = vmul.f32 %v3041_v42, %v8586_v53  ;;  %v3055_v46 = vpack.c.bf16 %v3041_v42, %v3040_v39 }
 0xb4b   : > { %5978 = vst.msk [vmem:[%s8593_s28 + $0x8] sm:$0xf] %vm2913_vm3, %v6134_v44  ;;  %v6135_v47 = vpack.c.bf16 %v3043_v45, %v3043_v45  ;;  %6767 = vmatmul.mubr.msk.bf16.vlgmr.msra.gmra.mrb[28].mxu1 %vm2880_vm2, %v3055_v46 }
 0xb4c   : > { %6771 = vmatpush3.bf16.xpose.msra.mxu1 %v3123_v48  ;;  %6772 = vmatprep.mubr.msk.bf16.mxu1 %vm7897_vm0, %v7896_v0 }
 0xb4d   : > { %5979 = vst.msk [vmem:[%s8593_s28 + $0xc] sm:$0xf] %vm2913_vm3, %v6135_v47  ;;  %6776 = vmatprep.subr.bf16.mxu1 %v7896_v0 }
 0xb53   : > { %6773 = vmatmul.mubr.msk.bf16.vlgmr.msra.gmra.mrb[32].mxu1 %vm2828_vm1, %v3116_v51 }
 0xb54   : > { %6778 = vmatprep.mubr.msk.bf16.mxu1 %vm7897_vm0, %v7896_v0 }
 0xc1e   : > { %v8637_v52 = vpop.f32.mrb[28].mxu1 }
 0xc1f   : > { %v6768_v54 = vpop.f32.mrb[29].mxu1 }
 0xc20   : > { %v8639_v55 = vpop.f32.mrb[30].mxu1 }
 0xc21   : > { %v6769_v56 = vpop.f32.mrb[31].mxu1 }
 0xc26   : > { %v3159_v57 = vpop.f32.mrb[32].mxu1 }
 0xc27   : > { %v3166_v58 = vmul.f32 0.17677669, %v3159_v57  ;;  %v6774_v59 = vpop.f32.mrb[33].mxu1 }
 0xc28   : > { %v3162_v60 = vpop.f32.mrb[34].mxu1 }
 0xc29   : > { %v3167_v61 = vmul.f32 0.17677669, %v3162_v60  ;;  %v6775_v63 = vpop.f32.mrb[35].mxu1  ;;  %v3168_v2 = vadd.f32 %v3166_v58, %v8573_v26 }
 0xc2b   : > { %v3170_v3 = vsel %vm2880_vm2, %v3168_v2, -inf  ;;  %v3169_v4 = vadd.f32 %v3167_v61, %v8573_v26 }
 0xc2c   : > { %3171 = vmax.xlane.f32.xlu1 %v3170_v3 }
 0xc2d   : > { %v3173_v5 = vsel %vm2880_vm2, %v3169_v4, -inf }
 0xc2e   : > { %3174 = vmax.xlane.f32.xlu0 %v3173_v5 }
 0xc3d   : > { %3206 = vrot.lane.b32.xlu1 %v8566_v23, %s7900_s15 }
 0xc41   : > { %3264 = vrot.lane.b32.xlu1 %v8552_v12, %s7901_s13 }
 0xcb9   : > { %v3172_v6 = vpop.xlane.xlu1 %3171 }
 0xcba   : > { %v3176_v7 = vsub.f32 %v3168_v2, %v3172_v6 }
 0xcbb   : > { %v3175_v8 = vpop.xlane.xlu0 %3174 }
 0xcbc   : > { %v3178_v9 = vmul.f32 1.442695, %v3176_v7  ;;  %v3177_v10 = vsub.f32 %v3169_v4, %v3175_v8 }
 0xcbd   : > { %v3207_v11 = vpop.permute.xlu1 %3206 }
 0xcbe   : > { %7429 = vpow2.f32 %v3178_v9  ;;  %v3180_v14 = vmul.f32 1.442695, %v3177_v10  ;;  %6777 = vmatpush3.bf16.msra.mxu1 %v3207_v11 }
 0xcbf   : > { %6782 = vmatprep.subr.bf16.mxu1 %v7896_v0 }
 0xcc0   : > { %7431 = vpow2.f32 %v3180_v14 }
 0xcc1   : > { %v3265_v33 = vpop.permute.xlu1 %3264 }
 0xcc8   : > { %v7430_v16 = vpop.eup %7429 }
 0xcc9   : > { %v3182_v17 = vsel %vm2880_vm2, %v7430_v16, 0.0 }
 0xcca   : > { %v7432_v18 = vpop.eup %7431  ;;  %3183 = vadd.xlane.f32.xlu0 %v3182_v17 }
 0xccb   : > { %v3185_v12 = vsel %vm2880_vm2, %v7432_v18, 0.0 }
 0xcce   : > { %3186 = vadd.xlane.f32.xlu0 %v3185_v12  ;;  %v7325_v12 = vld [vmem:[#allocation16] sm:$0xff]  }
 0xccf   : > { %6795 = vmatpush3.bf16.msra.mxu0 %v7325_v12 }
 0xcd0   : > { %6796 = vmatprep.subr.bf16.mxu0 %v7896_v0 }
 0xce4   : > { %3266 = vrot.lane.b32.xlu0 %v8554_v13, %s7901_s13 }
 0xd57   : > { %v3184_v19 = vpop.xlane.xlu0 %3183 }
 0xd58   : > { %7433 = vrcp.f32 %v3184_v19  ;;  %v7326_v19 = vld [vmem:[#allocation16 + $0x8] sm:$0xff]  }
 0xd59   : > { %6797 = vmatpush3.bf16.msra.mxu0 %v7326_v19 }
 0xd5a   : > { %6798 = vmatprep.subr.bf16.mxu0 %v7896_v0 }
 0xd5b   : > { %v3187_v20 = vpop.xlane.xlu0 %3186 }
 0xd5c   : > { %7435 = vrcp.f32 %v3187_v20  ;;  %v7327_v20 = vld [vmem:[#allocation16 + $0x10] sm:$0xff]  }
 0xd5d   : > { %6799 = vmatpush3.bf16.msra.mxu0 %v7327_v20 }
 0xd5e   : > { %6800 = vmatprep.subr.bf16.mxu0 %v7896_v0 }
 0xd5f   : > { %v3267_v29 = vpop.permute.xlu0 %3266 }
 0xd60   : > { %v3272_v13 = vsel %vm2828_vm1, %v3267_v29, 0  ;;  %v7333_v29 = vld [vmem:[#allocation14 + $0xc0] ss:$12 sps:$4 sm:$0xff]  }
 0xd62   : > { %v7434_v21 = vpop.eup %7433 }
 0xd63   : > { %v3190_v22 = vmul.f32 %v7434_v21, %v7430_v16  ;;  %v7328_v21 = vld [vmem:[#allocation16 + $0x18] sm:$0xff]  }
 0xd64   : > { %6801 = vmatpush3.bf16.msra.mxu0 %v7328_v21 }
 0xd65   : > { %v3192_v24 = vmul.f32 %v3190_v22, %v8586_v53  ;;  %6802 = vmatprep.subr.bf16.mxu0 %v7896_v0 }
 0xd66   : > { %v7436_v25 = vpop.eup %7435 }
 0xd67   : > { %v6136_v27 = vpack.c.bf16 %v3192_v24, %v3192_v24  ;;  %v3191_v28 = vmul.f32 %v7436_v25, %v7432_v18  ;;  %v7330_v24 = vld [vmem:[#allocation16 + $0x28] sm:$0xff]   ;;  %v7331_v25 = vld [vmem:[#allocation16 + $0x30] sm:$0xff]  }
 0xd69   : > { %5984 = vst.msk [vmem:[%s8593_s28 + $0x10] sm:$0xf] %vm2913_vm3, %v6136_v27  ;;  %v3193_v30 = vmul.f32 %v3191_v28, %v8586_v53  ;;  %v3205_v31 = vpack.c.bf16 %v3191_v28, %v3190_v22  ;;  %v7329_v22 = vld [vmem:[#allocation16 + $0x20] sm:$0xff]   ;;  %v7332_v27 = vld [vmem:[#allocation16 + $0x38] sm:$0xff]  }
 0xd6a   : > { %6803 = vmatpush3.bf16.msra.mxu0 %v7329_v22 }
 0xd6b   : > { %v6137_v32 = vpack.c.bf16 %v3193_v30, %v3193_v30  ;;  %6779 = vmatmul.mubr.msk.bf16.vlgmr.msra.gmra.mrb[36].mxu1 %vm2880_vm2, %v3205_v31  ;;  %6804 = vmatprep.subr.bf16.mxu0 %v7896_v0  ;;  %v7335_v30 = vld [vmem:[#allocation14 + $0xc4] ss:$12 sps:$4 sm:$0xff]  }
 0xd6c   : > { %6783 = vmatpush3.bf16.xpose.msra.mxu1 %v3272_v13  ;;  %6784 = vmatprep.mubr.msk.bf16.mxu1 %vm7897_vm0, %v7896_v0  ;;  %v7339_v13 = vld [vmem:[#allocation14 + $0xdc] ss:$12 sps:$4 sm:$0xff]  }
 0xd6d   : > { %5985 = vst.msk [vmem:[%s8593_s28 + $0x14] sm:$0xf] %vm2913_vm3, %v6137_v32  ;;  %6788 = vmatprep.subr.bf16.mxu1 %v7896_v0 }
 0xd6e   : > { %6805 = vmatpush3.bf16.msra.mxu0 %v7330_v24 }
 0xd6f   : > { %6806 = vmatprep.subr.bf16.mxu0 %v7896_v0 }
 0xd72   : > { %6807 = vmatpush3.bf16.msra.mxu0 %v7331_v25 }
 0xd73   : > { %6785 = vmatmul.mubr.msk.bf16.vlgmr.msra.gmra.mrb[40].mxu1 %vm2828_vm1, %v3265_v33  ;;  %6808 = vmatprep.subr.bf16.mxu0 %v7896_v0 }
 0xd74   : > { %6790 = vmatprep.mubr.msk.bf16.mxu1 %vm7897_vm0, %v7896_v0 }
 0xd76   : > { %6809 = vmatpush3.bf16.msra.mxu0 %v7332_v27 }
 0xd77   : > { %6814 = vmatprep.subr.bf16.mxu0 %v7896_v0 }
 0xe3e   : > { %v3246_v35 = vpop.f32.mrb[36].mxu1 }
 0xe3f   : > { %v6780_v36 = vpop.f32.mrb[37].mxu1 }
 0xe40   : > { %v3249_v37 = vpop.f32.mrb[38].mxu1  ;;  %v7343_v36 = vld [vmem:[#allocation14 + $0xf4] ss:$12 sps:$4 sm:$0xff]  }
 0xe41   : > { %v6781_v38 = vpop.f32.mrb[39].mxu1 }
 0xe42   : > { %v7347_v38 = vld [vmem:[#allocation14 + $0x10c] ss:$12 sps:$4 sm:$0xff]  }
 0xe46   : > { %v3308_v39 = vpop.f32.mrb[40].mxu1 }
 0xe47   : > { %v3315_v40 = vmul.f32 0.17677669, %v3308_v39  ;;  %v6786_v41 = vpop.f32.mrb[41].mxu1  ;;  %v7345_v39 = vld [vmem:[#allocation14 + $0x108] ss:$12 sps:$4 sm:$0xff]  }
 0xe48   : > { %v3311_v42 = vpop.f32.mrb[42].mxu1  ;;  %v7349_v41 = vld [vmem:[#allocation14 + $0x120] ss:$12 sps:$4 sm:$0xff]  }
 0xe49   : > { %v3316_v43 = vmul.f32 0.17677669, %v3311_v42  ;;  %v6787_v44 = vpop.f32.mrb[43].mxu1  ;;  %v3317_v45 = vadd.f32 %v3315_v40, %v8573_v26  ;;  %v7351_v40 = vld [vmem:[#allocation14 + $0x124] ss:$12 sps:$4 sm:$0xff]  }
 0xe4a   : > { %v7355_v42 = vld [vmem:[#allocation14 + $0x13c] ss:$12 sps:$4 sm:$0xff]  }
 0xe4b   : > { %v3319_v46 = vsel %vm2880_vm2, %v3317_v45, -inf  ;;  %v3318_v47 = vadd.f32 %v3316_v43, %v8573_v26  ;;  %v7353_v43 = vld [vmem:[#allocation14 + $0x138] ss:$12 sps:$4 sm:$0xff]  }
 0xe4c   : > { %3320 = vmax.xlane.f32.xlu1 %v3319_v46 }
 0xe4d   : > { %v3322_v48 = vsel %vm2880_vm2, %v3318_v47, -inf }
 0xe4e   : > { %3323 = vmax.xlane.f32.xlu0 %v3322_v48  ;;  %v7336_v48 = vld [vmem:[#allocation14 + $0xc8] ss:$12 sps:$4 sm:$0xff]  }
 0xed9   : > { %v3321_v51 = vpop.xlane.xlu1 %3320 }
 0xeda   : > { %v3325_v54 = vsub.f32 %v3317_v45, %v3321_v51 }
 0xedb   : > { %v3324_v56 = vpop.xlane.xlu0 %3323 }
 0xedc   : > { %v3327_v57 = vmul.f32 1.442695, %v3325_v54  ;;  %v3326_v58 = vsub.f32 %v3318_v47, %v3324_v56  ;;  %v7340_v54 = vld [vmem:[#allocation14 + $0xe0] ss:$12 sps:$4 sm:$0xff]   ;;  %v7344_v56 = vld [vmem:[#allocation14 + $0xf8] ss:$12 sps:$4 sm:$0xff]  }
 0xede   : > { %7437 = vpow2.f32 %v3327_v57  ;;  %v3329_v59 = vmul.f32 1.442695, %v3326_v58  ;;  %v7348_v57 = vld [vmem:[#allocation14 + $0x110] ss:$12 sps:$4 sm:$0xff]   ;;  %v7352_v58 = vld [vmem:[#allocation14 + $0x128] ss:$12 sps:$4 sm:$0xff]  }
 0xee0   : > { %7439 = vpow2.f32 %v3329_v59  ;;  %v7356_v59 = vld [vmem:[#allocation14 + $0x140] ss:$12 sps:$4 sm:$0xff]  }
 0xee8   : > { %v7438_v60 = vpop.eup %7437 }
 0xee9   : > { %v3331_v61 = vsel %vm2880_vm2, %v7438_v60, 0.0 }
 0xeea   : > { %v7440_v63 = vpop.eup %7439  ;;  %3332 = vadd.xlane.f32.xlu0 %v3331_v61  ;;  %v7357_v61 = vld [vmem:[#allocation14 + $0x150] ss:$12 sps:$4 sm:$0xff]  }
 0xeeb   : > { %v3334_v2 = vsel %vm2880_vm2, %v7440_v63, 0.0 }
 0xeec   : > { %3335 = vadd.xlane.f32.xlu1 %v3334_v2  ;;  %v7363_v2 = vld [vmem:[#allocation14 + $0x16c] ss:$12 sps:$4 sm:$0xff]  }
 0xefd   : > { %3106 = vrot.lane.b32.xlu1 %v8637_v52, %s7901_s13 }
 0xf00   : > { %3355 = vrot.lane.b32.xlu0 %v8566_v23, %s7901_s13 }
 0xf01   : > { %3108 = vrot.lane.b32.xlu1 %v8639_v55, %s7901_s13 }
 0xf04   : > { %3257 = vrot.lane.b32.xlu0 %v3249_v37, %s7900_s15  ;;  %v7341_v37 = vld [vmem:[#allocation14 + $0xf0] ss:$12 sps:$4 sm:$0xff]  }
 0xf05   : > { %3255 = vrot.lane.b32.xlu1 %v3246_v35, %s7900_s15  ;;  %v7337_v35 = vld [vmem:[#allocation14 + $0xd8] ss:$12 sps:$4 sm:$0xff]  }
 0xf77   : > { %v3333_v3 = vpop.xlane.xlu0 %3332 }
 0xf78   : > { %7441 = vrcp.f32 %v3333_v3  ;;  %v7361_v3 = vld [vmem:[#allocation14 + $0x168] ss:$12 sps:$4 sm:$0xff]  }
 0xf79   : > { %v3336_v4 = vpop.xlane.xlu1 %3335 }
 0xf7a   : > { %7443 = vrcp.f32 %v3336_v4  ;;  %v7364_v4 = vld [vmem:[#allocation14 + $0x170] ss:$12 sps:$4 sm:$0xff]  }
 0xf7b   : > { %v3356_v5 = vpop.permute.xlu0 %3355 }
 0xf7c   : > { %6789 = vmatpush3.bf16.msra.mxu1 %v3356_v5  ;;  %v5993_v5 = vld [vmem:[%s9302_s8] ss:$0 sm:$0xff] }
 0xf7d   : > { %v3107_v6 = vpop.permute.xlu1 %3106  ;;  %3710 = vmatprep.subr.bf16.mxu1 %v7335_v30 }
 0xf7e   : > { %3113 = vst.msk [vmem:[#allocation3] sm:$0xff] %vm3112_vm4, %v3107_v6 }
 0xf7f   : > { %v3258_v7 = vpop.permute.xlu0 %3257 }
 0xf81   : > { %v3109_v23 = vpop.permute.xlu1 %3108 }
 0xf82   : > { %v7442_v52 = vpop.eup %7441  ;;  %3114 = vst.msk [vmem:[#allocation3 + $0x8] sm:$0xff] %vm3112_vm4, %v3109_v23 }
 0xf83   : > { %v3339_v55 = vmul.f32 %v7442_v52, %v7438_v60  ;;  %3263 = vst.msk [vmem:[#allocation3 + $0x8] sm:$0xff] %vm3261_vm5, %v3258_v7  ;;  %v7359_v60 = vld [vmem:[#allocation14 + $0x154] ss:$12 sps:$4 sm:$0xff]  }
 0xf84   : > { %v7444_v8 = vpop.eup %7443 }
 0xf85   : > { %v3341_v9 = vmul.f32 %v3339_v55, %v8586_v53  ;;  %v3340_v10 = vmul.f32 %v7444_v8, %v7440_v63  ;;  %v3256_v11 = vpop.permute.xlu1 %3255  ;;  %v7360_v63 = vld [vmem:[#allocation14 + $0x158] ss:$12 sps:$4 sm:$0xff]  }
 0xf86   : > { %3262 = vst.msk [vmem:[#allocation3] sm:$0xff] %vm3261_vm5, %v3256_v11 }
 0xf87   : > { %v6138_v14 = vpack.c.bf16 %v3341_v9, %v3341_v9  ;;  %v3342_v16 = vmul.f32 %v3340_v10, %v8586_v53  ;;  %v3354_v17 = vpack.c.bf16 %v3340_v10, %v3339_v55 }
 0xf89   : > { %5990 = vst.msk [vmem:[%s8593_s28 + $0x18] sm:$0xf] %vm2913_vm3, %v6138_v14  ;;  %v6139_v18 = vpack.c.bf16 %v3342_v16, %v3342_v16  ;;  %6791 = vmatmul.mubr.msk.bf16.vlgmr.msra.gmra.mrb[44].mxu1 %vm2880_vm2, %v3354_v17  ;;  %v6002_v14 = vld [vmem:[%s9301_s19 + $0x3] sm:$0x7] }
 0xf8a   : > { %3742 = vmatprep.mubr.bf16.mxu1 %v7898_v34  ;;  %3711 = vmatpush1.bf16.msra.mxu1 %v7333_v29 }
 0xf8b   : > { %5991 = vst.msk [vmem:[%s8593_s28 + $0x1c] sm:$0xf] %vm2913_vm3, %v6139_v18  ;;  %3712 = vmatprep.subr.bf16.mxu1 %v7339_v13  ;;  %v3574_v18 = vrot.slane %v6002_v14, %v8548_v1 }
 0xf8e   : > { %3713 = vmatpush1.bf16.msra.mxu1 %v7337_v35 }
 0xf8f   : > { %3714 = vmatprep.subr.bf16.mxu1 %v7343_v36 }
 0xf92   : > { %3715 = vmatpush1.bf16.msra.mxu1 %v7341_v37 }
 0xf93   : > { %3716 = vmatprep.subr.bf16.mxu1 %v7347_v38 }
 0xf96   : > { %3717 = vmatpush1.bf16.msra.mxu1 %v7345_v39 }
 0xf97   : > { %3718 = vmatprep.subr.bf16.mxu1 %v7351_v40 }
 0xf9a   : > { %3719 = vmatpush1.bf16.msra.mxu1 %v7349_v41 }
 0xf9b   : > { %3720 = vmatprep.subr.bf16.mxu1 %v7355_v42 }
 0xf9e   : > { %3721 = vmatpush1.bf16.msra.mxu1 %v7353_v43 }
 0xf9f   : > { %3722 = vmatprep.subr.bf16.mxu1 %v7359_v60 }
 0xfa2   : > { %3723 = vmatpush1.bf16.msra.mxu1 %v7357_v61 }
 0xfa3   : > { %3724 = vmatprep.subr.bf16.mxu1 %v7363_v2 }
 0xfa6   : > { %3725 = vmatpush1.bf16.msra.mxu1 %v7361_v3 }
 0xfa7   : > { %6834 = vmatprep.subr.bf16.mxu1 %v7896_v0 }
0x105c   : > { %v3395_v28 = vpop.f32.mrb[44].mxu1 }
0x105d   : > { %3404 = vrot.lane.b32.xlu1 %v3395_v28, %s7899_s11  ;;  %v6792_v31 = vpop.f32.mrb[45].mxu1 }
0x105e   : > { %v3398_v32 = vpop.f32.mrb[46].mxu1 }
0x105f   : > { %3406 = vrot.lane.b32.xlu0 %v3398_v32, %s7899_s11  ;;  %v6793_v33 = vpop.f32.mrb[47].mxu1 }
0x10cf   : > { %v3405_v44 = vpop.permute.xlu1 %3404 }
0x10d0   : > { %3411 = vst.msk [vmem:[#allocation3] sm:$0xff] %vm3410_vm6, %v3405_v44 }
0x10d1   : > { %v3407_v45 = vpop.permute.xlu0 %3406 }
0x10d2   : > { %3412 = vst.msk [vmem:[#allocation3 + $0x8] sm:$0xff] %vm3410_vm6, %v3407_v45 }
0x10d7   : > { %v3413_v46 = vld [vmem:[#allocation3] sm:$0xff] }
0x10d9   : > { %v3414_v47 = vld [vmem:[#allocation3 + $0x8] sm:$0xff] }
0x10da   : > { %v3415_v51 = vpack.c.bf16 %v3414_v47, %v3413_v46 }
0x10dc   : > { %6811 = vmatmul.mubr.bf16.vlgmr.msra.gmra.mrb[8].mxu0 %v3415_v51 }
0x10dd   : > { %6815 = vmatpush3.bf16.msra.mxu0 %v7336_v48  ;;  %6830 = vmatprep.mubr.msk.bf16.mxu0 %vm7897_vm0, %v7896_v0 }
0x10de   : > { %6816 = vmatprep.subr.bf16.mxu0 %v7896_v0 }
0x10e1   : > { %6817 = vmatpush3.bf16.msra.mxu0 %v7340_v54 }
0x10e2   : > { %6818 = vmatprep.subr.bf16.mxu0 %v7896_v0 }
0x10e5   : > { %6819 = vmatpush3.bf16.msra.mxu0 %v7344_v56 }
0x10e6   : > { %6820 = vmatprep.subr.bf16.mxu0 %v7896_v0 }
0x10e9   : > { %6821 = vmatpush3.bf16.msra.mxu0 %v7348_v57 }
0x10ea   : > { %6822 = vmatprep.subr.bf16.mxu0 %v7896_v0 }
0x10ed   : > { %6823 = vmatpush3.bf16.msra.mxu0 %v7352_v58 }
0x10ee   : > { %6824 = vmatprep.subr.bf16.mxu0 %v7896_v0 }
0x10f1   : > { %6825 = vmatpush3.bf16.msra.mxu0 %v7356_v59 }
0x10f2   : > { %6826 = vmatprep.subr.bf16.mxu0 %v7896_v0 }
0x10f5   : > { %6827 = vmatpush3.bf16.msra.mxu0 %v7360_v63 }
0x10f6   : > { %6828 = vmatprep.subr.bf16.mxu0 %v7896_v0 }
0x10f9   : > { %6829 = vmatpush3.bf16.msra.mxu0 %v7364_v4 }
0x10fa   : > { %6882 = vmatprep.subr.bf16.mxu0 %v7896_v0 }
0x11af   : > { %v3521_v6 = vpop.f32.mrb[8].mxu0 }
0x11b0   : > { %v3522_v23 = vadd.f32 %v5993_v5, %v3521_v6  ;;  %v6812_v52 = vpop.f32.mrb[9].mxu0 }
0x11b1   : > { %v3524_v7 = vpop.f32.mrb[10].mxu0 }
0x11b2   : > { %v3525_v55 = vadd.f32 %v5993_v5, %v3524_v7  ;;  %v6813_v8 = vpop.f32.mrb[11].mxu0  ;;  %v8721_v9 = vadd.f32 %v3522_v23, %v8525_v49  ;;  %v3570_v49 = vrot.slane %v6002_v14, %v8543_v62 }
0x11b4   : > { %v8724_v10 = vadd.f32 %v3525_v55, %v8527_v50  ;;  %v3578_v50 = vrot.slane %v6002_v14, %v8563_v15 }
0x11b6   : > { %v3530_v11 = vpack.c.bf16 %v8724_v10, %v8721_v9 }
0x11b8   : > { %3743 = vmatmul.mubr.bf16.vlgmr.msra.gmra.mrb[48].mxu1 %v3530_v11  ;;  %6831 = vmatmul.mubr.bf16.vlgmr.msra.gmra.mrb[12].mxu0 %v3530_v11 }
0x11b9   : > { %6836 = vmatprep.mubr.msk.bf16.mxu1 %vm7897_vm0, %v7896_v0  ;;  %6898 = vmatprep.mubr.msk.bf16.mxu0 %vm7897_vm0, %v7896_v0 }
0x128b   : > { %v3744_v16 = vpop.f32.mrb[48].mxu1  ;;  %v3787_v17 = vpop.f32.mrb[12].mxu0 }
0x128c   : > { %v3746_v12 = vpop.f32.mrb[49].mxu1  ;;  %v6832_v19 = vpop.f32.mrb[13].mxu0  ;;  %v3745_v22 = vadd.f32 %v3744_v16, %v3570_v49  ;;  %v3788_v24 = vadd.f32 %v3787_v17, %v3578_v50 }
0x128d   : > { %v3748_v20 = vpop.f32.mrb[50].mxu1  ;;  %v3790_v21 = vpop.f32.mrb[14].mxu0  ;;  %v3747_v30 = vadd.f32 %v3746_v12, %v3574_v18 }
0x128e   : > { %v3749_v25 = vadd.f32 %v3748_v20, %v3570_v49  ;;  %v3791_v27 = vadd.f32 %v3790_v21, %v3578_v50  ;;  %v3750_v28 = vpop.f32.mrb[51].mxu1  ;;  %v6833_v29 = vpop.f32.mrb[15].mxu0 }
0x128f   : > { %v3751_v31 = vadd.f32 %v3750_v28, %v3574_v18 }
0x1290   : > { %v8738_v32 = vpack.c.bf16 %v3749_v25, %v3745_v22  ;;  %v8740_v13 = vpack.c.bf16 %v3791_v27, %v3788_v24 }
0x1291   : > { %v8742_v33 = vpack.c.bf16 %v3751_v31, %v3747_v30 }
0x1293   : > { %v3801_v35 = vsel %vm2828_vm1, %v8742_v33, 0 }
0x1294   : > { %6835 = vmatpush3.bf16.xpose.msra.mxu1 %v3801_v35 }
0x1295   : > { %6840 = vmatprep.subr.bf16.mxu1 %v7896_v0 }
0x129b   : > { %6837 = vmatmul.mubr.msk.bf16.vlgmr.msra.gmra.mrb[52].mxu1 %vm2828_vm1, %v8738_v32 }
0x129c   : > { %6841 = vmatpush3.bf16.msra.mxu1 %v8740_v13  ;;  %6842 = vmatprep.mubr.msk.bf16.mxu1 %vm7897_vm0, %v7896_v0 }
0x129d   : > { %6846 = vmatprep.subr.bf16.mxu1 %v7896_v0 }
0x136e   : > { %v3837_v36 = vpop.f32.mrb[52].mxu1 }
0x136f   : > { %v3844_v37 = vmul.f32 0.17677669, %v3837_v36  ;;  %v6838_v38 = vpop.f32.mrb[53].mxu1 }
0x1370   : > { %v3840_v39 = vpop.f32.mrb[54].mxu1 }
0x1371   : > { %v3845_v40 = vmul.f32 0.17677669, %v3840_v39  ;;  %v6839_v41 = vpop.f32.mrb[55].mxu1  ;;  %v3846_v42 = vadd.f32 %v3844_v37, %v8573_v26 }
0x1373   : > { %v3848_v43 = vsel %vm2880_vm2, %v3846_v42, -inf  ;;  %v3847_v44 = vadd.f32 %v3845_v40, %v8573_v26 }
0x1374   : > { %3849 = vmax.xlane.f32.xlu1 %v3848_v43 }
0x1375   : > { %v3851_v45 = vsel %vm2880_vm2, %v3847_v44, -inf }
0x1376   : > { %3852 = vmax.xlane.f32.xlu0 %v3851_v45 }
0x1385   : > { %3933 = vrot.lane.b32.xlu1 %v8742_v33, %s7899_s11 }
0x1401   : > { %v3850_v46 = vpop.xlane.xlu1 %3849 }
0x1402   : > { %v3854_v47 = vsub.f32 %v3846_v42, %v3850_v46 }
0x1403   : > { %v3853_v48 = vpop.xlane.xlu0 %3852 }
0x1404   : > { %v3856_v51 = vmul.f32 1.442695, %v3854_v47  ;;  %v3855_v54 = vsub.f32 %v3847_v44, %v3853_v48 }
0x1405   : > { %v3934_v52 = vpop.permute.xlu1 %3933 }
0x1406   : > { %7445 = vpow2.f32 %v3856_v51  ;;  %v3858_v56 = vmul.f32 1.442695, %v3855_v54  ;;  %v3939_v8 = vsel %vm2828_vm1, %v3934_v52, 0 }
0x1408   : > { %7447 = vpow2.f32 %v3858_v56 }
0x1410   : > { %v7446_v57 = vpop.eup %7445 }
0x1411   : > { %v3860_v58 = vsel %vm2880_vm2, %v7446_v57, 0.0 }
0x1412   : > { %v7448_v59 = vpop.eup %7447  ;;  %3861 = vadd.xlane.f32.xlu0 %v3860_v58 }
0x1413   : > { %v3863_v60 = vsel %vm2880_vm2, %v7448_v59, 0.0 }
0x1416   : > { %3864 = vadd.xlane.f32.xlu0 %v3863_v60 }
0x142c   : > { %3930 = vrot.lane.b32.xlu0 %v8738_v32, %s7899_s11 }
0x149f   : > { %v3862_v61 = vpop.xlane.xlu0 %3861 }
0x14a0   : > { %7449 = vrcp.f32 %v3862_v61 }
0x14a3   : > { %v3865_v63 = vpop.xlane.xlu0 %3864 }
0x14a4   : > { %7451 = vrcp.f32 %v3865_v63 }
0x14a7   : > { %v3931_v14 = vpop.permute.xlu0 %3930 }
0x14aa   : > { %v7450_v2 = vpop.eup %7449 }
0x14ab   : > { %v3868_v3 = vmul.f32 %v7450_v2, %v7446_v57 }
0x14ad   : > { %v3870_v4 = vmul.f32 %v3868_v3, %v8586_v53 }
0x14ae   : > { %v7452_v5 = vpop.eup %7451 }
0x14af   : > { %v6140_v6 = vpack.c.bf16 %v3870_v4, %v3870_v4  ;;  %v3869_v23 = vmul.f32 %v7452_v5, %v7448_v59 }
0x14b1   : > { %3880 = vst.msk [vmem:[%s8765_s23] sm:$0xf] %vm2913_vm3, %v6140_v6  ;;  %v3871_v7 = vmul.f32 %v3869_v23, %v8586_v53  ;;  %v3882_v55 = vpack.c.bf16 %v3869_v23, %v3868_v3 }
0x14b3   : > { %v6141_v11 = vpack.c.bf16 %v3871_v7, %v3871_v7  ;;  %6843 = vmatmul.mubr.msk.bf16.vlgmr.msra.gmra.mrb[56].mxu1 %vm2880_vm2, %v3882_v55 }
0x14b4   : > { %6847 = vmatpush3.bf16.xpose.msra.mxu1 %v3939_v8  ;;  %6848 = vmatprep.mubr.msk.bf16.mxu1 %vm7897_vm0, %v7896_v0 }
0x14b5   : > { %3881 = vst.msk [vmem:[%s8765_s23 + $0x4] sm:$0xf] %vm2913_vm3, %v6141_v11  ;;  %6852 = vmatprep.subr.bf16.mxu1 %v7896_v0 }
0x14bb   : > { %6849 = vmatmul.mubr.msk.bf16.vlgmr.msra.gmra.mrb[60].mxu1 %vm2828_vm1, %v3931_v14 }
0x14bc   : > { %6854 = vmatprep.mubr.msk.bf16.mxu1 %vm7897_vm0, %v7896_v0 }
0x1586   : > { %v3920_v49 = vpop.f32.mrb[56].mxu1 }
0x1587   : > { %3927 = vst.msk [vmem:[#allocation3] sm:$0xff] %vm2828_vm1, %v3920_v49  ;;  %v6844_v50 = vpop.f32.mrb[57].mxu1 }
0x1588   : > { %v3923_v16 = vpop.f32.mrb[58].mxu1 }
0x1589   : > { %3928 = vst.msk [vmem:[#allocation3 + $0x8] sm:$0xff] %vm2828_vm1, %v3923_v16  ;;  %v6845_v17 = vpop.f32.mrb[59].mxu1 }
0x158e   : > { %v3975_v18 = vpop.f32.mrb[60].mxu1 }
0x158f   : > { %v3982_v12 = vmul.f32 0.17677669, %v3975_v18  ;;  %v6850_v19 = vpop.f32.mrb[61].mxu1 }
0x1590   : > { %v3978_v20 = vpop.f32.mrb[62].mxu1 }
0x1591   : > { %v3983_v21 = vmul.f32 0.17677669, %v3978_v20  ;;  %v6851_v22 = vpop.f32.mrb[63].mxu1  ;;  %v3984_v24 = vadd.f32 %v3982_v12, %v8573_v26 }
0x1593   : > { %v3986_v25 = vsel %vm2880_vm2, %v3984_v24, -inf  ;;  %v3985_v27 = vadd.f32 %v3983_v21, %v8573_v26 }
0x1594   : > { %3987 = vmax.xlane.f32.xlu1 %v3986_v25 }
0x1595   : > { %v3989_v28 = vsel %vm2880_vm2, %v3985_v27, -inf }
0x1596   : > { %3990 = vmax.xlane.f32.xlu0 %v3989_v28 }
0x1621   : > { %v3988_v29 = vpop.xlane.xlu1 %3987 }
0x1622   : > { %v3992_v30 = vsub.f32 %v3984_v24, %v3988_v29 }
0x1623   : > { %v3991_v31 = vpop.xlane.xlu0 %3990 }
0x1624   : > { %v3994_v35 = vmul.f32 1.442695, %v3992_v30  ;;  %v3993_v36 = vsub.f32 %v3985_v27, %v3991_v31 }
0x1626   : > { %7453 = vpow2.f32 %v3994_v35  ;;  %v3996_v37 = vmul.f32 1.442695, %v3993_v36 }
0x1628   : > { %7455 = vpow2.f32 %v3996_v37 }
0x1630   : > { %v7454_v38 = vpop.eup %7453 }
0x1631   : > { %v3998_v39 = vsel %vm2880_vm2, %v7454_v38, 0.0 }
0x1632   : > { %v7456_v40 = vpop.eup %7455  ;;  %3999 = vadd.xlane.f32.xlu1 %v3998_v39 }
0x1633   : > { %v4001_v41 = vsel %vm2880_vm2, %v7456_v40, 0.0 }
0x1634   : > { %4002 = vadd.xlane.f32.xlu0 %v4001_v41 }
0x1643   : > { %4023 = vrot.lane.b32.xlu1 %v8740_v13, %s7899_s11 }
0x1647   : > { %4080 = vrot.lane.b32.xlu1 %v8738_v32, %s7900_s15 }
0x164a   : > { %4082 = vrot.lane.b32.xlu0 %v8742_v33, %s7900_s15 }
0x16bf   : > { %v4000_v42 = vpop.xlane.xlu1 %3999 }
0x16c0   : > { %7457 = vrcp.f32 %v4000_v42 }
0x16c1   : > { %v4003_v43 = vpop.xlane.xlu0 %4002 }
0x16c2   : > { %7459 = vrcp.f32 %v4003_v43 }
0x16c3   : > { %v4024_v44 = vpop.permute.xlu1 %4023 }
0x16c4   : > { %6853 = vmatpush3.bf16.msra.mxu1 %v4024_v44 }
0x16c5   : > { %6858 = vmatprep.subr.bf16.mxu1 %v7896_v0  ;;  %v4083_v54 = vpop.permute.xlu0 %4082 }
0x16c6   : > { %v4088_v60 = vsel %vm2828_vm1, %v4083_v54, 0 }
0x16c7   : > { %v4081_v61 = vpop.permute.xlu1 %4080 }
0x16ca   : > { %v7458_v45 = vpop.eup %7457 }
0x16cb   : > { %v4006_v46 = vmul.f32 %v7458_v45, %v7454_v38 }
0x16cc   : > { %v7460_v47 = vpop.eup %7459 }
0x16cd   : > { %v4008_v48 = vmul.f32 %v4006_v46, %v8586_v53  ;;  %v4007_v51 = vmul.f32 %v7460_v47, %v7456_v40 }
0x16cf   : > { %v6142_v56 = vpack.c.bf16 %v4008_v48, %v4008_v48  ;;  %v4009_v57 = vmul.f32 %v4007_v51, %v8586_v53  ;;  %v4021_v58 = vpack.c.bf16 %v4007_v51, %v4006_v46 }
0x16d1   : > { %6034 = vst.msk [vmem:[%s8765_s23 + $0x8] sm:$0xf] %vm2913_vm3, %v6142_v56  ;;  %v6143_v59 = vpack.c.bf16 %v4009_v57, %v4009_v57  ;;  %6855 = vmatmul.mubr.msk.bf16.vlgmr.msra.gmra.mrb[64].mxu1 %vm2880_vm2, %v4021_v58 }
0x16d2   : > { %6859 = vmatpush3.bf16.xpose.msra.mxu1 %v4088_v60  ;;  %6860 = vmatprep.mubr.msk.bf16.mxu1 %vm7897_vm0, %v7896_v0 }
0x16d3   : > { %6035 = vst.msk [vmem:[%s8765_s23 + $0xc] sm:$0xf] %vm2913_vm3, %v6143_v59  ;;  %6864 = vmatprep.subr.bf16.mxu1 %v7896_v0 }
0x16d9   : > { %6861 = vmatmul.mubr.msk.bf16.vlgmr.msra.gmra.mrb[68].mxu1 %vm2828_vm1, %v4081_v61 }
0x16da   : > { %6866 = vmatprep.mubr.msk.bf16.mxu1 %vm7897_vm0, %v7896_v0 }
0x17a4   : > { %v8809_v63 = vpop.f32.mrb[64].mxu1 }
0x17a5   : > { %v6856_v2 = vpop.f32.mrb[65].mxu1 }
0x17a6   : > { %v8811_v3 = vpop.f32.mrb[66].mxu1 }
0x17a7   : > { %v6857_v4 = vpop.f32.mrb[67].mxu1 }
0x17ac   : > { %v4124_v5 = vpop.f32.mrb[68].mxu1 }
0x17ad   : > { %v4131_v6 = vmul.f32 0.17677669, %v4124_v5  ;;  %v6862_v23 = vpop.f32.mrb[69].mxu1 }
0x17ae   : > { %v4127_v52 = vpop.f32.mrb[70].mxu1 }
0x17af   : > { %v4132_v7 = vmul.f32 0.17677669, %v4127_v52  ;;  %v6863_v55 = vpop.f32.mrb[71].mxu1  ;;  %v4133_v8 = vadd.f32 %v4131_v6, %v8573_v26 }
0x17b1   : > { %v4135_v11 = vsel %vm2880_vm2, %v4133_v8, -inf  ;;  %v4134_v14 = vadd.f32 %v4132_v7, %v8573_v26 }
0x17b2   : > { %4136 = vmax.xlane.f32.xlu1 %v4135_v11 }
0x17b3   : > { %v4138_v49 = vsel %vm2880_vm2, %v4134_v14, -inf }
0x17b4   : > { %4139 = vmax.xlane.f32.xlu0 %v4138_v49 }
0x183f   : > { %v4137_v50 = vpop.xlane.xlu1 %4136 }
0x1840   : > { %v4141_v16 = vsub.f32 %v4133_v8, %v4137_v50 }
0x1841   : > { %v4140_v17 = vpop.xlane.xlu0 %4139 }
0x1842   : > { %v4143_v18 = vmul.f32 1.442695, %v4141_v16  ;;  %v4142_v12 = vsub.f32 %v4134_v14, %v4140_v17 }
0x1844   : > { %7461 = vpow2.f32 %v4143_v18  ;;  %v4145_v19 = vmul.f32 1.442695, %v4142_v12 }
0x1846   : > { %7463 = vpow2.f32 %v4145_v19 }
0x184e   : > { %v7462_v20 = vpop.eup %7461 }
0x184f   : > { %v4147_v21 = vsel %vm2880_vm2, %v7462_v20, 0.0 }
0x1850   : > { %v7464_v22 = vpop.eup %7463  ;;  %4148 = vadd.xlane.f32.xlu0 %v4147_v21 }
0x1851   : > { %v4150_v24 = vsel %vm2880_vm2, %v7464_v22, 0.0 }
0x1852   : > { %4151 = vadd.xlane.f32.xlu1 %v4150_v24 }
0x1863   : > { %4230 = vrot.lane.b32.xlu1 %v8742_v33, %s7901_s13 }
0x1866   : > { %4171 = vrot.lane.b32.xlu0 %v8740_v13, %s7900_s15 }
0x1867   : > { %4228 = vrot.lane.b32.xlu1 %v8738_v32, %s7901_s13 }
0x18dd   : > { %v4149_v25 = vpop.xlane.xlu0 %4148 }
0x18de   : > { %7465 = vrcp.f32 %v4149_v25  ;;  %v7365_v25 = vld [vmem:[#allocation16 + $0x40] sm:$0xff]  }
0x18df   : > { %v4152_v27 = vpop.xlane.xlu1 %4151  ;;  %6883 = vmatpush3.bf16.msra.mxu0 %v7365_v25 }
0x18e0   : > { %7467 = vrcp.f32 %v4152_v27  ;;  %v7366_v27 = vld [vmem:[#allocation16 + $0x48] sm:$0xff]   ;;  %6884 = vmatprep.subr.bf16.mxu0 %v7896_v0 }
0x18e1   : > { %v4172_v28 = vpop.permute.xlu0 %4171 }
0x18e2   : > { %6865 = vmatpush3.bf16.msra.mxu1 %v4172_v28  ;;  %v7367_v28 = vld [vmem:[#allocation16 + $0x50] sm:$0xff]  }
0x18e3   : > { %6870 = vmatprep.subr.bf16.mxu1 %v7896_v0  ;;  %v4231_v36 = vpop.permute.xlu1 %4230  ;;  %6885 = vmatpush3.bf16.msra.mxu0 %v7366_v27 }
0x18e4   : > { %v4236_v40 = vsel %vm2828_vm1, %v4231_v36, 0  ;;  %6886 = vmatprep.subr.bf16.mxu0 %v7896_v0  ;;  %v7373_v36 = vld [vmem:[#allocation14 + $0x180] ss:$12 sps:$4 sm:$0xff]  }
0x18e7   : > { %v4229_v41 = vpop.permute.xlu1 %4228  ;;  %6887 = vmatpush3.bf16.msra.mxu0 %v7367_v28 }
0x18e8   : > { %v7466_v29 = vpop.eup %7465  ;;  %6888 = vmatprep.subr.bf16.mxu0 %v7896_v0 }
0x18e9   : > { %v4155_v30 = vmul.f32 %v7466_v29, %v7462_v20  ;;  %v7368_v29 = vld [vmem:[#allocation16 + $0x58] sm:$0xff]  }
0x18ea   : > { %v7468_v31 = vpop.eup %7467 }
0x18eb   : > { %v4157_v33 = vmul.f32 %v4155_v30, %v8586_v53  ;;  %v4156_v35 = vmul.f32 %v7468_v31, %v7464_v22  ;;  %6889 = vmatpush3.bf16.msra.mxu0 %v7368_v29  ;;  %v7371_v31 = vld [vmem:[#allocation16 + $0x70] sm:$0xff]  }
0x18ec   : > { %6890 = vmatprep.subr.bf16.mxu0 %v7896_v0 }
0x18ed   : > { %v6144_v37 = vpack.c.bf16 %v4157_v33, %v4157_v33  ;;  %v4158_v32 = vmul.f32 %v4156_v35, %v8586_v53  ;;  %v4170_v38 = vpack.c.bf16 %v4156_v35, %v4155_v30  ;;  %v7369_v30 = vld [vmem:[#allocation16 + $0x60] sm:$0xff]   ;;  %v7372_v33 = vld [vmem:[#allocation16 + $0x78] sm:$0xff]  }
0x18ef   : > { %6040 = vst.msk [vmem:[%s8765_s23 + $0x10] sm:$0xf] %vm2913_vm3, %v6144_v37  ;;  %v6145_v39 = vpack.c.bf16 %v4158_v32, %v4158_v32  ;;  %6867 = vmatmul.mubr.msk.bf16.vlgmr.msra.gmra.mrb[72].mxu1 %vm2880_vm2, %v4170_v38  ;;  %6891 = vmatpush3.bf16.msra.mxu0 %v7369_v30  ;;  %v7375_v37 = vld [vmem:[#allocation14 + $0x184] ss:$12 sps:$4 sm:$0xff]  }
0x18f0   : > { %6871 = vmatpush3.bf16.xpose.msra.mxu1 %v4236_v40  ;;  %6872 = vmatprep.mubr.msk.bf16.mxu1 %vm7897_vm0, %v7896_v0 }
0x18f1   : > { %6041 = vst.msk [vmem:[%s8765_s23 + $0x14] sm:$0xf] %vm2913_vm3, %v6145_v39  ;;  %6876 = vmatprep.subr.bf16.mxu1 %v7896_v0  ;;  %6892 = vmatprep.subr.bf16.mxu0 %v7896_v0  ;;  %v7379_v39 = vld [vmem:[#allocation14 + $0x19c] ss:$12 sps:$4 sm:$0xff]  }
0x18f7   : > { %6873 = vmatmul.mubr.msk.bf16.vlgmr.msra.gmra.mrb[76].mxu1 %vm2828_vm1, %v4229_v41  ;;  %v7377_v41 = vld [vmem:[#allocation14 + $0x198] ss:$12 sps:$4 sm:$0xff]  }
0x18f8   : > { %6878 = vmatprep.mubr.msk.bf16.mxu1 %vm7897_vm0, %v7896_v0 }
0x19c2   : > { %v4211_v42 = vpop.f32.mrb[72].mxu1 }
0x19c3   : > { %v6868_v43 = vpop.f32.mrb[73].mxu1 }
0x19c4   : > { %v4214_v44 = vpop.f32.mrb[74].mxu1  ;;  %v7381_v43 = vld [vmem:[#allocation14 + $0x1b0] ss:$12 sps:$4 sm:$0xff]  }
0x19c5   : > { %v6869_v45 = vpop.f32.mrb[75].mxu1 }
0x19c6   : > { %v7385_v45 = vld [vmem:[#allocation14 + $0x1c8] ss:$12 sps:$4 sm:$0xff]  }
0x19ca   : > { %v4272_v46 = vpop.f32.mrb[76].mxu1 }
0x19cb   : > { %v4279_v47 = vmul.f32 0.17677669, %v4272_v46  ;;  %v6874_v48 = vpop.f32.mrb[77].mxu1  ;;  %v7391_v46 = vld [vmem:[#allocation14 + $0x1e4] ss:$12 sps:$4 sm:$0xff]  }
0x19cc   : > { %v4275_v51 = vpop.f32.mrb[78].mxu1  ;;  %v7395_v48 = vld [vmem:[#allocation14 + $0x1fc] ss:$12 sps:$4 sm:$0xff]  }
0x19cd   : > { %v4280_v54 = vmul.f32 0.17677669, %v4275_v51  ;;  %v6875_v56 = vpop.f32.mrb[79].mxu1  ;;  %v4281_v57 = vadd.f32 %v4279_v47, %v8573_v26  ;;  %v7389_v47 = vld [vmem:[#allocation14 + $0x1e0] ss:$12 sps:$4 sm:$0xff]  }
0x19ce   : > { %v7393_v51 = vld [vmem:[#allocation14 + $0x1f8] ss:$12 sps:$4 sm:$0xff]  }
0x19cf   : > { %v4283_v58 = vsel %vm2880_vm2, %v4281_v57, -inf  ;;  %v4282_v59 = vadd.f32 %v4280_v54, %v8573_v26 }
0x19d0   : > { %4284 = vmax.xlane.f32.xlu1 %v4283_v58 }
0x19d1   : > { %v4286_v60 = vsel %vm2880_vm2, %v4282_v59, -inf }
0x19d2   : > { %4287 = vmax.xlane.f32.xlu0 %v4286_v60 }
0x19e1   : > { %4319 = vrot.lane.b32.xlu1 %v8740_v13, %s7901_s13 }
0x19e5   : > { %4074 = vrot.lane.b32.xlu1 %v8811_v3, %s7901_s13 }
0x19e9   : > { %4220 = vrot.lane.b32.xlu1 %v4211_v42, %s7900_s15  ;;  %v7383_v42 = vld [vmem:[#allocation14 + $0x1b4] ss:$12 sps:$4 sm:$0xff]  }
0x19ed   : > { %4222 = vrot.lane.b32.xlu1 %v4214_v44, %s7900_s15  ;;  %v7387_v44 = vld [vmem:[#allocation14 + $0x1cc] ss:$12 sps:$4 sm:$0xff]  }
0x1a5d   : > { %v4285_v61 = vpop.xlane.xlu1 %4284 }
0x1a5e   : > { %v4289_v2 = vsub.f32 %v4281_v57, %v4285_v61  ;;  %v7380_v61 = vld [vmem:[#allocation14 + $0x1a0] ss:$12 sps:$4 sm:$0xff]  }
0x1a5f   : > { %v4288_v4 = vpop.xlane.xlu0 %4287 }
0x1a60   : > { %v4291_v5 = vmul.f32 1.442695, %v4289_v2  ;;  %v4290_v6 = vsub.f32 %v4282_v59, %v4288_v4  ;;  %v7376_v59 = vld [vmem:[#allocation14 + $0x188] ss:$12 sps:$4 sm:$0xff]   ;;  %v7384_v2 = vld [vmem:[#allocation14 + $0x1b8] ss:$12 sps:$4 sm:$0xff]  }
0x1a61   : > { %v4320_v23 = vpop.permute.xlu1 %4319  ;;  %v7388_v4 = vld [vmem:[#allocation14 + $0x1d0] ss:$12 sps:$4 sm:$0xff]  }
0x1a62   : > { %7469 = vpow2.f32 %v4291_v5  ;;  %v4293_v52 = vmul.f32 1.442695, %v4290_v6  ;;  %6877 = vmatpush3.bf16.msra.mxu1 %v4320_v23  ;;  %v7392_v5 = vld [vmem:[#allocation14 + $0x1e8] ss:$12 sps:$4 sm:$0xff]   ;;  %v7396_v6 = vld [vmem:[#allocation14 + $0x200] ss:$12 sps:$4 sm:$0xff]  }
0x1a63   : > { %4675 = vmatprep.subr.bf16.mxu1 %v7375_v37  ;;  %v7399_v23 = vld [vmem:[#allocation14 + $0x214] ss:$12 sps:$4 sm:$0xff]  }
0x1a64   : > { %7471 = vpow2.f32 %v4293_v52  ;;  %v7397_v52 = vld [vmem:[#allocation14 + $0x210] ss:$12 sps:$4 sm:$0xff]  }
0x1a65   : > { %v4075_v7 = vpop.permute.xlu1 %4074 }
0x1a66   : > { %4079 = vst.msk [vmem:[#allocation3 + $0x8] sm:$0xff] %vm3112_vm4, %v4075_v7  ;;  %v7400_v7 = vld [vmem:[#allocation14 + $0x218] ss:$12 sps:$4 sm:$0xff]  }
0x1a69   : > { %v4221_v13 = vpop.permute.xlu1 %4220 }
0x1a6c   : > { %v7470_v55 = vpop.eup %7469 }
0x1a6d   : > { %v4223_v3 = vpop.permute.xlu1 %4222  ;;  %v4295_v8 = vsel %vm2880_vm2, %v7470_v55, 0.0 }
0x1a6e   : > { %v7472_v11 = vpop.eup %7471  ;;  %4227 = vst.msk [vmem:[#allocation3 + $0x8] sm:$0xff] %vm3261_vm5, %v4223_v3  ;;  %4296 = vadd.xlane.f32.xlu0 %v4295_v8  ;;  %v7404_v3 = vld [vmem:[#allocation14 + $0x230] ss:$12 sps:$4 sm:$0xff]   ;;  %v6050_v8 = vld [vmem:[%s9302_s8 + $0x1] ss:$0 sm:$0xff] }
0x1a6f   : > { %v4298_v14 = vsel %vm2880_vm2, %v7472_v11, 0.0 }
0x1a72   : > { %4299 = vadd.xlane.f32.xlu0 %v4298_v14 }
0x1a88   : > { %4072 = vrot.lane.b32.xlu0 %v8809_v63, %s7901_s13 }
0x1afb   : > { %v4297_v49 = vpop.xlane.xlu0 %4296 }
0x1afc   : > { %7473 = vrcp.f32 %v4297_v49 }
0x1aff   : > { %v4300_v50 = vpop.xlane.xlu0 %4299 }
0x1b00   : > { %7475 = vrcp.f32 %v4300_v50 }
0x1b03   : > { %v4073_v16 = vpop.permute.xlu0 %4072 }
0x1b04   : > { %4078 = vst.msk [vmem:[#allocation3] sm:$0xff] %vm3112_vm4, %v4073_v16 }
0x1b05   : > { %4226 = vst.msk [vmem:[#allocation3] sm:$0xff] %vm3261_vm5, %v4221_v13  ;;  %v7403_v13 = vld [vmem:[#allocation14 + $0x22c] ss:$12 sps:$4 sm:$0xff]  }
0x1b06   : > { %v7474_v17 = vpop.eup %7473 }
0x1b07   : > { %v4303_v18 = vmul.f32 %v7474_v17, %v7470_v55  ;;  %v7401_v55 = vld [vmem:[#allocation14 + $0x228] ss:$12 sps:$4 sm:$0xff]  }
0x1b09   : > { %v4305_v12 = vmul.f32 %v4303_v18, %v8586_v53 }
0x1b0a   : > { %v7476_v19 = vpop.eup %7475 }
0x1b0b   : > { %v6146_v20 = vpack.c.bf16 %v4305_v12, %v4305_v12  ;;  %v4304_v21 = vmul.f32 %v7476_v19, %v7472_v11 }
0x1b0d   : > { %6046 = vst.msk [vmem:[%s8765_s23 + $0x18] sm:$0xf] %vm2913_vm3, %v6146_v20  ;;  %v4306_v63 = vmul.f32 %v4304_v21, %v8586_v53  ;;  %v4318_v22 = vpack.c.bf16 %v4304_v21, %v4303_v18  ;;  %v6059_v20 = vld [vmem:[%s9301_s19 + $0x6] sm:$0x7] }
0x1b0f   : > { %v6147_v24 = vpack.c.bf16 %v4306_v63, %v4306_v63  ;;  %6879 = vmatmul.mubr.msk.bf16.vlgmr.msra.gmra.mrb[80].mxu1 %vm2880_vm2, %v4318_v22  ;;  %v4539_v22 = vrot.slane %v6059_v20, %v8548_v1 }
0x1b10   : > { %4707 = vmatprep.mubr.bf16.mxu1 %v7898_v34  ;;  %v7370_v34 = vld [vmem:[#allocation16 + $0x68] sm:$0xff]   ;;  %4676 = vmatpush1.bf16.msra.mxu1 %v7373_v36 }
0x1b11   : > { %6047 = vst.msk [vmem:[%s8765_s23 + $0x1c] sm:$0xf] %vm2913_vm3, %v6147_v24  ;;  %6893 = vmatpush3.bf16.msra.mxu0 %v7370_v34  ;;  %4677 = vmatprep.subr.bf16.mxu1 %v7379_v39 }
0x1b12   : > { %6894 = vmatprep.subr.bf16.mxu0 %v7896_v0 }
0x1b14   : > { %4678 = vmatpush1.bf16.msra.mxu1 %v7377_v41 }
0x1b15   : > { %6895 = vmatpush3.bf16.msra.mxu0 %v7371_v31  ;;  %4679 = vmatprep.subr.bf16.mxu1 %v7383_v42 }
0x1b16   : > { %6896 = vmatprep.subr.bf16.mxu0 %v7896_v0 }
0x1b18   : > { %4680 = vmatpush1.bf16.msra.mxu1 %v7381_v43 }
0x1b19   : > { %6897 = vmatpush3.bf16.msra.mxu0 %v7372_v33  ;;  %4681 = vmatprep.subr.bf16.mxu1 %v7387_v44 }
0x1b1a   : > { %6902 = vmatprep.subr.bf16.mxu0 %v7896_v0 }
0x1b1c   : > { %4682 = vmatpush1.bf16.msra.mxu1 %v7385_v45 }
0x1b1d   : > { %4683 = vmatprep.subr.bf16.mxu1 %v7391_v46 }
0x1b20   : > { %4684 = vmatpush1.bf16.msra.mxu1 %v7389_v47 }
0x1b21   : > { %4685 = vmatprep.subr.bf16.mxu1 %v7395_v48 }
0x1b24   : > { %4686 = vmatpush1.bf16.msra.mxu1 %v7393_v51 }
0x1b25   : > { %4687 = vmatprep.subr.bf16.mxu1 %v7399_v23 }
0x1b28   : > { %4688 = vmatpush1.bf16.msra.mxu1 %v7397_v52 }
0x1b29   : > { %4689 = vmatprep.subr.bf16.mxu1 %v7403_v13 }
0x1b2c   : > { %4690 = vmatpush1.bf16.msra.mxu1 %v7401_v55 }
0x1b2d   : > { %6922 = vmatprep.subr.bf16.mxu1 %v7896_v0 }
0x1be2   : > { %v4359_v35 = vpop.f32.mrb[80].mxu1 }
0x1be3   : > { %4368 = vrot.lane.b32.xlu0 %v4359_v35, %s7899_s11  ;;  %v6880_v32 = vpop.f32.mrb[81].mxu1 }
0x1be4   : > { %v4362_v38 = vpop.f32.mrb[82].mxu1 }
0x1be5   : > { %4370 = vrot.lane.b32.xlu1 %v4362_v38, %s7899_s11  ;;  %v6881_v40 = vpop.f32.mrb[83].mxu1 }
0x1c55   : > { %v4369_v54 = vpop.permute.xlu0 %4368 }
0x1c56   : > { %4374 = vst.msk [vmem:[#allocation3] sm:$0xff] %vm3410_vm6, %v4369_v54 }
0x1c57   : > { %v4371_v56 = vpop.permute.xlu1 %4370 }
0x1c58   : > { %4375 = vst.msk [vmem:[#allocation3 + $0x8] sm:$0xff] %vm3410_vm6, %v4371_v56 }
0x1c5d   : > { %v4376_v57 = vld [vmem:[#allocation3] sm:$0xff] }
0x1c5f   : > { %v4377_v58 = vld [vmem:[#allocation3 + $0x8] sm:$0xff] }
0x1c60   : > { %v4378_v60 = vpack.c.bf16 %v4377_v58, %v4376_v57 }
0x1c62   : > { %6899 = vmatmul.mubr.bf16.vlgmr.msra.gmra.mrb[16].mxu0 %v4378_v60 }
0x1c63   : > { %6903 = vmatpush3.bf16.msra.mxu0 %v7376_v59  ;;  %6918 = vmatprep.mubr.msk.bf16.mxu0 %vm7897_vm0, %v7896_v0 }
0x1c64   : > { %6904 = vmatprep.subr.bf16.mxu0 %v7896_v0 }
0x1c67   : > { %6905 = vmatpush3.bf16.msra.mxu0 %v7380_v61 }
0x1c68   : > { %6906 = vmatprep.subr.bf16.mxu0 %v7896_v0 }
0x1c6b   : > { %6907 = vmatpush3.bf16.msra.mxu0 %v7384_v2 }
0x1c6c   : > { %6908 = vmatprep.subr.bf16.mxu0 %v7896_v0 }
0x1c6f   : > { %6909 = vmatpush3.bf16.msra.mxu0 %v7388_v4 }
0x1c70   : > { %6910 = vmatprep.subr.bf16.mxu0 %v7896_v0 }
0x1c73   : > { %6911 = vmatpush3.bf16.msra.mxu0 %v7392_v5 }
0x1c74   : > { %6912 = vmatprep.subr.bf16.mxu0 %v7896_v0 }
0x1c77   : > { %6913 = vmatpush3.bf16.msra.mxu0 %v7396_v6 }
0x1c78   : > { %6914 = vmatprep.subr.bf16.mxu0 %v7896_v0 }
0x1c7b   : > { %6915 = vmatpush3.bf16.msra.mxu0 %v7400_v7 }
0x1c7c   : > { %6916 = vmatprep.subr.bf16.mxu0 %v7896_v0 }
0x1c7f   : > { %6917 = vmatpush3.bf16.msra.mxu0 %v7404_v3 }
0x1c80   : > { %6946 = vmatprep.subr.bf16.mxu0 %v7896_v0 }
0x1d35   : > { %v4486_v11 = vpop.f32.mrb[16].mxu0 }
0x1d36   : > { %v4487_v14 = vadd.f32 %v6050_v8, %v4486_v11  ;;  %v6900_v49 = vpop.f32.mrb[17].mxu0 }
0x1d37   : > { %v4489_v50 = vpop.f32.mrb[18].mxu0 }
0x1d38   : > { %v4490_v16 = vadd.f32 %v6050_v8, %v4489_v50  ;;  %v6901_v17 = vpop.f32.mrb[19].mxu0  ;;  %v8893_v18 = vadd.f32 %v4487_v14, %v8721_v9  ;;  %v4535_v9 = vrot.slane %v6059_v20, %v8543_v62 }
0x1d3a   : > { %v8896_v12 = vadd.f32 %v4490_v16, %v8724_v10  ;;  %v4543_v10 = vrot.slane %v6059_v20, %v8563_v15 }
0x1d3c   : > { %v4495_v19 = vpack.c.bf16 %v8896_v12, %v8893_v18 }
0x1d3e   : > { %4708 = vmatmul.mubr.bf16.vlgmr.msra.gmra.mrb[84].mxu1 %v4495_v19  ;;  %6919 = vmatmul.mubr.bf16.vlgmr.msra.gmra.mrb[20].mxu0 %v4495_v19 }
0x1d3f   : > { %6924 = vmatprep.mubr.msk.bf16.mxu1 %vm7897_vm0, %v7896_v0  ;;  %6948 = vmatprep.mubr.msk.bf16.mxu0 %vm7897_vm0, %v7896_v0 }
0x1e11   : > { %v4709_v21 = vpop.f32.mrb[84].mxu1  ;;  %v4752_v63 = vpop.f32.mrb[20].mxu0 }
0x1e12   : > { %v4711_v24 = vpop.f32.mrb[85].mxu1  ;;  %v6920_v25 = vpop.f32.mrb[21].mxu0  ;;  %v4710_v29 = vadd.f32 %v4709_v21, %v4535_v9  ;;  %v4753_v30 = vadd.f32 %v4752_v63, %v4543_v10 }
0x1e13   : > { %v4713_v27 = vpop.f32.mrb[86].mxu1  ;;  %v4755_v28 = vpop.f32.mrb[22].mxu0  ;;  %v4712_v36 = vadd.f32 %v4711_v24, %v4539_v22 }
0x1e14   : > { %v4714_v34 = vadd.f32 %v4713_v27, %v4535_v9  ;;  %v4756_v31 = vadd.f32 %v4755_v28, %v4543_v10  ;;  %v4715_v33 = vpop.f32.mrb[87].mxu1  ;;  %v6921_v35 = vpop.f32.mrb[23].mxu0 }
0x1e15   : > { %v4716_v37 = vadd.f32 %v4715_v33, %v4539_v22 }
0x1e16   : > { %v4759_v32 = vpack.c.bf16 %v4714_v34, %v4710_v29  ;;  %v8910_v62 = vpack.c.bf16 %v4756_v31, %v4753_v30 }
0x1e17   : > { %v4760_v15 = vpack.c.bf16 %v4716_v37, %v4712_v36 }
0x1e19   : > { %v4766_v38 = vsel %vm2828_vm1, %v4760_v15, 0 }
0x1e1a   : > { %6923 = vmatpush3.bf16.xpose.msra.mxu1 %v4766_v38 }
0x1e1b   : > { %6928 = vmatprep.subr.bf16.mxu1 %v7896_v0 }
0x1e21   : > { %6925 = vmatmul.mubr.msk.bf16.vlgmr.msra.gmra.mrb[88].mxu1 %vm2828_vm1, %v4759_v32 }
0x1e22   : > { %6929 = vmatpush3.bf16.msra.mxu1 %v8910_v62  ;;  %6930 = vmatprep.mubr.msk.bf16.mxu1 %vm7897_vm0, %v7896_v0 }
0x1e23   : > { %6934 = vmatprep.subr.bf16.mxu1 %v7896_v0 }
0x1ef4   : > { %v4802_v1 = vpop.f32.mrb[88].mxu1 }
0x1ef5   : > { %v4809_v39 = vmul.f32 0.17677669, %v4802_v1  ;;  %v6926_v40 = vpop.f32.mrb[89].mxu1 }
0x1ef6   : > { %v4805_v41 = vpop.f32.mrb[90].mxu1 }
0x1ef7   : > { %v4810_v42 = vmul.f32 0.17677669, %v4805_v41  ;;  %v6927_v43 = vpop.f32.mrb[91].mxu1  ;;  %v4811_v44 = vadd.f32 %v4809_v39, %v8573_v26 }
0x1ef9   : > { %v4813_v45 = vsel %vm2880_vm2, %v4811_v44, -inf  ;;  %v4812_v46 = vadd.f32 %v4810_v42, %v8573_v26 }
0x1efa   : > { %4814 = vmax.xlane.f32.xlu0 %v4813_v45 }
0x1efb   : > { %v4816_v47 = vsel %vm2880_vm2, %v4812_v46, -inf }
0x1efc   : > { %4817 = vmax.xlane.f32.xlu1 %v4816_v47 }
0x1f0d   : > { %4895 = vrot.lane.b32.xlu1 %v4759_v32, %s7899_s11 }
0x1f11   : > { %5047 = vrot.lane.b32.xlu1 %v4760_v15, %s7900_s15 }
0x1f15   : > { %5045 = vrot.lane.b32.xlu1 %v4759_v32, %s7900_s15 }
0x1f19   : > { %5193 = vrot.lane.b32.xlu1 %v4759_v32, %s7901_s13 }
0x1f87   : > { %v4815_v48 = vpop.xlane.xlu0 %4814 }
0x1f88   : > { %v4819_v51 = vsub.f32 %v4811_v44, %v4815_v48 }
0x1f89   : > { %v4818_v54 = vpop.xlane.xlu1 %4817 }
0x1f8a   : > { %v4821_v56 = vmul.f32 1.442695, %v4819_v51  ;;  %v4820_v57 = vsub.f32 %v4812_v46, %v4818_v54 }
0x1f8c   : > { %7477 = vpow2.f32 %v4821_v56  ;;  %v4823_v58 = vmul.f32 1.442695, %v4820_v57 }
0x1f8d   : > { %v4896_v59 = vpop.permute.xlu1 %4895 }
0x1f8e   : > { %7479 = vpow2.f32 %v4823_v58 }
0x1f91   : > { %v5048_v60 = vpop.permute.xlu1 %5047 }
0x1f92   : > { %v5053_v61 = vsel %vm2828_vm1, %v5048_v60, 0 }
0x1f93   : > { %6947 = vmatpush3.bf16.xpose.msra.mxu0 %v5053_v61 }
0x1f94   : > { %6958 = vmatprep.subr.bf16.mxu0 %v7896_v0 }
0x1f95   : > { %v5046_v6 = vpop.permute.xlu1 %5045 }
0x1f96   : > { %v7478_v2 = vpop.eup %7477 }
0x1f97   : > { %v4825_v4 = vsel %vm2880_vm2, %v7478_v2, 0.0 }
0x1f98   : > { %v7480_v5 = vpop.eup %7479  ;;  %4826 = vadd.xlane.f32.xlu0 %v4825_v4 }
0x1f99   : > { %v4828_v23 = vsel %vm2880_vm2, %v7480_v5, 0.0  ;;  %v5194_v20 = vpop.permute.xlu1 %5193 }
0x1f9a   : > { %6949 = vmatmul.mubr.msk.bf16.vlgmr.msra.gmra.mrb[24].mxu0 %vm2828_vm1, %v5046_v6 }
0x1f9b   : > { %6960 = vmatprep.mubr.msk.bf16.mxu0 %vm7897_vm0, %v7896_v0 }
0x1f9c   : > { %4829 = vadd.xlane.f32.xlu0 %v4828_v23 }
0x1fb2   : > { %4898 = vrot.lane.b32.xlu0 %v4760_v15, %s7899_s11 }
0x1fb6   : > { %5195 = vrot.lane.b32.xlu0 %v4760_v15, %s7901_s13 }
0x2025   : > { %v4827_v52 = vpop.xlane.xlu0 %4826 }
0x2026   : > { %7481 = vrcp.f32 %v4827_v52 }
0x2029   : > { %v4830_v7 = vpop.xlane.xlu0 %4829 }
0x202a   : > { %7483 = vrcp.f32 %v4830_v7 }
0x202d   : > { %v4899_v13 = vpop.permute.xlu0 %4898 }
0x202e   : > { %v4904_v10 = vsel %vm2828_vm1, %v4899_v13, 0 }
0x2030   : > { %v7482_v55 = vpop.eup %7481 }
0x2031   : > { %v4833_v3 = vmul.f32 %v7482_v55, %v7478_v2  ;;  %v5196_v8 = vpop.permute.xlu0 %5195 }
0x2032   : > { %v5201_v11 = vsel %vm2828_vm1, %v5196_v8, 0 }
0x2033   : > { %v4835_v14 = vmul.f32 %v4833_v3, %v8586_v53  ;;  %6959 = vmatpush3.bf16.xpose.msra.mxu0 %v5201_v11 }
0x2034   : > { %v7484_v49 = vpop.eup %7483  ;;  %6970 = vmatprep.subr.bf16.mxu0 %v7896_v0 }
0x2035   : > { %v6148_v50 = vpack.c.bf16 %v4835_v14, %v4835_v14  ;;  %v4834_v16 = vmul.f32 %v7484_v49, %v7480_v5 }
0x2037   : > { %4845 = vst.msk [vmem:[%s8940_s21] sm:$0xf] %vm2913_vm3, %v6148_v50  ;;  %v4836_v17 = vmul.f32 %v4834_v16, %v8586_v53  ;;  %v4847_v19 = vpack.c.bf16 %v4834_v16, %v4833_v3 }
0x2039   : > { %v6149_v9 = vpack.c.bf16 %v4836_v17, %v4836_v17  ;;  %6931 = vmatmul.mubr.msk.bf16.vlgmr.msra.gmra.mrb[92].mxu1 %vm2880_vm2, %v4847_v19 }
0x203a   : > { %6935 = vmatpush3.bf16.xpose.msra.mxu1 %v4904_v10  ;;  %6961 = vmatmul.mubr.msk.bf16.vlgmr.msra.gmra.mrb[28].mxu0 %vm2828_vm1, %v5194_v20 }
0x203b   : > { %4846 = vst.msk [vmem:[%s8940_s21 + $0x4] sm:$0xf] %vm2913_vm3, %v6149_v9  ;;  %6936 = vmatprep.mubr.msk.bf16.mxu1 %vm7897_vm0, %v7896_v0  ;;  %6940 = vmatprep.subr.bf16.mxu1 %v7896_v0 }
0x203c   : > { %6986 = vmatprep.mubr.msk.bf16.mxu0 %vm7897_vm0, %v7896_v0 }
0x2041   : > { %6937 = vmatmul.mubr.msk.bf16.vlgmr.msra.gmra.mrb[96].mxu1 %vm2828_vm1, %v4896_v59 }
0x2042   : > { %6942 = vmatprep.mubr.msk.bf16.mxu1 %vm7897_vm0, %v7896_v0 }
0x206d   : > { %v5089_v21 = vpop.f32.mrb[24].mxu0 }
0x206e   : > { %v6950_v63 = vpop.f32.mrb[25].mxu0  ;;  %v5096_v36 = vmul.f32 0.17677669, %v5089_v21 }
0x206f   : > { %v5092_v22 = vpop.f32.mrb[26].mxu0 }
0x2070   : > { %v6951_v24 = vpop.f32.mrb[27].mxu0  ;;  %v5097_v41 = vmul.f32 0.17677669, %v5092_v22  ;;  %v5098_v44 = vadd.f32 %v5096_v36, %v8573_v26 }
0x2072   : > { %v5100_v48 = vsel %vm2880_vm2, %v5098_v44, -inf  ;;  %v5099_v51 = vadd.f32 %v5097_v41, %v8573_v26 }
0x2074   : > { %v5103_v56 = vsel %vm2880_vm2, %v5099_v51, -inf }
0x210c   : > { %v4885_v25 = vpop.f32.mrb[92].mxu1 }
0x210d   : > { %4892 = vst.msk [vmem:[#allocation3] sm:$0xff] %vm2828_vm1, %v4885_v25  ;;  %v6932_v27 = vpop.f32.mrb[93].mxu1  ;;  %v5237_v28 = vpop.f32.mrb[28].mxu0 }
0x210e   : > { %v4888_v29 = vpop.f32.mrb[94].mxu1  ;;  %v6962_v30 = vpop.f32.mrb[29].mxu0  ;;  %v5244_v47 = vmul.f32 0.17677669, %v5237_v28 }
0x210f   : > { %4893 = vst.msk [vmem:[#allocation3 + $0x8] sm:$0xff] %vm2828_vm1, %v4888_v29  ;;  %v6933_v34 = vpop.f32.mrb[95].mxu1  ;;  %v5240_v31 = vpop.f32.mrb[30].mxu0 }
0x2110   : > { %v6963_v33 = vpop.f32.mrb[31].mxu0  ;;  %v5245_v38 = vmul.f32 0.17677669, %v5240_v31  ;;  %v5246_v57 = vadd.f32 %v5244_v47, %v8573_v26 }
0x2112   : > { %v5247_v46 = vadd.f32 %v5245_v38, %v8573_v26  ;;  %v5248_v58 = vsel %vm2880_vm2, %v5246_v57, -inf }
0x2114   : > { %v4940_v35 = vpop.f32.mrb[96].mxu1  ;;  %v5251_v54 = vsel %vm2880_vm2, %v5247_v46, -inf }
0x2115   : > { %v4947_v37 = vmul.f32 0.17677669, %v4940_v35  ;;  %v6938_v32 = vpop.f32.mrb[97].mxu1 }
0x2116   : > { %v4943_v15 = vpop.f32.mrb[98].mxu1 }
0x2117   : > { %v4948_v1 = vmul.f32 0.17677669, %v4943_v15  ;;  %v6939_v39 = vpop.f32.mrb[99].mxu1  ;;  %v4949_v40 = vadd.f32 %v4947_v37, %v8573_v26 }
0x2119   : > { %v4951_v42 = vsel %vm2880_vm2, %v4949_v40, -inf  ;;  %v4950_v43 = vadd.f32 %v4948_v1, %v8573_v26 }
0x211a   : > { %4952 = vmax.xlane.f32.xlu0 %v4951_v42 }
0x211b   : > { %v4954_v45 = vsel %vm2880_vm2, %v4950_v43, -inf }
0x211c   : > { %4955 = vmax.xlane.f32.xlu1 %v4954_v45 }
0x211e   : > { %5101 = vmax.xlane.f32.xlu0 %v5100_v48 }
0x2120   : > { %5252 = vmax.xlane.f32.xlu1 %v5251_v54 }
0x2122   : > { %5104 = vmax.xlane.f32.xlu0 %v5103_v56 }
0x2126   : > { %5249 = vmax.xlane.f32.xlu0 %v5248_v58 }
0x21a7   : > { %v4953_v59 = vpop.xlane.xlu0 %4952 }
0x21a8   : > { %v4957_v7 = vsub.f32 %v4949_v40, %v4953_v59 }
0x21a9   : > { %v4956_v60 = vpop.xlane.xlu1 %4955 }
0x21aa   : > { %v4958_v13 = vsub.f32 %v4950_v43, %v4956_v60  ;;  %v4959_v11 = vmul.f32 1.442695, %v4957_v7  ;;  %v7409_v7 = vld [vmem:[#allocation16 + $0xa0] sm:$0xff]  }
0x21ab   : > { %v5102_v61 = vpop.xlane.xlu0 %5101 }
0x21ac   : > { %v5106_v2 = vsub.f32 %v5098_v44, %v5102_v61  ;;  %v4961_v14 = vmul.f32 1.442695, %v4958_v13 }
0x21ad   : > { %v5253_v4 = vpop.xlane.xlu1 %5252 }
0x21ae   : > { %v5108_v5 = vmul.f32 1.442695, %v5106_v2  ;;  %v5255_v6 = vsub.f32 %v5247_v46, %v5253_v4 }
0x21af   : > { %v5105_v23 = vpop.xlane.xlu0 %5104 }
0x21b0   : > { %7485 = vpow2.f32 %v5108_v5  ;;  %v5107_v52 = vsub.f32 %v5099_v51, %v5105_v23  ;;  %v5258_v55 = vmul.f32 1.442695, %v5255_v6  ;;  %v7405_v5 = vld [vmem:[#allocation16 + $0x80] sm:$0xff]   ;;  %v7406_v6 = vld [vmem:[#allocation16 + $0x88] sm:$0xff]   ;;  %v7407_v23 = vld [vmem:[#allocation16 + $0x90] sm:$0xff]  }
0x21b1   : > { %6971 = vmatpush3.bf16.msra.mxu0 %v7405_v5 }
0x21b2   : > { %v5110_v3 = vmul.f32 1.442695, %v5107_v52  ;;  %6972 = vmatprep.subr.bf16.mxu0 %v7896_v0  ;;  %v7408_v52 = vld [vmem:[#allocation16 + $0x98] sm:$0xff]  }
0x21b3   : > { %v5250_v8 = vpop.xlane.xlu0 %5249 }
0x21b4   : > { %7487 = vpow2.f32 %v5110_v3  ;;  %v5254_v26 = vsub.f32 %v5246_v57, %v5250_v8 }
0x21b5   : > { %7489 = vpow2.f32 %v5258_v55  ;;  %6973 = vmatpush3.bf16.msra.mxu0 %v7406_v6 }
0x21b6   : > { %v5256_v49 = vmul.f32 1.442695, %v5254_v26  ;;  %6974 = vmatprep.subr.bf16.mxu0 %v7896_v0  ;;  %v7410_v26 = vld [vmem:[#allocation16 + $0xa8] sm:$0xff]  }
0x21b8   : > { %7491 = vpow2.f32 %v5256_v49 }
0x21b9   : > { %7493 = vpow2.f32 %v4959_v11  ;;  %6975 = vmatpush3.bf16.msra.mxu0 %v7407_v23  ;;  %v7411_v11 = vld [vmem:[#allocation16 + $0xb0] sm:$0xff]  }
0x21ba   : > { %v7486_v50 = vpop.eup %7485  ;;  %7495 = vpow2.f32 %v4961_v14  ;;  %6976 = vmatprep.subr.bf16.mxu0 %v7896_v0 }
0x21bb   : > { %v5112_v16 = vsel %vm2880_vm2, %v7486_v50, 0.0 }
0x21bc   : > { %5113 = vadd.xlane.f32.xlu0 %v5112_v16  ;;  %v7412_v16 = vld [vmem:[#allocation16 + $0xb8] sm:$0xff]  }
0x21bd   : > { %6977 = vmatpush3.bf16.msra.mxu0 %v7408_v52 }
0x21be   : > { %v7488_v17 = vpop.eup %7487  ;;  %6978 = vmatprep.subr.bf16.mxu0 %v7896_v0 }
0x21bf   : > { %v5115_v19 = vsel %vm2880_vm2, %v7488_v17, 0.0  ;;  %v7490_v20 = vpop.eup %7489 }
0x21c0   : > { %5116 = vadd.xlane.f32.xlu1 %v5115_v19  ;;  %v5263_v63 = vsel %vm2880_vm2, %v7490_v20, 0.0 }
0x21c1   : > { %6979 = vmatpush3.bf16.msra.mxu0 %v7409_v7 }
0x21c2   : > { %v7492_v9 = vpop.eup %7491  ;;  %6980 = vmatprep.subr.bf16.mxu0 %v7896_v0 }
0x21c3   : > { %v7494_v10 = vpop.eup %7493  ;;  %v5260_v21 = vsel %vm2880_vm2, %v7492_v9, 0.0 }
0x21c4   : > { %v7496_v22 = vpop.eup %7495  ;;  %5261 = vadd.xlane.f32.xlu0 %v5260_v21  ;;  %5264 = vadd.xlane.f32.xlu1 %v5263_v63  ;;  %v4963_v24 = vsel %vm2880_vm2, %v7494_v10, 0.0 }
0x21c5   : > { %v4966_v25 = vsel %vm2880_vm2, %v7496_v22, 0.0  ;;  %6981 = vmatpush3.bf16.msra.mxu0 %v7410_v26 }
0x21c6   : > { %6982 = vmatprep.subr.bf16.mxu0 %v7896_v0 }
0x21c8   : > { %4964 = vadd.xlane.f32.xlu0 %v4963_v24  ;;  %4967 = vadd.xlane.f32.xlu1 %v4966_v25 }
0x21c9   : > { %6983 = vmatpush3.bf16.msra.mxu0 %v7411_v11 }
0x21ca   : > { %6984 = vmatprep.subr.bf16.mxu0 %v7896_v0 }
0x21cd   : > { %6985 = vmatpush3.bf16.msra.mxu0 %v7412_v16 }
0x21d9   : > { %5136 = vrot.lane.b32.xlu1 %v8910_v62, %s7900_s15 }
0x21dd   : > { %5284 = vrot.lane.b32.xlu1 %v8910_v62, %s7901_s13 }
0x21de   : > { %4988 = vrot.lane.b32.xlu0 %v8910_v62, %s7899_s11 }
0x2249   : > { %v5114_v27 = vpop.xlane.xlu0 %5113 }
0x224a   : > { %7497 = vrcp.f32 %v5114_v27 }
0x224d   : > { %v5117_v28 = vpop.xlane.xlu1 %5116 }
0x224e   : > { %7499 = vrcp.f32 %v5117_v28 }
0x2251   : > { %v5262_v29 = vpop.xlane.xlu0 %5261  ;;  %v5265_v30 = vpop.xlane.xlu1 %5264 }
0x2252   : > { %7501 = vrcp.f32 %v5262_v29 }
0x2253   : > { %7503 = vrcp.f32 %v5265_v30 }
0x2254   : > { %v7498_v34 = vpop.eup %7497 }
0x2255   : > { %v5120_v31 = vmul.f32 %v7498_v34, %v7486_v50  ;;  %v4965_v33 = vpop.xlane.xlu0 %4964  ;;  %v4968_v35 = vpop.xlane.xlu1 %4967 }
0x2256   : > { %7505 = vrcp.f32 %v4965_v33 }
0x2257   : > { %v5122_v36 = vmul.f32 %v5120_v31, %v8586_v53  ;;  %7507 = vrcp.f32 %v4968_v35 }
0x2258   : > { %v7500_v37 = vpop.eup %7499 }
0x2259   : > { %v6152_v62 = vpack.c.bf16 %v5122_v36, %v5122_v36  ;;  %v5121_v32 = vmul.f32 %v7500_v37, %v7488_v17  ;;  %v4989_v15 = vpop.permute.xlu0 %4988  ;;  %v5137_v61 = vpop.permute.xlu1 %5136 }
0x225a   : > { %6941 = vmatpush3.bf16.msra.mxu1 %v4989_v15 }
0x225b   : > { %6097 = vst.msk [vmem:[%s8940_s21 + $0x10] sm:$0xf] %vm2913_vm3, %v6152_v62  ;;  %v5123_v38 = vmul.f32 %v5121_v32, %v8586_v53  ;;  %6952 = vmatprep.subr.bf16.mxu1 %v7896_v0  ;;  %v5135_v2 = vpack.c.bf16 %v5121_v32, %v5120_v31 }
0x225c   : > { %v7502_v1 = vpop.eup %7501 }
0x225d   : > { %v7504_v39 = vpop.eup %7503  ;;  %v6153_v40 = vpack.c.bf16 %v5123_v38, %v5123_v38  ;;  %v5268_v41 = vmul.f32 %v7502_v1, %v7492_v9  ;;  %v5285_v4 = vpop.permute.xlu1 %5284 }
0x225e   : > { %v5269_v42 = vmul.f32 %v7504_v39, %v7490_v20 }
0x225f   : > { %6098 = vst.msk [vmem:[%s8940_s21 + $0x14] sm:$0xf] %vm2913_vm3, %v6153_v40  ;;  %v5270_v43 = vmul.f32 %v5268_v41, %v8586_v53 }
0x2260   : > { %v7506_v44 = vpop.eup %7505  ;;  %v5271_v45 = vmul.f32 %v5269_v42, %v8586_v53 }
0x2261   : > { %v7508_v46 = vpop.eup %7507  ;;  %v6154_v47 = vpack.c.bf16 %v5270_v43, %v5270_v43  ;;  %v4971_v48 = vmul.f32 %v7506_v44, %v7494_v10 }
0x2262   : > { %v6155_v51 = vpack.c.bf16 %v5271_v45, %v5271_v45  ;;  %v4972_v54 = vmul.f32 %v7508_v46, %v7496_v22 }
0x2263   : > { %6103 = vst.msk [vmem:[%s8940_s21 + $0x18] sm:$0xf] %vm2913_vm3, %v6154_v47  ;;  %v4973_v56 = vmul.f32 %v4971_v48, %v8586_v53 }
0x2264   : > { %6104 = vst.msk [vmem:[%s8940_s21 + $0x1c] sm:$0xf] %vm2913_vm3, %v6155_v51  ;;  %v4974_v57 = vmul.f32 %v4972_v54, %v8586_v53  ;;  %v4986_v58 = vpack.c.bf16 %v4972_v54, %v4971_v48  ;;  %v5283_v53 = vpack.c.bf16 %v5269_v42, %v5268_v41 }
0x2265   : > { %v6150_v59 = vpack.c.bf16 %v4973_v56, %v4973_v56 }
0x2266   : > { %v6151_v60 = vpack.c.bf16 %v4974_v57, %v4974_v57  ;;  %6943 = vmatmul.mubr.msk.bf16.vlgmr.msra.gmra.mrb[100].mxu1 %vm2880_vm2, %v4986_v58 }
0x2267   : > { %6091 = vst.msk [vmem:[%s8940_s21 + $0x8] sm:$0xf] %vm2913_vm3, %v6150_v59  ;;  %6953 = vmatpush3.bf16.msra.mxu1 %v5137_v61  ;;  %6954 = vmatprep.mubr.msk.bf16.mxu1 %vm7897_vm0, %v7896_v0 }
0x2268   : > { %6092 = vst.msk [vmem:[%s8940_s21 + $0xc] sm:$0xf] %vm2913_vm3, %v6151_v60  ;;  %6964 = vmatprep.subr.bf16.mxu1 %v7896_v0 }
0x226e   : > { %6955 = vmatmul.mubr.msk.bf16.vlgmr.msra.gmra.mrb[104].mxu1 %vm2880_vm2, %v5135_v2 }
0x226f   : > { %6965 = vmatpush3.bf16.msra.mxu1 %v5285_v4  ;;  %6966 = vmatprep.mubr.msk.bf16.mxu1 %vm7897_vm0, %v7896_v0 }
0x2276   : > { %6967 = vmatmul.mubr.msk.bf16.vlgmr.msra.gmra.mrb[108].mxu1 %vm2880_vm2, %v5283_v53 }
0x2339   : > { %v5028_v13 = vpop.f32.mrb[100].mxu1 }
0x233a   : > { %5037 = vrot.lane.b32.xlu1 %v5028_v13, %s7901_s13  ;;  %v6944_v55 = vpop.f32.mrb[101].mxu1 }
0x233b   : > { %v5031_v3 = vpop.f32.mrb[102].mxu1 }
0x233c   : > { %5039 = vrot.lane.b32.xlu0 %v5031_v3, %s7901_s13  ;;  %v6945_v8 = vpop.f32.mrb[103].mxu1  ;;  %s9037_s13 = scalar_lea.hbm %s9304_s18, %s9031_s16 }
0x2341   : > { %v5176_v14 = vpop.f32.mrb[104].mxu1 }
0x2342   : > { %5185 = vrot.lane.b32.xlu1 %v5176_v14, %s7900_s15  ;;  %v6956_v49 = vpop.f32.mrb[105].mxu1 }
0x2343   : > { %v5179_v50 = vpop.f32.mrb[106].mxu1 }
0x2344   : > { %5187 = vrot.lane.b32.xlu0 %v5179_v50, %s7900_s15  ;;  %v6957_v17 = vpop.f32.mrb[107].mxu1 }
0x2349   : > { %v5324_v19 = vpop.f32.mrb[108].mxu1 }
0x234a   : > { %5333 = vrot.lane.b32.xlu1 %v5324_v19, %s7899_s11  ;;  %v6968_v20 = vpop.f32.mrb[109].mxu1 }
0x234b   : > { %v5327_v9 = vpop.f32.mrb[110].mxu1 }
0x234c   : > { %5335 = vrot.lane.b32.xlu0 %v5327_v9, %s7899_s11  ;;  %v6969_v10 = vpop.f32.mrb[111].mxu1 }
0x23ac   : > { %v5038_v21 = vpop.permute.xlu1 %5037 }
0x23ad   : > { %5043 = vst.msk [vmem:[#allocation3] sm:$0xff] %vm3112_vm4, %v5038_v21 }
0x23ae   : > { %v5040_v63 = vpop.permute.xlu0 %5039 }
0x23af   : > { %5044 = vst.msk [vmem:[#allocation3 + $0x8] sm:$0xff] %vm3112_vm4, %v5040_v63 }
0x23b4   : > { %v5186_v22 = vpop.permute.xlu1 %5185 }
0x23b5   : > { %5191 = vst.msk [vmem:[#allocation3] sm:$0xff] %vm3261_vm5, %v5186_v22 }
0x23b6   : > { %v5188_v0 = vpop.permute.xlu0 %5187 }
0x23b7   : > { %5192 = vst.msk [vmem:[#allocation3 + $0x8] sm:$0xff] %vm3261_vm5, %v5188_v0 }
0x23bc   : > { %v5334_v24 = vpop.permute.xlu1 %5333 }
0x23bd   : > { %5339 = vst.msk [vmem:[#allocation3] sm:$0xff] %vm3410_vm6, %v5334_v24 }
0x23be   : > { %v5336_v25 = vpop.permute.xlu0 %5335 }
0x23bf   : > { %5340 = vst.msk [vmem:[#allocation3 + $0x8] sm:$0xff] %vm3410_vm6, %v5336_v25 }
0x23c4   : > { %v5341_v27 = vld [vmem:[#allocation3] sm:$0xff] }
0x23c6   : > { %v5342_v28 = vld [vmem:[#allocation3 + $0x8] sm:$0xff] }
0x23c7   : > { %v5343_v29 = vpack.c.bf16 %v5342_v28, %v5341_v27 }
0x23c9   : > { %6987 = vmatmul.mubr.bf16.vlgmr.msra.gmra.mrb[32].mxu0 %v5343_v29 }
0x23ca   : > { %7724 = shalt.err (!%p7721_p12)
}
0x23cb   : > { %s7725_s30 = scalar_lea.hbm %s9037_s13, 512  ;;  %s7729_s3 = scalar_lea.hbm %s9304_s18, 1024 }
0x23cc   : > { %p7726_p10 = scmp.ne.s32.totalorder %s9037_s13, %s7725_s30  ;;  %p7730_p1 = scmp.lt.u32.totalorder %s9037_s13, %s9304_s18 }
0x23cd   : > { %p7731_p6 = scmp.lt.u32.totalorder %s7729_s3, %s7725_s30  ;;  %p7733_p5 = scmp.lt.u32.totalorder %s7725_s30, %s9037_s13 }
0x23ce   : > { %p7727_p8 = pnand %p7726_p10, %p9305_p2 }
0x23cf   : > { %p7732_p3 = por %p7731_p6, %p7730_p1 }
0x23d0   : > { %p7728_p0 = pneg %p7727_p8 }
0x23d1   : > { %p7734_p4 = por %p7733_p5, %p7732_p3 }
0x23d3   : > { %p7735_p11 = pnand %p7734_p4, %p7728_p0 }
0x23d5   : > { %7738 = shalt.err (!%p7735_p11)
}
0x23d6   : > { %s7903_s9 = smov 4   ;;  %s9306_s1 = sld [smem:[#allocation46_spill]] }
0x23d7   : > { %7061 = dma.vmem_to_hbm [thread:$0]  (%p9305_p2), %s9040_s0, 512, %s9037_s13, %s9044_s22, %s7900_s15, %s7900_s15, %s7903_s9  }
0x23d8   : > { %s5523_s28 = sshll.u32 %s8765_s23, 4  ;;  %s7904_s3 = smov [#allocation20]   ;;  %s9078_s28 = int_to_ptr.vmem [resolvable:$true] %s5523_s28 }
0x23d9   : > { %s7739_s17 = scalar_lea.vmem %s9078_s28, 512  ;;  %s7743_s14 = sshll.u32 %s7904_s3, 4  ;;  %s7744_s14 = int_to_ptr.vmem [resolvable:$false] %s7743_s14 }
0x23da   : > { %p7740_p13 = scmp.ne.s32.totalorder %s9078_s28, %s7739_s17  ;;  %s7745_s13 = scalar_lea.vmem %s7744_s14, 1024 }
0x23db   : > { %p7746_p12 = scmp.lt.s32.totalorder %s9078_s28, %s7744_s14  ;;  %p7747_p10 = scmp.lt.s32.totalorder %s7745_s13, %s7739_s17 }
0x23dc   : > { %s9075_s30 = scalar_lea.hbm %s9306_s1, %s9031_s16  ;;  %p7741_p9 = pnand %p7740_p13, %p9305_p2 }
0x23dd   : > { %p7748_p8 = por %p7747_p10, %p7746_p12 }
0x23de   : > { %p7742_p7 = pneg %p7741_p9 }
0x23e0   : > { %p7749_p0 = pnand %p7748_p8, %p7742_p7 }
0x23e2   : > { %7752 = shalt.err (!%p7749_p0)
}
0x23e3   : > { %s7753_s23 = scalar_lea.hbm %s9075_s30, 512  ;;  %s7757_s25 = scalar_lea.hbm %s9306_s1, 1024 }
0x23e4   : > { %p7754_p1 = scmp.ne.s32.totalorder %s9075_s30, %s7753_s23  ;;  %p7758_p5 = scmp.lt.u32.totalorder %s9075_s30, %s9306_s1 }
0x23e5   : > { %p7759_p4 = scmp.lt.u32.totalorder %s7757_s25, %s7753_s23  ;;  %p7761_p13 = scmp.lt.u32.totalorder %s7753_s23, %s9075_s30 }
0x23e6   : > { %p7755_p6 = pnand %p7754_p1, %p9305_p2 }
0x23e7   : > { %p7760_p11 = por %p7759_p4, %p7758_p5 }
0x23e8   : > { %p7756_p3 = pneg %p7755_p6 }
0x23e9   : > { %p7762_p9 = por %p7761_p13, %p7760_p11 }
0x23eb   : > { %p7763_p7 = pnand %p7762_p9, %p7756_p3 }
0x23ed   : > { %7766 = shalt.err (!%p7763_p7)
}
0x23ee   : > { %7062 = dma.vmem_to_hbm [thread:$0]  (%p9305_p2), %s9078_s28, 512, %s9075_s30, %s9044_s22, %s7900_s15, %s7900_s15, %s7903_s9  }
0x23ef   : > { %s9307_s13 = sld [smem:[#allocation47_spill]]  ;;  %s5539_s0 = sshll.u32 %s8940_s21, 4  ;;  %s9112_s0 = int_to_ptr.vmem [resolvable:$true] %s5539_s0 }
0x23f0   : > { %s5478_s11 = scalar_lea.sflag [#allocation22], %s8288_s6  ;;  %s7767_s25 = scalar_lea.vmem %s9112_s0, 512 }
0x23f1   : > { %p7768_p12 = scmp.ne.s32.totalorder %s9112_s0, %s7767_s25  ;;  %s7905_s20 = smov [#allocation21]  }
0x23f2   : > { %s7771_s3 = sshll.u32 %s7905_s20, 4  ;;  %s7772_s3 = int_to_ptr.vmem [resolvable:$false] %s7771_s3 }
0x23f3   : > { %p7769_p10 = pnand %p7768_p12, %p9305_p2  ;;  %s7773_s22 = scalar_lea.vmem %s7772_s3, 1024 }
0x23f4   : > { %p7774_p0 = scmp.lt.s32.totalorder %s9112_s0, %s7772_s3  ;;  %p7775_p1 = scmp.lt.s32.totalorder %s7773_s22, %s7767_s25 }
0x23f5   : > { %s9109_s23 = scalar_lea.hbm %s9307_s13, %s9031_s16  ;;  %p7770_p8 = pneg %p7769_p10 }
0x23f6   : > { %p7776_p6 = por %p7775_p1, %p7774_p0 }
0x23f8   : > { %p7777_p3 = pnand %p7776_p6, %p7770_p8 }
0x23fa   : > { %7780 = shalt.err (!%p7777_p3)
}
0x23fb   : > { %s7781_s21 = scalar_lea.hbm %s9109_s23, 512  ;;  %s7785_s28 = scalar_lea.hbm %s9307_s13, 1024 }
0x23fc   : > { %p7782_p5 = scmp.ne.s32.totalorder %s9109_s23, %s7781_s21  ;;  %p7786_p13 = scmp.lt.u32.totalorder %s9109_s23, %s9307_s13 }
0x23fd   : > { %p7787_p9 = scmp.lt.u32.totalorder %s7785_s28, %s7781_s21  ;;  %p7789_p12 = scmp.lt.u32.totalorder %s7781_s21, %s9109_s23 }
0x23fe   : > { %p7783_p4 = pnand %p7782_p5, %p9305_p2 }
0x23ff   : > { %p7788_p7 = por %p7787_p9, %p7786_p13 }
0x2400   : > { %p7784_p11 = pneg %p7783_p4 }
0x2401   : > { %p7790_p10 = por %p7789_p12, %p7788_p7 }
0x2403   : > { %p7791_p8 = pnand %p7790_p10, %p7784_p11 }
0x2405   : > { %7794 = shalt.err (!%p7791_p8)
}
0x2406   : > { %7063 = dma.vmem_to_hbm [thread:$0]  (%p9305_p2), %s9112_s0, 512, %s9109_s23, %s5478_s11, %s7900_s15, %s7900_s15, %s7903_s9  }
0x2407   : > { %v6107_v30 = vld [vmem:[%s9302_s8 + $0x2] ss:$0 sm:$0xff]  ;;  %s676_s3 = scalar_lea.vmem [#allocation17], %s8291_s10  ;;  %s6156_s21 = sshll.u32 %s8018_s12, 8 }
0x2408   : > { %s5491_s22 = sshll.u32 %s676_s3, 4  ;;  %s9308_s23 = sld [smem:[#allocation44_spill]]  ;;  %s9147_s22 = int_to_ptr.vmem [resolvable:$true] %s5491_s22 }
0x2409   : > { %s5463_s12 = scalar_lea.sflag [#allocation7], %s8288_s6  ;;  %s7795_s10 = scalar_lea.vmem %s9147_s22, 256 }
0x240a   : > { %p7796_p0 = scmp.ne.s32.totalorder %s9147_s22, %s7795_s10  ;;  %s7906_s16 = smov [#allocation17]  }
0x240b   : > { %s7799_s30 = sshll.u32 %s7906_s16, 4  ;;  %s7800_s30 = int_to_ptr.vmem [resolvable:$false] %s7799_s30 }
0x240c   : > { %p7797_p1 = pnand %p7796_p0, %p9305_p2  ;;  %s7801_s28 = scalar_lea.vmem %s7800_s30, 512 }
0x240d   : > { %p7802_p3 = scmp.lt.s32.totalorder %s9147_s22, %s7800_s30  ;;  %p7803_p5 = scmp.lt.s32.totalorder %s7801_s28, %s7795_s10 }
0x240e   : > { %s9309_s0 = smov %s9308_s23  ;;  %s9152_s11 = scalar_lea.hbm %s9308_s23, %s6156_s21 }
0x240f   : > { %p7798_p6 = pneg %p7797_p1  ;;  %p7804_p4 = por %p7803_p5, %p7802_p3 }
0x2411   : > { %p7805_p11 = pnand %p7804_p4, %p7798_p6 }
0x249c   : > { %v5451_v34 = vpop.f32.mrb[32].mxu0 }
0x249d   : > { %v5452_v31 = vadd.f32 %v6107_v30, %v5451_v34  ;;  %v6988_v33 = vpop.f32.mrb[33].mxu0 }
0x249e   : > { %v5454_v35 = vpop.f32.mrb[34].mxu0 }
0x249f   : > { %v5458_v36 = vadd.f32 %v5452_v31, %v8893_v18  ;;  %v5455_v37 = vadd.f32 %v6107_v30, %v5454_v35  ;;  %v6989_v62 = vpop.f32.mrb[35].mxu0 }
0x24a1   : > { %5460 = vst [vmem:[%s676_s3] sm:$0xff] %v5458_v36  ;;  %v5459_v32 = vadd.f32 %v5455_v37, %v8896_v12 }
0x24a3   : > { %5461 = vst [vmem:[%s676_s3 + $0x8] sm:$0xff] %v5459_v32 }
0x24a4   : > { %7808 = shalt.err (!%p7805_p11)
}
0x24a5   : > { %s7809_s17 = scalar_lea.hbm %s9152_s11, 256  ;;  %s7813_s20 = scalar_lea.hbm %s9309_s0, 512 }
0x24a6   : > { %p7810_p13 = scmp.ne.s32.totalorder %s9152_s11, %s7809_s17  ;;  %p7814_p12 = scmp.lt.u32.totalorder %s9152_s11, %s9309_s0 }
0x24a7   : > { %p7815_p10 = scmp.lt.u32.totalorder %s7813_s20, %s7809_s17  ;;  %p7817_p0 = scmp.lt.u32.totalorder %s7809_s17, %s9152_s11 }
0x24a8   : > { %p7811_p9 = pnand %p7810_p13, %p9305_p2 }
0x24a9   : > { %p7816_p8 = por %p7815_p10, %p7814_p12 }
0x24aa   : > { %p7812_p7 = pneg %p7811_p9 }
0x24ab   : > { %p7818_p1 = por %p7817_p0, %p7816_p8 }
0x24ad   : > { %p7819_p6 = pnand %p7818_p1, %p7812_p7 }
0x24af   : > { %7822 = shalt.err (!%p7819_p6)
}
0x24b0   : > { %s7907_s15 = smov 128   ;;  %s7908_s9 = smov 8  }
0x24b1   : > { %7060 = dma.vmem_to_hbm [thread:$0]  (%p9305_p2), %s9147_s22, 256, %s9152_s11, %s5463_s12, %s7907_s15, %s7907_s15, %s7908_s9  }
0x24b2 PF: > { %s9310_s23 = sld [smem:[#allocation30_spill]]  ;;  %s9311_s10 = sld [smem:[#allocation32_spill]] }
0x24b3   : > { %p9313_p5 = scmp.ge.s32.totalorder %s7881_s26, 2 }
0x24b8   : > { %s5554_s16 = sand.u32 1, %s9310_s23   ;;  %p9312_p3 = scmp.ne.s32.totalorder %s9311_s10, 0 }
0x24b9   : > { %s5555_s30 = scalar_lea.sflag [#allocation7], %s5554_s16 }
0x24ba   : > { %p7092_p4 = pnand %p9313_p5, %p9312_p3 }
0x24bc   : > { %7856 = dma.done.wait (!%p7092_p4), %s5555_s30, 256  }
0x24bd   : > { %7858 = vsyncadd (!%p7092_p4), %s5555_s30, 4294967040  ;;  %s9314_s28 = sadd.s32 4294967294, %s7881_s26  }
0x24be   : > { %s5563_s17 = sand.u32 1, %s9314_s28  }
0x24bf   : > { %s5564_s14 = scalar_lea.sflag [#allocation19], %s5563_s17 }
0x24c0   : > { %7860 = dma.done.wait (!%p7092_p4), %s5564_s14, 1024  }
0x24c1   : > { %7862 = vsyncadd (!%p7092_p4), %s5564_s14, 4294966272  ;;  %s5582_s29 = scalar_lea.sflag [#allocation22], %s5554_s16 }
0x24c2   : > { %7864 = dma.done.wait (!%p7092_p4), %s5582_s29, 512  }
0x24c3   : > { %7866 = vsyncadd (!%p7092_p4), %s5582_s29, 4294966784  ;;  %s9315_s26 = sld [smem:[#allocation33_spill]]  ;;  %s9316_s6 = sld [smem:[#allocation31_spill]] }
0x24c4   : > { %s9317_s25 = sld [smem:[#allocation34_spill]]  ;;  %s9318_s23 = smov %s7873_s24 }
0x24c9   : > { %p42_p2 = scmp.ge.s32.totalorder %s9315_s26, 4   ;;  %s9319_s24 = smov %s9316_s6 }
0x24cb   :  { %44 = sbr.rel (!%p42_p2) target bundleno = 27 (0x1b), region = 241 }
0x24d2   :  { %5587 = vsyncpa [#allocation6], 1 }
0x24d3   :  { %5589 = vsyncpa [#allocation6 + $0x1], 1 }
0x24d4   :  { %5590 = vsyncpa [#allocation9], 1 }
0x24d5   :  { %5592 = vsyncpa [#allocation9 + $0x1], 1 }
0x24d6   :  { %5593 = vsyncpa [#allocation12], 1 }
0x24d7   :  { %5594 = vsyncpa [#allocation15], 1 }
0x24d8   :  { %5595 = vsyncpa [#allocation7], 1 }
0x24d9   :  { %5597 = vsyncpa [#allocation7 + $0x1], 1 }
0x24da   :  { %5598 = vsyncpa [#allocation19], 1 }
0x24db   :  { %5600 = vsyncpa [#allocation19 + $0x1], 1 }
0x24dc   :  { %5601 = vsyncpa [#allocation22], 1 }
0x24dd   :  { %5603 = vsyncpa [#allocation22 + $0x1], 1 }

</bundles_post_ra>
